<compile_context>
chip_gen: v5e
topology: v5e:2x2
jax: 0.10.0
libtpu: 0.0.40
codegen_flags: <defaults>
</compile_context>

<pallas_src>
import functools

import jax
import jax.numpy as jnp
from jax.experimental import pallas as pl
from jax.experimental.pallas import tpu as pltpu

LRELU_SLOPE = 0.2
BN_EPS = 1e-5
LANE = 128                       # channel padding target (lane width)
MAX_TM = 512                     # max im2col rows per tile
VMEM_LIMIT = 32 * 1024 * 1024    # explicit scoped-VMEM budget (safe on v5e/v6e/v7x)


def _round_up(x, m):
    return (x + m - 1) // m * m


# ----------------------------- Pallas kernels ------------------------------ #
def _matmul_stats_kernel(p_ref, w_ref, y_ref, stats_ref, *, act_out):
    """conv-as-matmul (+ optional fused LeakyReLU epilogue) + per-tile BN stats.

    p_ref:     (TM, K)      bf16 im2col patch tile
    w_ref:     (K, Cpad)    bf16 packed weight (zero-padded to 128 lanes)
    y_ref:     (TM, Cpad)   layer output tile
    stats_ref: (1, 2, Cpad) per-tile [sum, sum-of-squares] over the M rows
    """
    acc = jnp.dot(p_ref[...], w_ref[...], preferred_element_type=jnp.float32)

    s = jnp.sum(acc, axis=0, keepdims=True)            # (1, Cpad)
    sq = jnp.sum(acc * acc, axis=0, keepdims=True)      # (1, Cpad)
    stats_ref[...] = jnp.concatenate([s, sq], axis=0)[None]

    if act_out:
        acc = jnp.where(acc > 0, acc, LRELU_SLOPE * acc)
    y_ref[...] = acc.astype(y_ref.dtype)


def _bn_act_kernel(y_ref, scale_ref, shift_ref, o_ref, *, act):
    """Affine BatchNorm application (+ optional fused LeakyReLU epilogue)."""
    y = y_ref[...] * scale_ref[...] + shift_ref[...]
    if act:
        y = jnp.where(y > 0, y, LRELU_SLOPE * y)
    o_ref[...] = y.astype(o_ref.dtype)


# ------------------------------ glue (JAX) --------------------------------- #
def _im2col_nhwc(x, k, stride, pad):
    """x: (N,H,W,C) -> patch matrix (N*Ho*Wo, k*k*C); K ordered (kh, kw, c)."""
    N, H, W, C = x.shape
    xp = jnp.pad(x, ((0, 0), (pad, pad), (pad, pad), (0, 0)))
    Ho = (H + 2 * pad - k) // stride + 1
    Wo = (W + 2 * pad - k) // stride + 1
    cols = [
        xp[:, kh:kh + (Ho - 1) * stride + 1:stride,
              kw:kw + (Wo - 1) * stride + 1:stride, :]
        for kh in range(k) for kw in range(k)
    ]
    p = jnp.concatenate(cols, axis=-1)                   # (N, Ho, Wo, k*k*C)
    return p.reshape(N * Ho * Wo, k * k * C), (N, Ho, Wo)


def _pack_weight(w, cin_pad, cout_pad):
    """PyTorch (Cout,Cin,kh,kw) -> (kh*kw*cin_pad, cout_pad), zero-padded, bf16."""
    cout, cin, kh, kw = w.shape
    wt = jnp.transpose(w, (2, 3, 1, 0))                  # (kh, kw, Cin, Cout)
    wt = jnp.pad(wt, ((0, 0), (0, 0), (0, cin_pad - cin), (0, cout_pad - cout)))
    return wt.reshape(kh * kw * cin_pad, cout_pad).astype(jnp.bfloat16)


def conv_stage(h, w, gamma, beta, *, stride, pad, bn, act_out,
               out_dtype=jnp.bfloat16):
    """One Discriminator stage: Conv2d(4x4, bias=False) [+BN] [+LeakyReLU epilogue].

    h is NHWC with channels possibly zero-padded to 128; output keeps that
    convention (real channels first, padded channels stay exactly zero).
    """
    cout, cin, kh, kw = w.shape
    N, H, W, C = h.shape
    cpad = _round_up(cout, LANE)

    p, (N, Ho, Wo) = _im2col_nhwc(h, kh, stride, pad)
    M, K = p.shape
    wm = _pack_weight(w, C, cpad)                        # (K, cpad)

    tm = min(MAX_TM, _round_up(M, 8))
    m_pad = _round_up(M, tm)
    if m_pad != M:
        p = jnp.pad(p, ((0, m_pad - M), (0, 0)))
    p = p.astype(jnp.bfloat16)
    n_tiles = m_pad // tm

    y_dtype = jnp.float32 if bn else out_dtype
    y, stats = pl.pallas_call(
        functools.partial(_matmul_stats_kernel, act_out=(act_out and not bn)),
        out_shape=(
            jax.ShapeDtypeStruct((m_pad, cpad), y_dtype),
            jax.ShapeDtypeStruct((n_tiles, 2, cpad), jnp.float32),
        ),
        grid_spec=pltpu.PrefetchScalarGridSpec(
            num_scalar_prefetch=0,
            grid=(n_tiles,),
            in_specs=[
                pl.BlockSpec((tm, K), lambda i: (i, 0)),
                pl.BlockSpec((K, cpad), lambda i: (0, 0)),
            ],
            out_specs=[
                pl.BlockSpec((tm, cpad), lambda i: (i, 0)),
                pl.BlockSpec((1, 2, cpad), lambda i: (i, 0, 0)),
            ],
        ),
        compiler_params=pltpu.CompilerParams(
            dimension_semantics=("parallel",),
            vmem_limit_bytes=VMEM_LIMIT,
        ),
        cost_estimate=pl.CostEstimate(
            flops=2 * m_pad * K * cpad,
            transcendentals=0,
            bytes_accessed=m_pad * K * 2 + K * cpad * 2
            + m_pad * cpad * jnp.dtype(y_dtype).itemsize,
        ),
    )(p, wm)

    if bn:
        # nn.BatchNorm2d training forward: biased batch stats over (N,H,W) == M.
        ssum = jnp.sum(stats[:, 0, :], axis=0)
        ssq = jnp.sum(stats[:, 1, :], axis=0)
        mean = ssum / M
        var = jnp.maximum(ssq / M - mean * mean, 0.0)
        g = jnp.pad(gamma, (0, cpad - cout), constant_values=1.0)
        b = jnp.pad(beta, (0, cpad - cout))
        scale = (g * jax.lax.rsqrt(var + BN_EPS)).reshape(1, cpad).astype(jnp.float32)
        shift = (b - mean * (g * jax.lax.rsqrt(var + BN_EPS))
                 ).reshape(1, cpad).astype(jnp.float32)

        y = pl.pallas_call(
            functools.partial(_bn_act_kernel, act=act_out),
            out_shape=jax.ShapeDtypeStruct((m_pad, cpad), out_dtype),
            grid_spec=pltpu.PrefetchScalarGridSpec(
                num_scalar_prefetch=0,
                grid=(n_tiles,),
                in_specs=[
                    pl.BlockSpec((tm, cpad), lambda i: (i, 0)),
                    pl.BlockSpec((1, cpad), lambda i: (0, 0)),
                    pl.BlockSpec((1, cpad), lambda i: (0, 0)),
                ],
                out_specs=pl.BlockSpec((tm, cpad), lambda i: (i, 0)),
            ),
            compiler_params=pltpu.CompilerParams(
                dimension_semantics=("parallel",),
                vmem_limit_bytes=VMEM_LIMIT,
            ),
            cost_estimate=pl.CostEstimate(
                flops=2 * m_pad * cpad,
                transcendentals=0,
                bytes_accessed=m_pad * cpad * 4 + 2 * cpad * 4
                + m_pad * cpad * jnp.dtype(out_dtype).itemsize,
            ),
        )(y, scale, shift)

    return y[:M].reshape(N, Ho, Wo, cpad)


# ---------------------------- parameters ----------------------------------- #
def init_params(key, input_nc, nf):
    ks = jax.random.split(key, 5)

    def conv_w(k, cout, cin):
        fan_in = cin * 4 * 4
        bound = (1.0 / fan_in) ** 0.5
        return jax.random.uniform(k, (cout, cin, 4, 4), jnp.float32, -bound, bound)

    return {
        "w1": conv_w(ks[0], nf, input_nc),
        "w2": conv_w(ks[1], nf * 2, nf),
        "g2": jnp.ones((nf * 2,), jnp.float32),
        "b2": jnp.zeros((nf * 2,), jnp.float32),
        "w3": conv_w(ks[2], nf * 4, nf * 2),
        "g3": jnp.ones((nf * 4,), jnp.float32),
        "b3": jnp.zeros((nf * 4,), jnp.float32),
        "w4": conv_w(ks[3], nf * 8, nf * 4),
        "g4": jnp.ones((nf * 8,), jnp.float32),
        "b4": jnp.zeros((nf * 8,), jnp.float32),
        "w5": conv_w(ks[4], 1, nf * 8),
    }


def discriminator_forward(params, x):
    """x: (N, C, H, W) f32 -> (N, 1, Ho, Wo) f32, matching the PyTorch forward."""
    # NHWC end-to-end; single layout transpose at each end.
    h = jnp.transpose(x, (0, 2, 3, 1)).astype(jnp.bfloat16)

    # Conv2d(input_nc, nf, 4, 2, 1)                [next stage's LeakyReLU fused]
    h = conv_stage(h, params["w1"], None, None,
                   stride=2, pad=1, bn=False, act_out=True)
    # LeakyReLU -> Conv(nf, 2nf, 4, 2, 1) -> BN    (LReLU already applied upstream)
    h = conv_stage(h, params["w2"], params["g2"], params["b2"],
                   stride=2, pad=1, bn=True, act_out=True)
    # LeakyReLU -> Conv(2nf, 4nf, 4, 2, 1) -> BN
    h = conv_stage(h, params["w3"], params["g3"], params["b3"],
                   stride=2, pad=1, bn=True, act_out=True)
    # LeakyReLU -> Conv(4nf, 8nf, 4, 1, 1) -> BN
    h = conv_stage(h, params["w4"], params["g4"], params["b4"],
                   stride=1, pad=1, bn=True, act_out=True)
    # LeakyReLU -> Conv(8nf, 1, 4, 1, 1)           (final: no BN, no activation)
    h = conv_stage(h, params["w5"], None, None,
                   stride=1, pad=1, bn=False, act_out=False,
                   out_dtype=jnp.float32)

    # Drop lane padding (real Cout == 1) and return NCHW.
    return jnp.transpose(h[..., :1], (0, 3, 1, 2))


# --------------------------------- main ------------------------------------ #
if __name__ == "__main__":
    key = jax.random.PRNGKey(0)
    k_param, k_x = jax.random.split(key)

    batch, input_nc, nf, spatial = 2, 4, 8, 32
    x = jax.random.normal(k_x, (batch, input_nc, spatial, spatial), jnp.float32)
    params = init_params(k_param, input_nc, nf)

    fwd = jax.jit(discriminator_forward)
    out = jax.block_until_ready(fwd(params, x))

    # 32 -> 16 -> 8 -> 4 -> 3 -> 2 spatial; 1 output channel
    assert out.shape == (batch, 1, 2, 2), out.shape
    assert bool(jnp.all(jnp.isfinite(out)))
    print("KERNEL_OK")
</pallas_src>

<mosaic_0001>
module attributes {stable_mosaic.version = 11 : i64} {
  func.func @_matmul_stats_kernel(%arg0: i32, %arg1: memref<512x64xbf16, #tpu.memory_space<vmem>>, %arg2: memref<64x128xbf16, #tpu.memory_space<vmem>>, %arg3: memref<512x128xbf16, #tpu.memory_space<vmem>>, %arg4: memref<1x2x128xf32, #tpu.memory_space<vmem>>) attributes {dimension_semantics = [#tpu.dimension_semantics<parallel>], iteration_bounds = array<i64: 1>, scalar_prefetch = 0 : i64, scratch_operands = 0 : i64, tpu.core_type = #tpu.core_type<tc>, window_params = [{transform_indices = @transform_0, window_bounds = array<i64: 512, 64>}, {pipeline_mode = #tpu.pipeline_mode<synchronous>, transform_indices = @transform_1, window_bounds = array<i64: 64, 128>}, {transform_indices = @transform_2, window_bounds = array<i64: 512, 128>}, {transform_indices = @transform_3, window_bounds = array<i64: 1, 2, 128>}]} {
    %c0 = arith.constant 0 : index
    %c0_0 = arith.constant 0 : index
    %0 = vector.load %arg1[%c0, %c0_0] : memref<512x64xbf16, #tpu.memory_space<vmem>>, vector<512x64xbf16>
    %c0_1 = arith.constant 0 : index
    %c0_2 = arith.constant 0 : index
    %1 = vector.load %arg2[%c0_1, %c0_2] : memref<64x128xbf16, #tpu.memory_space<vmem>>, vector<64x128xbf16>
    %cst = arith.constant dense<0.000000e+00> : vector<512x128xf32>
    %2 = tpu.matmul %0, %1, %cst {dimension_numbers = #tpu.dot_dimension_numbers<[1], [0], [0], [1], [0, 0, 1, 1], [], []>} : vector<512x64xbf16>, vector<64x128xbf16>, vector<512x128xf32> -> vector<512x128xf32>
    %cst_3 = arith.constant dense<0.000000e+00> : vector<128xf32>
    %3 = vector.multi_reduction <add>, %2, %cst_3 [0] : vector<512x128xf32> to vector<128xf32>
    %4 = vector.shape_cast %3 : vector<128xf32> to vector<1x128xf32>
    %5 = arith.mulf %2, %2 : vector<512x128xf32>
    %cst_4 = arith.constant dense<0.000000e+00> : vector<128xf32>
    %6 = vector.multi_reduction <add>, %5, %cst_4 [0] : vector<512x128xf32> to vector<128xf32>
    %7 = vector.shape_cast %6 : vector<128xf32> to vector<1x128xf32>
    %8 = tpu.concatenate %4, %7 in 0 : vector<1x128xf32>, vector<1x128xf32> -> vector<2x128xf32>
    %9 = vector.shape_cast %8 : vector<2x128xf32> to vector<1x2x128xf32>
    %c0_5 = arith.constant 0 : index
    %c0_6 = arith.constant 0 : index
    %c0_7 = arith.constant 0 : index
    %10 = vector.load %arg4[%c0_5, %c0_6, %c0_7] : memref<1x2x128xf32, #tpu.memory_space<vmem>>, vector<1x2x128xf32>
    tpu.vector_store %arg4[%c0_5, %c0_6, %c0_7], %9 {strides = array<i32>} : memref<1x2x128xf32, #tpu.memory_space<vmem>>, vector<1x2x128xf32>,
    %cst_8 = arith.constant 0.000000e+00 : f32
    %11 = vector.broadcast %cst_8 : f32 to vector<512x128xf32>
    %12 = arith.cmpf ogt, %2, %11 : vector<512x128xf32>
    %cst_9 = arith.constant 2.000000e-01 : f32
    %13 = vector.broadcast %cst_9 : f32 to vector<512x128xf32>
    %14 = arith.mulf %13, %2 : vector<512x128xf32>
    %15 = arith.select %12, %2, %14 : vector<512x128xi1>, vector<512x128xf32>
    %16 = arith.truncf %15 : vector<512x128xf32> to vector<512x128xbf16>
    %c0_10 = arith.constant 0 : index
    %c0_11 = arith.constant 0 : index
    %17 = vector.load %arg3[%c0_10, %c0_11] : memref<512x128xbf16, #tpu.memory_space<vmem>>, vector<512x128xbf16>
    tpu.vector_store %arg3[%c0_10, %c0_11], %16 {strides = array<i32>} : memref<512x128xbf16, #tpu.memory_space<vmem>>, vector<512x128xbf16>,
    return
  }
  func.func @transform_0(%arg0: i32) -> (i32, i32) {
    %c0_i32 = arith.constant 0 : i32
    %c0_i32_0 = arith.constant 0 : i32
    return %arg0, %c0_i32 : i32, i32
  }
  func.func @transform_1(%arg0: i32) -> (i32, i32) {
    %c0_i32 = arith.constant 0 : i32
    %c0_i32_0 = arith.constant 0 : i32
    %c0_i32_1 = arith.constant 0 : i32
    return %c0_i32, %c0_i32_0 : i32, i32
  }
  func.func @transform_2(%arg0: i32) -> (i32, i32) {
    %c0_i32 = arith.constant 0 : i32
    %c0_i32_0 = arith.constant 0 : i32
    return %arg0, %c0_i32 : i32, i32
  }
  func.func @transform_3(%arg0: i32) -> (i32, i32, i32) {
    %c0_i32 = arith.constant 0 : i32
    %c0_i32_0 = arith.constant 0 : i32
    %c0_i32_1 = arith.constant 0 : i32
    return %arg0, %c0_i32, %c0_i32_0 : i32, i32, i32
  }
}

module attributes {stable_mosaic.version = 11 : i64} {
  func.func @_bn_act_kernel(%arg0: i32, %arg1: memref<128x128xf32, #tpu.memory_space<vmem>>, %arg2: memref<1x128xf32, #tpu.memory_space<vmem>>, %arg3: memref<1x128xf32, #tpu.memory_space<vmem>>, %arg4: memref<128x128xbf16, #tpu.memory_space<vmem>>) attributes {dimension_semantics = [#tpu.dimension_semantics<parallel>], iteration_bounds = array<i64: 1>, scalar_prefetch = 0 : i64, scratch_operands = 0 : i64, tpu.core_type = #tpu.core_type<tc>, window_params = [{transform_indices = @transform_0, window_bounds = array<i64: 128, 128>}, {pipeline_mode = #tpu.pipeline_mode<synchronous>, transform_indices = @transform_1, window_bounds = array<i64: 1, 128>}, {pipeline_mode = #tpu.pipeline_mode<synchronous>, transform_indices = @transform_2, window_bounds = array<i64: 1, 128>}, {transform_indices = @transform_3, window_bounds = array<i64: 128, 128>}]} {
    %c0 = arith.constant 0 : index
    %c0_0 = arith.constant 0 : index
    %0 = vector.load %arg1[%c0, %c0_0] : memref<128x128xf32, #tpu.memory_space<vmem>>, vector<128x128xf32>
    %c0_1 = arith.constant 0 : index
    %c0_2 = arith.constant 0 : index
    %1 = vector.load %arg2[%c0_1, %c0_2] : memref<1x128xf32, #tpu.memory_space<vmem>>, vector<1x128xf32>
    %2 = vector.broadcast %1 : vector<1x128xf32> to vector<128x128xf32>
    %3 = arith.mulf %0, %2 : vector<128x128xf32>
    %c0_3 = arith.constant 0 : index
    %c0_4 = arith.constant 0 : index
    %4 = vector.load %arg3[%c0_3, %c0_4] : memref<1x128xf32, #tpu.memory_space<vmem>>, vector<1x128xf32>
    %5 = vector.broadcast %4 : vector<1x128xf32> to vector<128x128xf32>
    %6 = arith.addf %3, %5 : vector<128x128xf32>
    %cst = arith.constant 0.000000e+00 : f32
    %7 = vector.broadcast %cst : f32 to vector<128x128xf32>
    %8 = arith.cmpf ogt, %6, %7 : vector<128x128xf32>
    %cst_5 = arith.constant 2.000000e-01 : f32
    %9 = vector.broadcast %cst_5 : f32 to vector<128x128xf32>
    %10 = arith.mulf %9, %6 : vector<128x128xf32>
    %11 = arith.select %8, %6, %10 : vector<128x128xi1>, vector<128x128xf32>
    %12 = arith.truncf %11 : vector<128x128xf32> to vector<128x128xbf16>
    %c0_6 = arith.constant 0 : index
    %c0_7 = arith.constant 0 : index
    %13 = vector.load %arg4[%c0_6, %c0_7] : memref<128x128xbf16, #tpu.memory_space<vmem>>, vector<128x128xbf16>
    tpu.vector_store %arg4[%c0_6, %c0_7], %12 {strides = array<i32>} : memref<128x128xbf16, #tpu.memory_space<vmem>>, vector<128x128xbf16>,
    return
  }
  func.func @transform_0(%arg0: i32) -> (i32, i32) {
    %c0_i32 = arith.constant 0 : i32
    %c0_i32_0 = arith.constant 0 : i32
    return %arg0, %c0_i32 : i32, i32
  }
  func.func @transform_1(%arg0: i32) -> (i32, i32) {
    %c0_i32 = arith.constant 0 : i32
    %c0_i32_0 = arith.constant 0 : i32
    %c0_i32_1 = arith.constant 0 : i32
    return %c0_i32, %c0_i32_0 : i32, i32
  }
  func.func @transform_2(%arg0: i32) -> (i32, i32) {
    %c0_i32 = arith.constant 0 : i32
    %c0_i32_0 = arith.constant 0 : i32
    %c0_i32_1 = arith.constant 0 : i32
    return %c0_i32, %c0_i32_0 : i32, i32
  }
  func.func @transform_3(%arg0: i32) -> (i32, i32) {
    %c0_i32 = arith.constant 0 : i32
    %c0_i32_0 = arith.constant 0 : i32
    return %arg0, %c0_i32 : i32, i32
  }
}

module attributes {stable_mosaic.version = 11 : i64} {
  func.func @_matmul_stats_kernel(%arg0: i32, %arg1: memref<128x2048xbf16, #tpu.memory_space<vmem>>, %arg2: memref<2048x128xbf16, #tpu.memory_space<vmem>>, %arg3: memref<128x128xf32, #tpu.memory_space<vmem>>, %arg4: memref<1x2x128xf32, #tpu.memory_space<vmem>>) attributes {dimension_semantics = [#tpu.dimension_semantics<parallel>], iteration_bounds = array<i64: 1>, scalar_prefetch = 0 : i64, scratch_operands = 0 : i64, tpu.core_type = #tpu.core_type<tc>, window_params = [{transform_indices = @transform_0, window_bounds = array<i64: 128, 2048>}, {pipeline_mode = #tpu.pipeline_mode<synchronous>, transform_indices = @transform_1, window_bounds = array<i64: 2048, 128>}, {transform_indices = @transform_2, window_bounds = array<i64: 128, 128>}, {transform_indices = @transform_3, window_bounds = array<i64: 1, 2, 128>}]} {
    %c0 = arith.constant 0 : index
    %c0_0 = arith.constant 0 : index
    %0 = vector.load %arg1[%c0, %c0_0] : memref<128x2048xbf16, #tpu.memory_space<vmem>>, vector<128x2048xbf16>
    %c0_1 = arith.constant 0 : index
    %c0_2 = arith.constant 0 : index
    %1 = vector.load %arg2[%c0_1, %c0_2] : memref<2048x128xbf16, #tpu.memory_space<vmem>>, vector<2048x128xbf16>
    %cst = arith.constant dense<0.000000e+00> : vector<128x128xf32>
    %2 = tpu.matmul %0, %1, %cst {dimension_numbers = #tpu.dot_dimension_numbers<[1], [0], [0], [1], [0, 0, 1, 1], [], []>} : vector<128x2048xbf16>, vector<2048x128xbf16>, vector<128x128xf32> -> vector<128x128xf32>
    %cst_3 = arith.constant dense<0.000000e+00> : vector<128xf32>
    %3 = vector.multi_reduction <add>, %2, %cst_3 [0] : vector<128x128xf32> to vector<128xf32>
    %4 = vector.shape_cast %3 : vector<128xf32> to vector<1x128xf32>
    %5 = arith.mulf %2, %2 : vector<128x128xf32>
    %cst_4 = arith.constant dense<0.000000e+00> : vector<128xf32>
    %6 = vector.multi_reduction <add>, %5, %cst_4 [0] : vector<128x128xf32> to vector<128xf32>
    %7 = vector.shape_cast %6 : vector<128xf32> to vector<1x128xf32>
    %8 = tpu.concatenate %4, %7 in 0 : vector<1x128xf32>, vector<1x128xf32> -> vector<2x128xf32>
    %9 = vector.shape_cast %8 : vector<2x128xf32> to vector<1x2x128xf32>
    %c0_5 = arith.constant 0 : index
    %c0_6 = arith.constant 0 : index
    %c0_7 = arith.constant 0 : index
    %10 = vector.load %arg4[%c0_5, %c0_6, %c0_7] : memref<1x2x128xf32, #tpu.memory_space<vmem>>, vector<1x2x128xf32>
    tpu.vector_store %arg4[%c0_5, %c0_6, %c0_7], %9 {strides = array<i32>} : memref<1x2x128xf32, #tpu.memory_space<vmem>>, vector<1x2x128xf32>,
    %c0_8 = arith.constant 0 : index
    %c0_9 = arith.constant 0 : index
    %11 = vector.load %arg3[%c0_8, %c0_9] : memref<128x128xf32, #tpu.memory_space<vmem>>, vector<128x128xf32>
    tpu.vector_store %arg3[%c0_8, %c0_9], %2 {strides = array<i32>} : memref<128x128xf32, #tpu.memory_space<vmem>>, vector<128x128xf32>,
    return
  }
  func.func @transform_0(%arg0: i32) -> (i32, i32) {
    %c0_i32 = arith.constant 0 : i32
    %c0_i32_0 = arith.constant 0 : i32
    return %arg0, %c0_i32 : i32, i32
  }
  func.func @transform_1(%arg0: i32) -> (i32, i32) {
    %c0_i32 = arith.constant 0 : i32
    %c0_i32_0 = arith.constant 0 : i32
    %c0_i32_1 = arith.constant 0 : i32
    return %c0_i32, %c0_i32_0 : i32, i32
  }
  func.func @transform_2(%arg0: i32) -> (i32, i32) {
    %c0_i32 = arith.constant 0 : i32
    %c0_i32_0 = arith.constant 0 : i32
    return %arg0, %c0_i32 : i32, i32
  }
  func.func @transform_3(%arg0: i32) -> (i32, i32, i32) {
    %c0_i32 = arith.constant 0 : i32
    %c0_i32_0 = arith.constant 0 : i32
    %c0_i32_1 = arith.constant 0 : i32
    return %arg0, %c0_i32, %c0_i32_0 : i32, i32, i32
  }
}

module attributes {stable_mosaic.version = 11 : i64} {
  func.func @_matmul_stats_kernel(%arg0: i32, %arg1: memref<32x2048xbf16, #tpu.memory_space<vmem>>, %arg2: memref<2048x128xbf16, #tpu.memory_space<vmem>>, %arg3: memref<32x128xf32, #tpu.memory_space<vmem>>, %arg4: memref<1x2x128xf32, #tpu.memory_space<vmem>>) attributes {dimension_semantics = [#tpu.dimension_semantics<parallel>], iteration_bounds = array<i64: 1>, scalar_prefetch = 0 : i64, scratch_operands = 0 : i64, tpu.core_type = #tpu.core_type<tc>, window_params = [{transform_indices = @transform_0, window_bounds = array<i64: 32, 2048>}, {pipeline_mode = #tpu.pipeline_mode<synchronous>, transform_indices = @transform_1, window_bounds = array<i64: 2048, 128>}, {transform_indices = @transform_2, window_bounds = array<i64: 32, 128>}, {transform_indices = @transform_3, window_bounds = array<i64: 1, 2, 128>}]} {
    %c0 = arith.constant 0 : index
    %c0_0 = arith.constant 0 : index
    %0 = vector.load %arg1[%c0, %c0_0] : memref<32x2048xbf16, #tpu.memory_space<vmem>>, vector<32x2048xbf16>
    %c0_1 = arith.constant 0 : index
    %c0_2 = arith.constant 0 : index
    %1 = vector.load %arg2[%c0_1, %c0_2] : memref<2048x128xbf16, #tpu.memory_space<vmem>>, vector<2048x128xbf16>
    %cst = arith.constant dense<0.000000e+00> : vector<32x128xf32>
    %2 = tpu.matmul %0, %1, %cst {dimension_numbers = #tpu.dot_dimension_numbers<[1], [0], [0], [1], [0, 0, 1, 1], [], []>} : vector<32x2048xbf16>, vector<2048x128xbf16>, vector<32x128xf32> -> vector<32x128xf32>
    %cst_3 = arith.constant dense<0.000000e+00> : vector<128xf32>
    %3 = vector.multi_reduction <add>, %2, %cst_3 [0] : vector<32x128xf32> to vector<128xf32>
    %4 = vector.shape_cast %3 : vector<128xf32> to vector<1x128xf32>
    %5 = arith.mulf %2, %2 : vector<32x128xf32>
    %cst_4 = arith.constant dense<0.000000e+00> : vector<128xf32>
    %6 = vector.multi_reduction <add>, %5, %cst_4 [0] : vector<32x128xf32> to vector<128xf32>
    %7 = vector.shape_cast %6 : vector<128xf32> to vector<1x128xf32>
    %8 = tpu.concatenate %4, %7 in 0 : vector<1x128xf32>, vector<1x128xf32> -> vector<2x128xf32>
    %9 = vector.shape_cast %8 : vector<2x128xf32> to vector<1x2x128xf32>
    %c0_5 = arith.constant 0 : index
    %c0_6 = arith.constant 0 : index
    %c0_7 = arith.constant 0 : index
    %10 = vector.load %arg4[%c0_5, %c0_6, %c0_7] : memref<1x2x128xf32, #tpu.memory_space<vmem>>, vector<1x2x128xf32>
    tpu.vector_store %arg4[%c0_5, %c0_6, %c0_7], %9 {strides = array<i32>} : memref<1x2x128xf32, #tpu.memory_space<vmem>>, vector<1x2x128xf32>,
    %c0_8 = arith.constant 0 : index
    %c0_9 = arith.constant 0 : index
    %11 = vector.load %arg3[%c0_8, %c0_9] : memref<32x128xf32, #tpu.memory_space<vmem>>, vector<32x128xf32>
    tpu.vector_store %arg3[%c0_8, %c0_9], %2 {strides = array<i32>} : memref<32x128xf32, #tpu.memory_space<vmem>>, vector<32x128xf32>,
    return
  }
  func.func @transform_0(%arg0: i32) -> (i32, i32) {
    %c0_i32 = arith.constant 0 : i32
    %c0_i32_0 = arith.constant 0 : i32
    return %arg0, %c0_i32 : i32, i32
  }
  func.func @transform_1(%arg0: i32) -> (i32, i32) {
    %c0_i32 = arith.constant 0 : i32
    %c0_i32_0 = arith.constant 0 : i32
    %c0_i32_1 = arith.constant 0 : i32
    return %c0_i32, %c0_i32_0 : i32, i32
  }
  func.func @transform_2(%arg0: i32) -> (i32, i32) {
    %c0_i32 = arith.constant 0 : i32
    %c0_i32_0 = arith.constant 0 : i32
    return %arg0, %c0_i32 : i32, i32
  }
  func.func @transform_3(%arg0: i32) -> (i32, i32, i32) {
    %c0_i32 = arith.constant 0 : i32
    %c0_i32_0 = arith.constant 0 : i32
    %c0_i32_1 = arith.constant 0 : i32
    return %arg0, %c0_i32, %c0_i32_0 : i32, i32, i32
  }
}

module attributes {stable_mosaic.version = 11 : i64} {
  func.func @_bn_act_kernel(%arg0: i32, %arg1: memref<32x128xf32, #tpu.memory_space<vmem>>, %arg2: memref<1x128xf32, #tpu.memory_space<vmem>>, %arg3: memref<1x128xf32, #tpu.memory_space<vmem>>, %arg4: memref<32x128xbf16, #tpu.memory_space<vmem>>) attributes {dimension_semantics = [#tpu.dimension_semantics<parallel>], iteration_bounds = array<i64: 1>, scalar_prefetch = 0 : i64, scratch_operands = 0 : i64, tpu.core_type = #tpu.core_type<tc>, window_params = [{transform_indices = @transform_0, window_bounds = array<i64: 32, 128>}, {pipeline_mode = #tpu.pipeline_mode<synchronous>, transform_indices = @transform_1, window_bounds = array<i64: 1, 128>}, {pipeline_mode = #tpu.pipeline_mode<synchronous>, transform_indices = @transform_2, window_bounds = array<i64: 1, 128>}, {transform_indices = @transform_3, window_bounds = array<i64: 32, 128>}]} {
    %c0 = arith.constant 0 : index
    %c0_0 = arith.constant 0 : index
    %0 = vector.load %arg1[%c0, %c0_0] : memref<32x128xf32, #tpu.memory_space<vmem>>, vector<32x128xf32>
    %c0_1 = arith.constant 0 : index
    %c0_2 = arith.constant 0 : index
    %1 = vector.load %arg2[%c0_1, %c0_2] : memref<1x128xf32, #tpu.memory_space<vmem>>, vector<1x128xf32>
    %2 = vector.broadcast %1 : vector<1x128xf32> to vector<32x128xf32>
    %3 = arith.mulf %0, %2 : vector<32x128xf32>
    %c0_3 = arith.constant 0 : index
    %c0_4 = arith.constant 0 : index
    %4 = vector.load %arg3[%c0_3, %c0_4] : memref<1x128xf32, #tpu.memory_space<vmem>>, vector<1x128xf32>
    %5 = vector.broadcast %4 : vector<1x128xf32> to vector<32x128xf32>
    %6 = arith.addf %3, %5 : vector<32x128xf32>
    %cst = arith.constant 0.000000e+00 : f32
    %7 = vector.broadcast %cst : f32 to vector<32x128xf32>
    %8 = arith.cmpf ogt, %6, %7 : vector<32x128xf32>
    %cst_5 = arith.constant 2.000000e-01 : f32
    %9 = vector.broadcast %cst_5 : f32 to vector<32x128xf32>
    %10 = arith.mulf %9, %6 : vector<32x128xf32>
    %11 = arith.select %8, %6, %10 : vector<32x128xi1>, vector<32x128xf32>
    %12 = arith.truncf %11 : vector<32x128xf32> to vector<32x128xbf16>
    %c0_6 = arith.constant 0 : index
    %c0_7 = arith.constant 0 : index
    %13 = vector.load %arg4[%c0_6, %c0_7] : memref<32x128xbf16, #tpu.memory_space<vmem>>, vector<32x128xbf16>
    tpu.vector_store %arg4[%c0_6, %c0_7], %12 {strides = array<i32>} : memref<32x128xbf16, #tpu.memory_space<vmem>>, vector<32x128xbf16>,
    return
  }
  func.func @transform_0(%arg0: i32) -> (i32, i32) {
    %c0_i32 = arith.constant 0 : i32
    %c0_i32_0 = arith.constant 0 : i32
    return %arg0, %c0_i32 : i32, i32
  }
  func.func @transform_1(%arg0: i32) -> (i32, i32) {
    %c0_i32 = arith.constant 0 : i32
    %c0_i32_0 = arith.constant 0 : i32
    %c0_i32_1 = arith.constant 0 : i32
    return %c0_i32, %c0_i32_0 : i32, i32
  }
  func.func @transform_2(%arg0: i32) -> (i32, i32) {
    %c0_i32 = arith.constant 0 : i32
    %c0_i32_0 = arith.constant 0 : i32
    %c0_i32_1 = arith.constant 0 : i32
    return %c0_i32, %c0_i32_0 : i32, i32
  }
  func.func @transform_3(%arg0: i32) -> (i32, i32) {
    %c0_i32 = arith.constant 0 : i32
    %c0_i32_0 = arith.constant 0 : i32
    return %arg0, %c0_i32 : i32, i32
  }
}

module attributes {stable_mosaic.version = 11 : i64} {
  func.func @_bn_act_kernel(%arg0: i32, %arg1: memref<24x128xf32, #tpu.memory_space<vmem>>, %arg2: memref<1x128xf32, #tpu.memory_space<vmem>>, %arg3: memref<1x128xf32, #tpu.memory_space<vmem>>, %arg4: memref<24x128xbf16, #tpu.memory_space<vmem>>) attributes {dimension_semantics = [#tpu.dimension_semantics<parallel>], iteration_bounds = array<i64: 1>, scalar_prefetch = 0 : i64, scratch_operands = 0 : i64, tpu.core_type = #tpu.core_type<tc>, window_params = [{transform_indices = @transform_0, window_bounds = array<i64: 24, 128>}, {pipeline_mode = #tpu.pipeline_mode<synchronous>, transform_indices = @transform_1, window_bounds = array<i64: 1, 128>}, {pipeline_mode = #tpu.pipeline_mode<synchronous>, transform_indices = @transform_2, window_bounds = array<i64: 1, 128>}, {transform_indices = @transform_3, window_bounds = array<i64: 24, 128>}]} {
    %c0 = arith.constant 0 : index
    %c0_0 = arith.constant 0 : index
    %0 = vector.load %arg1[%c0, %c0_0] : memref<24x128xf32, #tpu.memory_space<vmem>>, vector<24x128xf32>
    %c0_1 = arith.constant 0 : index
    %c0_2 = arith.constant 0 : index
    %1 = vector.load %arg2[%c0_1, %c0_2] : memref<1x128xf32, #tpu.memory_space<vmem>>, vector<1x128xf32>
    %2 = vector.broadcast %1 : vector<1x128xf32> to vector<24x128xf32>
    %3 = arith.mulf %0, %2 : vector<24x128xf32>
    %c0_3 = arith.constant 0 : index
    %c0_4 = arith.constant 0 : index
    %4 = vector.load %arg3[%c0_3, %c0_4] : memref<1x128xf32, #tpu.memory_space<vmem>>, vector<1x128xf32>
    %5 = vector.broadcast %4 : vector<1x128xf32> to vector<24x128xf32>
    %6 = arith.addf %3, %5 : vector<24x128xf32>
    %cst = arith.constant 0.000000e+00 : f32
    %7 = vector.broadcast %cst : f32 to vector<24x128xf32>
    %8 = arith.cmpf ogt, %6, %7 : vector<24x128xf32>
    %cst_5 = arith.constant 2.000000e-01 : f32
    %9 = vector.broadcast %cst_5 : f32 to vector<24x128xf32>
    %10 = arith.mulf %9, %6 : vector<24x128xf32>
    %11 = arith.select %8, %6, %10 : vector<24x128xi1>, vector<24x128xf32>
    %12 = arith.truncf %11 : vector<24x128xf32> to vector<24x128xbf16>
    %c0_6 = arith.constant 0 : index
    %c0_7 = arith.constant 0 : index
    %13 = vector.load %arg4[%c0_6, %c0_7] : memref<24x128xbf16, #tpu.memory_space<vmem>>, vector<24x128xbf16>
    tpu.vector_store %arg4[%c0_6, %c0_7], %12 {strides = array<i32>} : memref<24x128xbf16, #tpu.memory_space<vmem>>, vector<24x128xbf16>,
    return
  }
  func.func @transform_0(%arg0: i32) -> (i32, i32) {
    %c0_i32 = arith.constant 0 : i32
    %c0_i32_0 = arith.constant 0 : i32
    return %arg0, %c0_i32 : i32, i32
  }
  func.func @transform_1(%arg0: i32) -> (i32, i32) {
    %c0_i32 = arith.constant 0 : i32
    %c0_i32_0 = arith.constant 0 : i32
    %c0_i32_1 = arith.constant 0 : i32
    return %c0_i32, %c0_i32_0 : i32, i32
  }
  func.func @transform_2(%arg0: i32) -> (i32, i32) {
    %c0_i32 = arith.constant 0 : i32
    %c0_i32_0 = arith.constant 0 : i32
    %c0_i32_1 = arith.constant 0 : i32
    return %c0_i32, %c0_i32_0 : i32, i32
  }
  func.func @transform_3(%arg0: i32) -> (i32, i32) {
    %c0_i32 = arith.constant 0 : i32
    %c0_i32_0 = arith.constant 0 : i32
    return %arg0, %c0_i32 : i32, i32
  }
}

module attributes {stable_mosaic.version = 11 : i64} {
  func.func @_matmul_stats_kernel(%arg0: i32, %arg1: memref<24x2048xbf16, #tpu.memory_space<vmem>>, %arg2: memref<2048x128xbf16, #tpu.memory_space<vmem>>, %arg3: memref<24x128xf32, #tpu.memory_space<vmem>>, %arg4: memref<1x2x128xf32, #tpu.memory_space<vmem>>) attributes {dimension_semantics = [#tpu.dimension_semantics<parallel>], iteration_bounds = array<i64: 1>, scalar_prefetch = 0 : i64, scratch_operands = 0 : i64, tpu.core_type = #tpu.core_type<tc>, window_params = [{transform_indices = @transform_0, window_bounds = array<i64: 24, 2048>}, {pipeline_mode = #tpu.pipeline_mode<synchronous>, transform_indices = @transform_1, window_bounds = array<i64: 2048, 128>}, {transform_indices = @transform_2, window_bounds = array<i64: 24, 128>}, {transform_indices = @transform_3, window_bounds = array<i64: 1, 2, 128>}]} {
    %c0 = arith.constant 0 : index
    %c0_0 = arith.constant 0 : index
    %0 = vector.load %arg1[%c0, %c0_0] : memref<24x2048xbf16, #tpu.memory_space<vmem>>, vector<24x2048xbf16>
    %c0_1 = arith.constant 0 : index
    %c0_2 = arith.constant 0 : index
    %1 = vector.load %arg2[%c0_1, %c0_2] : memref<2048x128xbf16, #tpu.memory_space<vmem>>, vector<2048x128xbf16>
    %cst = arith.constant dense<0.000000e+00> : vector<24x128xf32>
    %2 = tpu.matmul %0, %1, %cst {dimension_numbers = #tpu.dot_dimension_numbers<[1], [0], [0], [1], [0, 0, 1, 1], [], []>} : vector<24x2048xbf16>, vector<2048x128xbf16>, vector<24x128xf32> -> vector<24x128xf32>
    %cst_3 = arith.constant dense<0.000000e+00> : vector<128xf32>
    %3 = vector.multi_reduction <add>, %2, %cst_3 [0] : vector<24x128xf32> to vector<128xf32>
    %4 = vector.shape_cast %3 : vector<128xf32> to vector<1x128xf32>
    %5 = arith.mulf %2, %2 : vector<24x128xf32>
    %cst_4 = arith.constant dense<0.000000e+00> : vector<128xf32>
    %6 = vector.multi_reduction <add>, %5, %cst_4 [0] : vector<24x128xf32> to vector<128xf32>
    %7 = vector.shape_cast %6 : vector<128xf32> to vector<1x128xf32>
    %8 = tpu.concatenate %4, %7 in 0 : vector<1x128xf32>, vector<1x128xf32> -> vector<2x128xf32>
    %9 = vector.shape_cast %8 : vector<2x128xf32> to vector<1x2x128xf32>
    %c0_5 = arith.constant 0 : index
    %c0_6 = arith.constant 0 : index
    %c0_7 = arith.constant 0 : index
    %10 = vector.load %arg4[%c0_5, %c0_6, %c0_7] : memref<1x2x128xf32, #tpu.memory_space<vmem>>, vector<1x2x128xf32>
    tpu.vector_store %arg4[%c0_5, %c0_6, %c0_7], %9 {strides = array<i32>} : memref<1x2x128xf32, #tpu.memory_space<vmem>>, vector<1x2x128xf32>,
    %c0_8 = arith.constant 0 : index
    %c0_9 = arith.constant 0 : index
    %11 = vector.load %arg3[%c0_8, %c0_9] : memref<24x128xf32, #tpu.memory_space<vmem>>, vector<24x128xf32>
    tpu.vector_store %arg3[%c0_8, %c0_9], %2 {strides = array<i32>} : memref<24x128xf32, #tpu.memory_space<vmem>>, vector<24x128xf32>,
    return
  }
  func.func @transform_0(%arg0: i32) -> (i32, i32) {
    %c0_i32 = arith.constant 0 : i32
    %c0_i32_0 = arith.constant 0 : i32
    return %arg0, %c0_i32 : i32, i32
  }
  func.func @transform_1(%arg0: i32) -> (i32, i32) {
    %c0_i32 = arith.constant 0 : i32
    %c0_i32_0 = arith.constant 0 : i32
    %c0_i32_1 = arith.constant 0 : i32
    return %c0_i32, %c0_i32_0 : i32, i32
  }
  func.func @transform_2(%arg0: i32) -> (i32, i32) {
    %c0_i32 = arith.constant 0 : i32
    %c0_i32_0 = arith.constant 0 : i32
    return %arg0, %c0_i32 : i32, i32
  }
  func.func @transform_3(%arg0: i32) -> (i32, i32, i32) {
    %c0_i32 = arith.constant 0 : i32
    %c0_i32_0 = arith.constant 0 : i32
    %c0_i32_1 = arith.constant 0 : i32
    return %arg0, %c0_i32, %c0_i32_0 : i32, i32, i32
  }
}

module attributes {stable_mosaic.version = 11 : i64} {
  func.func @_matmul_stats_kernel(%arg0: i32, %arg1: memref<8x2048xbf16, #tpu.memory_space<vmem>>, %arg2: memref<2048x128xbf16, #tpu.memory_space<vmem>>, %arg3: memref<8x128xf32, #tpu.memory_space<vmem>>, %arg4: memref<1x2x128xf32, #tpu.memory_space<vmem>>) attributes {dimension_semantics = [#tpu.dimension_semantics<parallel>], iteration_bounds = array<i64: 1>, scalar_prefetch = 0 : i64, scratch_operands = 0 : i64, tpu.core_type = #tpu.core_type<tc>, window_params = [{transform_indices = @transform_0, window_bounds = array<i64: 8, 2048>}, {pipeline_mode = #tpu.pipeline_mode<synchronous>, transform_indices = @transform_1, window_bounds = array<i64: 2048, 128>}, {transform_indices = @transform_2, window_bounds = array<i64: 8, 128>}, {transform_indices = @transform_3, window_bounds = array<i64: 1, 2, 128>}]} {
    %c0 = arith.constant 0 : index
    %c0_0 = arith.constant 0 : index
    %0 = vector.load %arg1[%c0, %c0_0] : memref<8x2048xbf16, #tpu.memory_space<vmem>>, vector<8x2048xbf16>
    %c0_1 = arith.constant 0 : index
    %c0_2 = arith.constant 0 : index
    %1 = vector.load %arg2[%c0_1, %c0_2] : memref<2048x128xbf16, #tpu.memory_space<vmem>>, vector<2048x128xbf16>
    %cst = arith.constant dense<0.000000e+00> : vector<8x128xf32>
    %2 = tpu.matmul %0, %1, %cst {dimension_numbers = #tpu.dot_dimension_numbers<[1], [0], [0], [1], [0, 0, 1, 1], [], []>} : vector<8x2048xbf16>, vector<2048x128xbf16>, vector<8x128xf32> -> vector<8x128xf32>
    %cst_3 = arith.constant dense<0.000000e+00> : vector<128xf32>
    %3 = vector.multi_reduction <add>, %2, %cst_3 [0] : vector<8x128xf32> to vector<128xf32>
    %4 = vector.shape_cast %3 : vector<128xf32> to vector<1x128xf32>
    %5 = arith.mulf %2, %2 : vector<8x128xf32>
    %cst_4 = arith.constant dense<0.000000e+00> : vector<128xf32>
    %6 = vector.multi_reduction <add>, %5, %cst_4 [0] : vector<8x128xf32> to vector<128xf32>
    %7 = vector.shape_cast %6 : vector<128xf32> to vector<1x128xf32>
    %8 = tpu.concatenate %4, %7 in 0 : vector<1x128xf32>, vector<1x128xf32> -> vector<2x128xf32>
    %9 = vector.shape_cast %8 : vector<2x128xf32> to vector<1x2x128xf32>
    %c0_5 = arith.constant 0 : index
    %c0_6 = arith.constant 0 : index
    %c0_7 = arith.constant 0 : index
    %10 = vector.load %arg4[%c0_5, %c0_6, %c0_7] : memref<1x2x128xf32, #tpu.memory_space<vmem>>, vector<1x2x128xf32>
    tpu.vector_store %arg4[%c0_5, %c0_6, %c0_7], %9 {strides = array<i32>} : memref<1x2x128xf32, #tpu.memory_space<vmem>>, vector<1x2x128xf32>,
    %c0_8 = arith.constant 0 : index
    %c0_9 = arith.constant 0 : index
    %11 = vector.load %arg3[%c0_8, %c0_9] : memref<8x128xf32, #tpu.memory_space<vmem>>, vector<8x128xf32>
    tpu.vector_store %arg3[%c0_8, %c0_9], %2 {strides = array<i32>} : memref<8x128xf32, #tpu.memory_space<vmem>>, vector<8x128xf32>,
    return
  }
  func.func @transform_0(%arg0: i32) -> (i32, i32) {
    %c0_i32 = arith.constant 0 : i32
    %c0_i32_0 = arith.constant 0 : i32
    return %arg0, %c0_i32 : i32, i32
  }
  func.func @transform_1(%arg0: i32) -> (i32, i32) {
    %c0_i32 = arith.constant 0 : i32
    %c0_i32_0 = arith.constant 0 : i32
    %c0_i32_1 = arith.constant 0 : i32
    return %c0_i32, %c0_i32_0 : i32, i32
  }
  func.func @transform_2(%arg0: i32) -> (i32, i32) {
    %c0_i32 = arith.constant 0 : i32
    %c0_i32_0 = arith.constant 0 : i32
    return %arg0, %c0_i32 : i32, i32
  }
  func.func @transform_3(%arg0: i32) -> (i32, i32, i32) {
    %c0_i32 = arith.constant 0 : i32
    %c0_i32_0 = arith.constant 0 : i32
    %c0_i32_1 = arith.constant 0 : i32
    return %arg0, %c0_i32, %c0_i32_0 : i32, i32, i32
  }
}

</mosaic_0001>

<bundles_post_ra>
// kernel: discriminator_forward.8
= control target key start
LH: loop header
LB: loop body
LE: loop exit
PB: predicated region body
PF: predicated region fallthrough
CT: control target
= control target key end

     0   :  { %s2241_s0 = inlined_call_operand.vmem [shape: bf16[512,64], index: 0, kind: input, shape index: {}]   ;;  %s2242_s1 = inlined_call_operand.vmem [shape: bf16[64,128], index: 1, kind: input, shape index: {}]   ;;  %s2243_s2 = inlined_call_operand.vmem [shape: bf16[512,128], index: 2, kind: output, shape index: {0}]   ;;  %s2244_s3 = inlined_call_operand.hbm [shape: f32[1,2,128], index: 3, kind: output, shape index: {1}]  }
   0x1   :  { %v1293_v0 = vld [vmem:[%s2242_s1 + $0x18] sm:$0xff]  ;;  %v1292_v1 = vld [vmem:[%s2242_s1 + $0x10] sm:$0xff] }
   0x2   :  { %372 = vmatpush.bf16.msra.mxu0 %v1293_v0  ;;  %1485 = vmatpush.bf16.msra.mxu1 %v1293_v0 }
   0x3   :  { %9 = vsyncpa [#allocation3], 0  ;;  %1486 = vmatpush.bf16.msra.mxu2 %v1293_v0  ;;  %1487 = vmatpush.bf16.msra.mxu3 %v1293_v0  ;;  %v1291_v2 = vld [vmem:[%s2242_s1 + $0x8] sm:$0xff]  ;;  %v1290_v3 = vld [vmem:[%s2242_s1] sm:$0xff]  ;;  %vm271_vm0 = vcmask 523264   ;;  %s1071_s9 = sshll.u32 %s2244_s3, 4  ;;  %s1072_s9 = int_to_ptr.hbm [resolvable:$true] %s1071_s9 }
   0x4   :  { %v1258_v4 = vld [vmem:[%s2241_s0] sm:$0xff]  ;;  %v1259_v6 = vld [vmem:[%s2241_s0 + $0x8] sm:$0xff]  ;;  %v1260_v9 = vld [vmem:[%s2241_s0 + $0x10] sm:$0xff] }
   0x5   :  { %v1266_v5 = vld [vmem:[%s2241_s0 + $0x40] sm:$0xff]  ;;  %v1267_v7 = vld [vmem:[%s2241_s0 + $0x48] sm:$0xff]  ;;  %v1268_v10 = vld [vmem:[%s2241_s0 + $0x50] sm:$0xff] }
   0x6   :  { %373 = vmatpush.bf16.msra.mxu0 %v1292_v1  ;;  %1488 = vmatpush.bf16.msra.mxu1 %v1292_v1  ;;  %v1274_v8 = vld [vmem:[%s2241_s0 + $0x80] sm:$0xff]  ;;  %v1275_v11 = vld [vmem:[%s2241_s0 + $0x88] sm:$0xff]  ;;  %v1261_v12 = vld [vmem:[%s2241_s0 + $0x18] sm:$0xff] }
   0x7   :  { %1489 = vmatpush.bf16.msra.mxu2 %v1292_v1  ;;  %1490 = vmatpush.bf16.msra.mxu3 %v1292_v1  ;;  %v1269_v13 = vld [vmem:[%s2241_s0 + $0x58] sm:$0xff]  ;;  %v1276_v14 = vld [vmem:[%s2241_s0 + $0x90] sm:$0xff]  ;;  %v1282_v15 = vld [vmem:[%s2241_s0 + $0xc0] sm:$0xff] }
   0x8   :  { %v1262_v16 = vld [vmem:[%s2241_s0 + $0x20] sm:$0xff]  ;;  %v1277_v18 = vld [vmem:[%s2241_s0 + $0x98] sm:$0xff]  ;;  %v1283_v19 = vld [vmem:[%s2241_s0 + $0xc8] sm:$0xff] }
   0x9   :  { %v1270_v17 = vld [vmem:[%s2241_s0 + $0x60] sm:$0xff]  ;;  %v1263_v20 = vld [vmem:[%s2241_s0 + $0x28] sm:$0xff]  ;;  %v1284_v23 = vld [vmem:[%s2241_s0 + $0xd0] sm:$0xff] }
   0xa   :  { %374 = vmatpush.bf16.msra.mxu0 %v1291_v2  ;;  %1491 = vmatpush.bf16.msra.mxu1 %v1291_v2  ;;  %v1271_v21 = vld [vmem:[%s2241_s0 + $0x68] sm:$0xff]  ;;  %v1278_v22 = vld [vmem:[%s2241_s0 + $0xa0] sm:$0xff]  ;;  %v1264_v24 = vld [vmem:[%s2241_s0 + $0x30] sm:$0xff] }
   0xb   :  { %1492 = vmatpush.bf16.msra.mxu2 %v1291_v2  ;;  %1493 = vmatpush.bf16.msra.mxu3 %v1291_v2  ;;  %v1272_v25 = vld [vmem:[%s2241_s0 + $0x70] sm:$0xff]  ;;  %v1279_v26 = vld [vmem:[%s2241_s0 + $0xa8] sm:$0xff]  ;;  %v1285_v27 = vld [vmem:[%s2241_s0 + $0xd8] sm:$0xff] }
   0xc   :  { %v1265_v28 = vld [vmem:[%s2241_s0 + $0x38] sm:$0xff]  ;;  %v1280_v30 = vld [vmem:[%s2241_s0 + $0xb0] sm:$0xff]  ;;  %v1286_v31 = vld [vmem:[%s2241_s0 + $0xe0] sm:$0xff] }
   0xd   :  { %v1273_v29 = vld [vmem:[%s2241_s0 + $0x78] sm:$0xff]  ;;  %v1287_v35 = vld [vmem:[%s2241_s0 + $0xe8] sm:$0xff]  ;;  %v1288_v56 = vld [vmem:[%s2241_s0 + $0xf0] sm:$0xff] }
   0xe   :  { %375 = vmatpush.bf16.msra.mxu0 %v1290_v3  ;;  %1494 = vmatpush.bf16.msra.mxu1 %v1290_v3  ;;  %v1281_v34 = vld [vmem:[%s2241_s0 + $0xb8] sm:$0xff] }
   0xf   :  { %1495 = vmatpush.bf16.msra.mxu2 %v1290_v3  ;;  %1496 = vmatpush.bf16.msra.mxu3 %v1290_v3 }
  0x11   :  { %1226 = vmatmul.msk.bf16.vlgmr.msra.gmra.mxu0 %vm271_vm0, %v1258_v4  ;;  %1234 = vmatmul.msk.bf16.vlgmr.msra.gmra.mxu1 %vm271_vm0, %v1266_v5 }
  0x12   :  { %1242 = vmatmul.msk.bf16.vlgmr.msra.gmra.mxu2 %vm271_vm0, %v1274_v8  ;;  %1250 = vmatmul.msk.bf16.vlgmr.msra.gmra.mxu3 %vm271_vm0, %v1282_v15 }
  0x21   :  { %1227 = vmatmul.msk.bf16.gmra.mxu0 %vm271_vm0, %v1259_v6  ;;  %1235 = vmatmul.msk.bf16.gmra.mxu1 %vm271_vm0, %v1267_v7 }
  0x22   :  { %1243 = vmatmul.msk.bf16.gmra.mxu2 %vm271_vm0, %v1275_v11  ;;  %1251 = vmatmul.msk.bf16.gmra.mxu3 %vm271_vm0, %v1283_v19 }
  0x31   :  { %1228 = vmatmul.msk.bf16.gmra.mxu0 %vm271_vm0, %v1260_v9  ;;  %1236 = vmatmul.msk.bf16.gmra.mxu1 %vm271_vm0, %v1268_v10 }
  0x32   :  { %1244 = vmatmul.msk.bf16.gmra.mxu2 %vm271_vm0, %v1276_v14  ;;  %1252 = vmatmul.msk.bf16.gmra.mxu3 %vm271_vm0, %v1284_v23 }
  0x41   :  { %1229 = vmatmul.msk.bf16.gmra.mxu0 %vm271_vm0, %v1261_v12  ;;  %1237 = vmatmul.msk.bf16.gmra.mxu1 %vm271_vm0, %v1269_v13 }
  0x42   :  { %1245 = vmatmul.msk.bf16.gmra.mxu2 %vm271_vm0, %v1277_v18  ;;  %1253 = vmatmul.msk.bf16.gmra.mxu3 %vm271_vm0, %v1285_v27  ;;  %v1289_v18 = vld [vmem:[%s2241_s0 + $0xf8] sm:$0xff] }
  0x51   :  { %1230 = vmatmul.msk.bf16.gmra.mxu0 %vm271_vm0, %v1262_v16  ;;  %1238 = vmatmul.msk.bf16.gmra.mxu1 %vm271_vm0, %v1270_v17 }
  0x52   :  { %1246 = vmatmul.msk.bf16.gmra.mxu2 %vm271_vm0, %v1278_v22  ;;  %1254 = vmatmul.msk.bf16.gmra.mxu3 %vm271_vm0, %v1286_v31 }
  0x61   :  { %1231 = vmatmul.msk.bf16.gmra.mxu0 %vm271_vm0, %v1263_v20  ;;  %1239 = vmatmul.msk.bf16.gmra.mxu1 %vm271_vm0, %v1271_v21 }
  0x62   :  { %1247 = vmatmul.msk.bf16.gmra.mxu2 %vm271_vm0, %v1279_v26  ;;  %1255 = vmatmul.msk.bf16.gmra.mxu3 %vm271_vm0, %v1287_v35 }
  0x71   :  { %1232 = vmatmul.msk.bf16.gmra.mxu0 %vm271_vm0, %v1264_v24  ;;  %1240 = vmatmul.msk.bf16.gmra.mxu1 %vm271_vm0, %v1272_v25 }
  0x72   :  { %1248 = vmatmul.msk.bf16.gmra.mxu2 %vm271_vm0, %v1280_v30  ;;  %1256 = vmatmul.msk.bf16.gmra.mxu3 %vm271_vm0, %v1288_v56 }
  0x81   :  { %1233 = vmatmul.msk.bf16.gmra.mxu0 %vm271_vm0, %v1265_v28  ;;  %1241 = vmatmul.msk.bf16.gmra.mxu1 %vm271_vm0, %v1273_v29 }
  0x82   :  { %1249 = vmatmul.msk.bf16.gmra.mxu2 %vm271_vm0, %v1281_v34  ;;  %1257 = vmatmul.msk.bf16.gmra.mxu3 %vm271_vm0, %v1289_v18 }
  0x8e   :  { %v377_v32 = vpop.f32.mrf.mxu0  ;;  %v1669_v33 = vpop.f32.mrf.mxu1 }
  0x8f   :  { %v822_v36 = vmul.f32 0.2, %v1669_v33  ;;  %v806_v37 = vmul.f32 0.2, %v377_v32  ;;  %vm758_vm1 = vcmp.gt.f32.partialorder %v1669_v33, 0.0  ;;  %v606_v38 = vmul.f32 %v377_v32, %v377_v32 }
  0x90   :  { %vm742_vm2 = vcmp.gt.f32.partialorder %v377_v32, 0.0 }
  0x91   :  { %v886_v44 = vsel %vm758_vm1, %v1669_v33, %v822_v36  ;;  %v870_v46 = vsel %vm742_vm2, %v377_v32, %v806_v37 }
  0x95   :  { %v1701_v60 = vpop.f32.mrf.mxu2 }
  0x96   :  { %v379_v39 = vpop.f32.mrf.mxu0  ;;  %v1681_v40 = vpop.f32.mrf.mxu1  ;;  %v838_v9 = vmul.f32 0.2, %v1701_v60  ;;  %vm774_vm9 = vcmp.gt.f32.partialorder %v1701_v60, 0.0 }
  0x97   :  { %v537_v41 = vadd.f32 %v379_v39, %v377_v32  ;;  %v607_v42 = vmul.f32 %v379_v39, %v379_v39  ;;  %vm743_vm3 = vcmp.gt.f32.partialorder %v379_v39, 0.0  ;;  %v807_v43 = vmul.f32 0.2, %v379_v39 }
  0x98   :  { %vm759_vm4 = vcmp.gt.f32.partialorder %v1681_v40, 0.0  ;;  %v823_v45 = vmul.f32 0.2, %v1681_v40  ;;  %v902_v14 = vsel %vm774_vm9, %v1701_v60, %v838_v9 }
  0x99   :  { %v670_v47 = vadd.f32 %v607_v42, %v606_v38  ;;  %v871_v48 = vsel %vm743_vm3, %v379_v39, %v807_v43 }
  0x9a   :  { %v1297_v49 = vpack.c.bf16 %v871_v48, %v870_v46  ;;  %v887_v50 = vsel %vm759_vm4, %v1681_v40, %v823_v45  ;;  %v1777_v48 = vpop.f32.mrf.mxu3 }
  0x9b   :  { %v1337_v51 = vpack.c.bf16 %v887_v50, %v886_v44 }
  0x9c   :  { %1298 = vst [vmem:[%s2243_s2] sm:$0xff] %v1297_v49  }
  0x9d   :  { %1461 = vst [vmem:[%s2243_s2 + $0x40] sm:$0xff] %v1337_v51   ;;  %v1717_v11 = vpop.f32.mrf.mxu2 }
  0x9e   :  { %v382_v52 = vpop.f32.mrf.mxu0  ;;  %v1693_v53 = vpop.f32.mrf.mxu1  ;;  %vm775_vm10 = vcmp.gt.f32.partialorder %v1717_v11, 0.0  ;;  %v839_v15 = vmul.f32 0.2, %v1717_v11 }
  0x9f   :  { %v538_v54 = vadd.f32 %v537_v41, %v382_v52  ;;  %v608_v55 = vmul.f32 %v382_v52, %v382_v52  ;;  %v824_v58 = vmul.f32 0.2, %v1693_v53  ;;  %v808_v59 = vmul.f32 0.2, %v382_v52 }
  0xa0   :  { %vm760_vm5 = vcmp.gt.f32.partialorder %v1693_v53, 0.0  ;;  %vm744_vm6 = vcmp.gt.f32.partialorder %v382_v52, 0.0  ;;  %v903_v19 = vsel %vm775_vm10, %v1717_v11, %v839_v15 }
  0xa1   :  { %v671_v57 = vadd.f32 %v670_v47, %v608_v55  ;;  %v888_v2 = vsel %vm760_vm5, %v1693_v53, %v824_v58  ;;  %v872_v4 = vsel %vm744_vm6, %v382_v52, %v808_v59  ;;  %v1377_v21 = vpack.c.bf16 %v903_v19, %v902_v14 }
  0xa3   :  { %1469 = vst [vmem:[%s2243_s2 + $0x80] sm:$0xff] %v1377_v21  }
  0xa5   :  { %v1738_v24 = vpop.f32.mrf.mxu2 }
  0xa6   :  { %v384_v61 = vpop.f32.mrf.mxu0  ;;  %v1703_v62 = vpop.f32.mrf.mxu1  ;;  %v840_v35 = vmul.f32 0.2, %v1738_v24  ;;  %vm776_vm15 = vcmp.gt.f32.partialorder %v1738_v24, 0.0 }
  0xa7   :  { %v539_v63 = vadd.f32 %v538_v54, %v384_v61  ;;  %v609_v0 = vmul.f32 %v384_v61, %v384_v61  ;;  %vm745_vm7 = vcmp.gt.f32.partialorder %v384_v61, 0.0  ;;  %v809_v1 = vmul.f32 0.2, %v384_v61 }
  0xa8   :  { %vm761_vm8 = vcmp.gt.f32.partialorder %v1703_v62, 0.0  ;;  %v825_v3 = vmul.f32 0.2, %v1703_v62  ;;  %v904_v41 = vsel %vm776_vm15, %v1738_v24, %v840_v35 }
  0xa9   :  { %v672_v5 = vadd.f32 %v671_v57, %v609_v0  ;;  %v873_v6 = vsel %vm745_vm7, %v384_v61, %v809_v1  ;;  %v1802_v0 = vpop.f32.mrf.mxu3  ;;  %vm790_vm7 = vcmp.gt.f32.partialorder %v1777_v48, 0.0 }
  0xaa   :  { %v1302_v7 = vpack.c.bf16 %v873_v6, %v872_v4  ;;  %v889_v8 = vsel %vm761_vm8, %v1703_v62, %v825_v3  ;;  %v854_v4 = vmul.f32 0.2, %v1777_v48  ;;  %vm791_vm8 = vcmp.gt.f32.partialorder %v1802_v0, 0.0 }
  0xab   :  { %v1342_v10 = vpack.c.bf16 %v889_v8, %v888_v2  ;;  %v855_v9 = vmul.f32 0.2, %v1802_v0 }
  0xac   :  { %1454 = vst [vmem:[%s2243_s2 + $0x8] sm:$0xff] %v1302_v7   ;;  %v918_v8 = vsel %vm790_vm7, %v1777_v48, %v854_v4 }
  0xad   :  { %1462 = vst [vmem:[%s2243_s2 + $0x48] sm:$0xff] %v1342_v10   ;;  %v1759_v37 = vpop.f32.mrf.mxu2 }
  0xae   :  { %v387_v12 = vpop.f32.mrf.mxu0  ;;  %v1719_v13 = vpop.f32.mrf.mxu1  ;;  %vm777_vm0 = vcmp.gt.f32.partialorder %v1759_v37, 0.0  ;;  %v841_v42 = vmul.f32 0.2, %v1759_v37 }
  0xaf   :  { %v1724_v16 = vadd.f32 %v539_v63, %v387_v12  ;;  %v610_v17 = vmul.f32 %v387_v12, %v387_v12  ;;  %v826_v22 = vmul.f32 0.2, %v1719_v13  ;;  %v810_v23 = vmul.f32 0.2, %v387_v12 }
  0xb0   :  { %vm762_vm11 = vcmp.gt.f32.partialorder %v1719_v13, 0.0  ;;  %vm746_vm12 = vcmp.gt.f32.partialorder %v387_v12, 0.0  ;;  %v905_v43 = vsel %vm777_vm0, %v1759_v37, %v841_v42 }
  0xb1   :  { %v1730_v20 = vadd.f32 %v672_v5, %v610_v17  ;;  %v890_v28 = vsel %vm762_vm11, %v1719_v13, %v826_v22  ;;  %v874_v30 = vsel %vm746_vm12, %v387_v12, %v810_v23  ;;  %v1382_v44 = vpack.c.bf16 %v905_v43, %v904_v41  ;;  %v1826_v18 = vpop.f32.mrf.mxu3 }
  0xb2   :  { %v919_v12 = vsel %vm791_vm8, %v1802_v0, %v855_v9  ;;  %vm792_vm15 = vcmp.gt.f32.partialorder %v1826_v18, 0.0 }
  0xb3   :  { %1470 = vst [vmem:[%s2243_s2 + $0x88] sm:$0xff] %v1382_v44   ;;  %v1417_v15 = vpack.c.bf16 %v919_v12, %v918_v8  ;;  %v856_v44 = vmul.f32 0.2, %v1826_v18 }
  0xb5   :  { %v1775_v47 = vpop.f32.mrf.mxu2  ;;  %1477 = vst [vmem:[%s2243_s2 + $0xc0] sm:$0xff] %v1417_v15  }
  0xb6   :  { %v1740_v25 = vpop.f32.mrf.mxu0  ;;  %v1742_v26 = vpop.f32.mrf.mxu1  ;;  %v842_v59 = vmul.f32 0.2, %v1775_v47  ;;  %vm778_vm5 = vcmp.gt.f32.partialorder %v1775_v47, 0.0 }
  0xb7   :  { %vm747_vm13 = vcmp.gt.f32.partialorder %v1740_v25, 0.0  ;;  %v811_v27 = vmul.f32 0.2, %v1740_v25  ;;  %vm763_vm14 = vcmp.gt.f32.partialorder %v1742_v26, 0.0  ;;  %v827_v29 = vmul.f32 0.2, %v1742_v26 }
  0xb8   :  { %v906_v3 = vsel %vm778_vm5, %v1775_v47, %v842_v59 }
  0xb9   :  { %v875_v31 = vsel %vm747_vm13, %v1740_v25, %v811_v27  ;;  %v891_v34 = vsel %vm763_vm14, %v1742_v26, %v827_v29 }
  0xba   :  { %v1307_v32 = vpack.c.bf16 %v875_v31, %v874_v30  ;;  %v1347_v36 = vpack.c.bf16 %v891_v34, %v890_v28 }
  0xbc   :  { %1455 = vst [vmem:[%s2243_s2 + $0x10] sm:$0xff] %v1307_v32  }
  0xbd   :  { %1463 = vst [vmem:[%s2243_s2 + $0x50] sm:$0xff] %v1347_v36   ;;  %v1800_v63 = vpop.f32.mrf.mxu2  ;;  %v1854_v36 = vpop.f32.mrf.mxu3 }
  0xbe   :  { %v1761_v38 = vpop.f32.mrf.mxu0  ;;  %v1763_v39 = vpop.f32.mrf.mxu1  ;;  %vm779_vm6 = vcmp.gt.f32.partialorder %v1800_v63, 0.0  ;;  %v843_v5 = vmul.f32 0.2, %v1800_v63  ;;  %vm793_vm0 = vcmp.gt.f32.partialorder %v1854_v36, 0.0 }
  0xbf   :  { %v828_v45 = vmul.f32 0.2, %v1763_v39  ;;  %v812_v46 = vmul.f32 0.2, %v1761_v38  ;;  %vm764_vm1 = vcmp.gt.f32.partialorder %v1763_v39, 0.0  ;;  %vm748_vm2 = vcmp.gt.f32.partialorder %v1761_v38, 0.0 }
  0xc0   :  { %v907_v6 = vsel %vm779_vm6, %v1800_v63, %v843_v5 }
  0xc1   :  { %v892_v52 = vsel %vm764_vm1, %v1763_v39, %v828_v45  ;;  %v876_v55 = vsel %vm748_vm2, %v1761_v38, %v812_v46  ;;  %v1387_v7 = vpack.c.bf16 %v907_v6, %v906_v3 }
  0xc3   :  { %1471 = vst [vmem:[%s2243_s2 + $0x90] sm:$0xff] %v1387_v7  }
  0xc5   :  { %v1824_v17 = vpop.f32.mrf.mxu2 }
  0xc6   :  { %v1780_v49 = vpop.f32.mrf.mxu0  ;;  %v1782_v50 = vpop.f32.mrf.mxu1  ;;  %v844_v32 = vmul.f32 0.2, %v1824_v17  ;;  %vm780_vm13 = vcmp.gt.f32.partialorder %v1824_v17, 0.0 }
  0xc7   :  { %vm749_vm3 = vcmp.gt.f32.partialorder %v1780_v49, 0.0  ;;  %v813_v51 = vmul.f32 0.2, %v1780_v49  ;;  %vm765_vm4 = vcmp.gt.f32.partialorder %v1782_v50, 0.0  ;;  %v829_v54 = vmul.f32 0.2, %v1782_v50 }
  0xc8   :  { %v908_v43 = vsel %vm780_vm13, %v1824_v17, %v844_v32  ;;  %v611_v32 = vmul.f32 %v1740_v25, %v1740_v25 }
  0xc9   :  { %v877_v56 = vsel %vm749_vm3, %v1780_v49, %v813_v51  ;;  %v893_v58 = vsel %vm765_vm4, %v1782_v50, %v829_v54  ;;  %v857_v54 = vmul.f32 0.2, %v1854_v36 }
  0xca   :  { %v1312_v57 = vpack.c.bf16 %v877_v56, %v876_v55  ;;  %v1352_v61 = vpack.c.bf16 %v893_v58, %v892_v52  ;;  %v920_v52 = vsel %vm792_vm15, %v1826_v18, %v856_v44  ;;  %v612_v44 = vmul.f32 %v1761_v38, %v1761_v38 }
  0xcb   :  { %v921_v56 = vsel %vm793_vm0, %v1854_v36, %v857_v54  ;;  %v674_v54 = vadd.f32 %v1730_v20, %v611_v32 }
  0xcc   :  { %1456 = vst [vmem:[%s2243_s2 + $0x18] sm:$0xff] %v1312_v57   ;;  %v1422_v58 = vpack.c.bf16 %v921_v56, %v920_v52 }
  0xcd   :  { %1464 = vst [vmem:[%s2243_s2 + $0x58] sm:$0xff] %v1352_v61   ;;  %v1852_v35 = vpop.f32.mrf.mxu2  ;;  %v1878_v61 = vpop.f32.mrf.mxu3 }
  0xce   :  { %v1804_v1 = vpop.f32.mrf.mxu0  ;;  %v1806_v2 = vpop.f32.mrf.mxu1  ;;  %vm781_vm14 = vcmp.gt.f32.partialorder %v1852_v35, 0.0  ;;  %v845_v45 = vmul.f32 0.2, %v1852_v35  ;;  %1478 = vst [vmem:[%s2243_s2 + $0xc8] sm:$0xff] %v1422_v58   ;;  %vm794_vm6 = vcmp.gt.f32.partialorder %v1878_v61, 0.0 }
  0xcf   :  { %v830_v10 = vmul.f32 0.2, %v1806_v2  ;;  %v814_v14 = vmul.f32 0.2, %v1804_v1  ;;  %vm766_vm9 = vcmp.gt.f32.partialorder %v1806_v2, 0.0  ;;  %vm750_vm10 = vcmp.gt.f32.partialorder %v1804_v1, 0.0 }
  0xd0   :  { %v909_v46 = vsel %vm781_vm14, %v1852_v35, %v845_v45 }
  0xd1   :  { %v894_v23 = vsel %vm766_vm9, %v1806_v2, %v830_v10  ;;  %v878_v28 = vsel %vm750_vm10, %v1804_v1, %v814_v14  ;;  %v1392_v51 = vpack.c.bf16 %v909_v46, %v908_v43  ;;  %v541_v46 = vadd.f32 %v1724_v16, %v1740_v25 }
  0xd2   :  { %v614_v16 = vmul.f32 %v1804_v1, %v1804_v1 }
  0xd3   :  { %1472 = vst [vmem:[%s2243_s2 + $0x98] sm:$0xff] %v1392_v51  }
  0xd5   :  { %v1876_v59 = vpop.f32.mrf.mxu2 }
  0xd6   :  { %v1829_v19 = vpop.f32.mrf.mxu0  ;;  %v1831_v21 = vpop.f32.mrf.mxu1  ;;  %v846_v15 = vmul.f32 0.2, %v1876_v59  ;;  %vm782_vm5 = vcmp.gt.f32.partialorder %v1876_v59, 0.0 }
  0xd7   :  { %vm751_vm11 = vcmp.gt.f32.partialorder %v1829_v19, 0.0  ;;  %v815_v22 = vmul.f32 0.2, %v1829_v19  ;;  %vm767_vm12 = vcmp.gt.f32.partialorder %v1831_v21, 0.0  ;;  %v831_v27 = vmul.f32 0.2, %v1831_v21 }
  0xd9   :  { %v879_v29 = vsel %vm751_vm11, %v1829_v19, %v815_v22  ;;  %v895_v31 = vsel %vm767_vm12, %v1831_v21, %v831_v27  ;;  %v858_v22 = vmul.f32 0.2, %v1878_v61  ;;  %v1908_v27 = vpop.f32.mrf.mxu3 }
  0xda   :  { %v1317_v30 = vpack.c.bf16 %v879_v29, %v878_v28  ;;  %v1357_v34 = vpack.c.bf16 %v895_v31, %v894_v23  ;;  %v859_v31 = vmul.f32 0.2, %v1908_v27  ;;  %vm795_vm8 = vcmp.gt.f32.partialorder %v1908_v27, 0.0 }
  0xdb   :  { %v922_v43 = vsel %vm794_vm6, %v1878_v61, %v858_v22 }
  0xdc   :  { %1457 = vst [vmem:[%s2243_s2 + $0x20] sm:$0xff] %v1317_v30   ;;  %v923_v52 = vsel %vm795_vm8, %v1908_v27, %v859_v31 }
  0xdd   :  { %1465 = vst [vmem:[%s2243_s2 + $0x60] sm:$0xff] %v1357_v34   ;;  %v1906_v23 = vpop.f32.mrf.mxu2  ;;  %v910_v34 = vsel %vm782_vm5, %v1876_v59, %v846_v15  ;;  %v1427_v56 = vpack.c.bf16 %v923_v52, %v922_v43 }
  0xde   :  { %v1856_v41 = vpop.f32.mrf.mxu0  ;;  %v1858_v42 = vpop.f32.mrf.mxu1  ;;  %vm783_vm7 = vcmp.gt.f32.partialorder %v1906_v23, 0.0  ;;  %v847_v30 = vmul.f32 0.2, %v1906_v23 }
  0xdf   :  { %v832_v55 = vmul.f32 0.2, %v1858_v42  ;;  %v816_v57 = vmul.f32 0.2, %v1856_v41  ;;  %vm768_vm1 = vcmp.gt.f32.partialorder %v1858_v42, 0.0  ;;  %vm752_vm2 = vcmp.gt.f32.partialorder %v1856_v41, 0.0 }
  0xe0   :  { %v911_v45 = vsel %vm783_vm7, %v1906_v23, %v847_v30  ;;  %1479 = vst [vmem:[%s2243_s2 + $0xd0] sm:$0xff] %v1427_v56   ;;  %v616_v30 = vmul.f32 %v1856_v41, %v1856_v41 }
  0xe1   :  { %v896_v6 = vsel %vm768_vm1, %v1858_v42, %v832_v55  ;;  %v880_v8 = vsel %vm752_vm2, %v1856_v41, %v816_v57  ;;  %v1397_v51 = vpack.c.bf16 %v911_v45, %v910_v34  ;;  %v613_v55 = vmul.f32 %v1780_v49, %v1780_v49 }
  0xe2   :  { %v542_v57 = vadd.f32 %v541_v46, %v1761_v38  ;;  %v1945_v38 = vpop.f32.mrf.mxu3 }
  0xe3   :  { %1473 = vst [vmem:[%s2243_s2 + $0xa0] sm:$0xff] %v1397_v51   ;;  %vm796_vm15 = vcmp.gt.f32.partialorder %v1945_v38, 0.0 }
  0xe5   :  { %v1943_v20 = vpop.f32.mrf.mxu2 }
  0xe6   :  { %v1881_v3 = vpop.f32.mrf.mxu0  ;;  %v1883_v4 = vpop.f32.mrf.mxu1  ;;  %vm784_vm13 = vcmp.gt.f32.partialorder %v1943_v20, 0.0 }
  0xe7   :  { %vm753_vm3 = vcmp.gt.f32.partialorder %v1881_v3, 0.0  ;;  %v817_v5 = vmul.f32 0.2, %v1881_v3  ;;  %vm769_vm4 = vcmp.gt.f32.partialorder %v1883_v4, 0.0  ;;  %v833_v7 = vmul.f32 0.2, %v1883_v4 }
  0xe8   :  { %v617_v51 = vmul.f32 %v1881_v3, %v1881_v3 }
  0xe9   :  { %v881_v9 = vsel %vm753_vm3, %v1881_v3, %v817_v5  ;;  %v897_v12 = vsel %vm769_vm4, %v1883_v4, %v833_v7  ;;  %v675_v5 = vadd.f32 %v674_v54, %v612_v44 }
  0xea   :  { %v1322_v10 = vpack.c.bf16 %v881_v9, %v880_v8  ;;  %v1362_v14 = vpack.c.bf16 %v897_v12, %v896_v6  ;;  %v543_v6 = vadd.f32 %v542_v57, %v1780_v49 }
  0xeb   :  { %v676_v9 = vadd.f32 %v675_v5, %v613_v55  ;;  %v1974_v55 = vpop.f32.mrf.mxu3 }
  0xec   :  { %1458 = vst [vmem:[%s2243_s2 + $0x28] sm:$0xff] %v1322_v10   ;;  %v615_v10 = vmul.f32 %v1829_v19, %v1829_v19  ;;  %vm797_vm0 = vcmp.gt.f32.partialorder %v1974_v55, 0.0 }
  0xed   :  { %1466 = vst [vmem:[%s2243_s2 + $0x68] sm:$0xff] %v1362_v14   ;;  %v544_v14 = vadd.f32 %v543_v6, %v1804_v1  ;;  %v677_v49 = vadd.f32 %v676_v9, %v614_v16  ;;  %v1972_v54 = vpop.f32.mrf.mxu2  ;;  %v860_v16 = vmul.f32 0.2, %v1945_v38 }
  0xee   :  { %v1910_v28 = vpop.f32.mrf.mxu0  ;;  %v1912_v29 = vpop.f32.mrf.mxu1  ;;  %v849_v5 = vmul.f32 0.2, %v1972_v54  ;;  %vm785_vm14 = vcmp.gt.f32.partialorder %v1972_v54, 0.0 }
  0xef   :  { %v834_v58 = vmul.f32 0.2, %v1912_v29  ;;  %v818_v25 = vmul.f32 0.2, %v1910_v28  ;;  %vm770_vm9 = vcmp.gt.f32.partialorder %v1912_v29, 0.0  ;;  %vm754_vm10 = vcmp.gt.f32.partialorder %v1910_v28, 0.0 }
  0xf0   :  { %v545_v34 = vadd.f32 %v544_v14, %v1829_v19  ;;  %v678_v45 = vadd.f32 %v677_v49, %v615_v10  ;;  %v848_v19 = vmul.f32 0.2, %v1943_v20  ;;  %v618_v56 = vmul.f32 %v1910_v28, %v1910_v28 }
  0xf1   :  { %v898_v15 = vsel %vm770_vm9, %v1912_v29, %v834_v58  ;;  %v882_v31 = vsel %vm754_vm10, %v1910_v28, %v818_v25 }
  0xf2   :  { %v546_v46 = vadd.f32 %v545_v34, %v1856_v41  ;;  %v679_v52 = vadd.f32 %v678_v45, %v616_v30  ;;  %v861_v30 = vmul.f32 0.2, %v1974_v55 }
  0xf4   :  { %v547_v41 = vadd.f32 %v546_v46, %v1881_v3  ;;  %v680_v25 = vadd.f32 %v679_v52, %v617_v51  ;;  %v912_v3 = vsel %vm784_vm13, %v1943_v20, %v848_v19 }
  0xf6   :  { %v409_v7 = vpop.f32.mrf.mxu0  ;;  %v1949_v8 = vpop.f32.mrf.mxu1  ;;  %v548_v6 = vadd.f32 %v547_v41, %v1910_v28  ;;  %v681_v10 = vadd.f32 %v680_v25, %v618_v56  ;;  %v622_v56 = vmul.f32 %v1669_v33, %v1669_v33 }
  0xf7   :  { %vm755_vm11 = vcmp.gt.f32.partialorder %v409_v7, 0.0  ;;  %v819_v12 = vmul.f32 0.2, %v409_v7  ;;  %vm771_vm12 = vcmp.gt.f32.partialorder %v1949_v8, 0.0  ;;  %v835_v22 = vmul.f32 0.2, %v1949_v8 }
  0xf8   :  { %v619_v9 = vmul.f32 %v409_v7, %v409_v7 }
  0xf9   :  { %v883_v32 = vsel %vm755_vm11, %v409_v7, %v819_v12  ;;  %v899_v44 = vsel %vm771_vm12, %v1949_v8, %v835_v22  ;;  %v549_v12 = vadd.f32 %v548_v6, %v409_v7  ;;  %v924_v22 = vsel %vm796_vm15, %v1945_v38, %v860_v16 }
  0xfa   :  { %v1327_v43 = vpack.c.bf16 %v883_v32, %v882_v31  ;;  %v1367_v1 = vpack.c.bf16 %v899_v44, %v898_v15  ;;  %v913_v15 = vsel %vm785_vm14, %v1972_v54, %v849_v5  ;;  %v682_v31 = vadd.f32 %v681_v10, %v619_v9  ;;  %v2000_v44 = vpop.f32.mrf.mxu3 }
  0xfb   :  { %v1402_v49 = vpack.c.bf16 %v913_v15, %v912_v3  ;;  %v925_v7 = vsel %vm797_vm0, %v1974_v55, %v861_v30  ;;  %v624_v30 = vmul.f32 %v1693_v53, %v1693_v53  ;;  %vm798_vm7 = vcmp.gt.f32.partialorder %v2000_v44, 0.0 }
  0xfc   :  { %1459 = vst [vmem:[%s2243_s2 + $0x30] sm:$0xff] %v1327_v43   ;;  %v1998_v43 = vpop.f32.mrf.mxu2  ;;  %v1432_v51 = vpack.c.bf16 %v925_v7, %v924_v22 }
  0xfd   :  { %1467 = vst [vmem:[%s2243_s2 + $0x70] sm:$0xff] %v1367_v1   ;;  %vm786_vm5 = vcmp.gt.f32.partialorder %v1998_v43, 0.0 }
  0xfe   :  { %v412_v57 = vpop.f32.mrf.mxu0  ;;  %v1979_v58 = vpop.f32.mrf.mxu1  ;;  %1474 = vst [vmem:[%s2243_s2 + $0xa8] sm:$0xff] %v1402_v49  }
  0xff   :  { %v620_v14 = vmul.f32 %v412_v57, %v412_v57  ;;  %v836_v28 = vmul.f32 0.2, %v1979_v58  ;;  %v820_v32 = vmul.f32 0.2, %v412_v57  ;;  %v550_v34 = vadd.f32 %v549_v12, %v412_v57  ;;  %1480 = vst [vmem:[%s2243_s2 + $0xd8] sm:$0xff] %v1432_v51  }
 0x100   :  { %vm772_vm1 = vcmp.gt.f32.partialorder %v1979_v58, 0.0  ;;  %vm756_vm2 = vcmp.gt.f32.partialorder %v412_v57, 0.0 }
 0x101   :  { %v683_v1 = vadd.f32 %v682_v31, %v620_v14  ;;  %v900_v16 = vsel %vm772_vm1, %v1979_v58, %v836_v28  ;;  %v884_v9 = vsel %vm756_vm2, %v412_v57, %v820_v32  ;;  %v623_v14 = vmul.f32 %v1681_v40, %v1681_v40 }
 0x102   :  { %v2034_v32 = vpop.f32.mrf.mxu3  ;;  %vm739_vm1 = vcmask 1040384  }
 0x103   :  { %vm799_vm8 = vcmp.gt.f32.partialorder %v2034_v32, 0.0 }
 0x104   :  { %v2032_v28 = vpop.f32.mrf.mxu2 }
 0x105   :  { %vm787_vm6 = vcmp.gt.f32.partialorder %v2032_v28, 0.0  ;;  %v851_v7 = vmul.f32 0.2, %v2032_v28 }
 0x106   :  { %v414_v45 = vpop.f32.mrf.mxu0  ;;  %v2002_v46 = vpop.f32.mrf.mxu1 }
 0x107   :  { %v551_v52 = vadd.f32 %v550_v34, %v414_v45  ;;  %v621_v19 = vmul.f32 %v414_v45, %v414_v45  ;;  %vm757_vm3 = vcmp.gt.f32.partialorder %v414_v45, 0.0  ;;  %v821_v41 = vmul.f32 0.2, %v414_v45 }
 0x108   :  { %vm773_vm4 = vcmp.gt.f32.partialorder %v2002_v46, 0.0  ;;  %v837_v5 = vmul.f32 0.2, %v2002_v46  ;;  %v862_v34 = vmul.f32 0.2, %v2000_v44  ;;  %v915_v51 = vsel %vm787_vm6, %v2032_v28, %v851_v7 }
 0x109   :  { %v552_v25 = vadd.f32 %v551_v52, %v1669_v33  ;;  %v684_v6 = vadd.f32 %v683_v1, %v621_v19  ;;  %v885_v3 = vsel %vm757_vm3, %v414_v45, %v821_v41  ;;  %v625_v33 = vmul.f32 %v1703_v62, %v1703_v62 }
 0x10a   :  { %v1332_v10 = vpack.c.bf16 %v885_v3, %v884_v9  ;;  %v901_v12 = vsel %vm773_vm4, %v2002_v46, %v837_v5  ;;  %v626_v52 = vmul.f32 %v1719_v13, %v1719_v13  ;;  %v926_v5 = vsel %vm798_vm7, %v2000_v44, %v862_v34 }
 0x10b   :  { %v553_v15 = vadd.f32 %v552_v25, %v1681_v40  ;;  %v685_v22 = vadd.f32 %v684_v6, %v622_v56  ;;  %v1372_v49 = vpack.c.bf16 %v901_v12, %v900_v16  ;;  %v850_v40 = vmul.f32 0.2, %v1998_v43 }
 0x10c   :  { %1460 = vst [vmem:[%s2243_s2 + $0x38] sm:$0xff] %v1332_v10   ;;  %v627_v16 = vmul.f32 %v1742_v26, %v1742_v26  ;;  %v628_v9 = vmul.f32 %v1763_v39, %v1763_v39  ;;  %v632_v34 = vmul.f32 %v1858_v42, %v1858_v42 }
 0x10d   :  { %v554_v57 = vadd.f32 %v553_v15, %v1693_v53  ;;  %v686_v31 = vadd.f32 %v685_v22, %v623_v14  ;;  %1468 = vst [vmem:[%s2243_s2 + $0x78] sm:$0xff] %v1372_v49   ;;  %v914_v1 = vsel %vm786_vm5, %v1998_v43, %v850_v40  ;;  %v2060_v14 = vpop.f32.mrf.mxu2  ;;  %v2062_v15 = vpop.f32.mrf.mxu3 }
 0x10e   :  { %v1407_v56 = vpack.c.bf16 %v915_v51, %v914_v1  ;;  %vm788_vm9 = vcmp.gt.f32.partialorder %v2060_v14, 0.0  ;;  %v633_v51 = vmul.f32 %v1883_v4, %v1883_v4  ;;  %vm800_vm11 = vcmp.gt.f32.partialorder %v2062_v15, 0.0 }
 0x10f   :  { %v555_v53 = vadd.f32 %v554_v57, %v1703_v62  ;;  %v687_v45 = vadd.f32 %v686_v31, %v624_v30  ;;  %v863_v62 = vmul.f32 0.2, %v2034_v32  ;;  %v630_v30 = vmul.f32 %v1806_v2, %v1806_v2 }
 0x110   :  { %1475 = vst [vmem:[%s2243_s2 + $0xb0] sm:$0xff] %v1407_v56   ;;  %v631_v57 = vmul.f32 %v1831_v21, %v1831_v21  ;;  %v634_v56 = vmul.f32 %v1912_v29, %v1912_v29 }
 0x111   :  { %v556_v19 = vadd.f32 %v555_v53, %v1719_v13  ;;  %v688_v41 = vadd.f32 %v687_v45, %v625_v33  ;;  %v927_v13 = vsel %vm799_vm8, %v2034_v32, %v863_v62  ;;  %v852_v53 = vmul.f32 0.2, %v2060_v14 }
 0x112   :  { %v1437_v12 = vpack.c.bf16 %v927_v13, %v926_v5  ;;  %v635_v13 = vmul.f32 %v1949_v8, %v1949_v8 }
 0x113   :  { %v557_v25 = vadd.f32 %v556_v19, %v1742_v26  ;;  %v689_v6 = vadd.f32 %v688_v41, %v626_v52  ;;  %v629_v26 = vmul.f32 %v1782_v50, %v1782_v50  ;;  %v916_v19 = vsel %vm788_vm9, %v2060_v14, %v852_v53 }
 0x114   :  { %1481 = vst [vmem:[%s2243_s2 + $0xe0] sm:$0xff] %v1437_v12  }
 0x115   :  { %v558_v3 = vadd.f32 %v557_v25, %v1763_v39  ;;  %v690_v10 = vadd.f32 %v689_v6, %v627_v16  ;;  %v2080_v45 = vpop.f32.mrf.mxu2  ;;  %v2082_v1 = vpop.f32.mrf.mxu3 }
 0x116   :  { %vm789_vm10 = vcmp.gt.f32.partialorder %v2080_v45, 0.0  ;;  %vm801_vm12 = vcmp.gt.f32.partialorder %v2082_v1, 0.0 }
 0x117   :  { %v691_v22 = vadd.f32 %v690_v10, %v628_v9  ;;  %v559_v49 = vadd.f32 %v558_v3, %v1782_v50  ;;  %v636_v10 = vmul.f32 %v1979_v58, %v1979_v58 }
 0x119   :  { %v560_v39 = vadd.f32 %v559_v49, %v1806_v2  ;;  %v692_v33 = vadd.f32 %v691_v22, %v629_v26  ;;  %v864_v2 = vmul.f32 0.2, %v2062_v15 }
 0x11b   :  { %v561_v31 = vadd.f32 %v560_v39, %v1831_v21  ;;  %v693_v40 = vadd.f32 %v692_v33, %v630_v30  ;;  %v853_v21 = vmul.f32 0.2, %v2080_v45  ;;  %v928_v25 = vsel %vm800_vm11, %v2062_v15, %v864_v2 }
 0x11c   :  { %v638_v39 = vmul.f32 %v1701_v60, %v1701_v60 }
 0x11d   :  { %v562_v50 = vadd.f32 %v561_v31, %v1858_v42  ;;  %v694_v7 = vadd.f32 %v693_v40, %v631_v57  ;;  %v917_v41 = vsel %vm789_vm10, %v2080_v45, %v853_v21  ;;  %v2110_v22 = vpop.f32.mrf.mxu3 }
 0x11e   :  { %v1412_v16 = vpack.c.bf16 %v917_v41, %v916_v19  ;;  %vm802_vm13 = vcmp.gt.f32.partialorder %v2110_v22, 0.0 }
 0x11f   :  { %v563_v42 = vadd.f32 %v562_v50, %v1883_v4  ;;  %v695_v52 = vadd.f32 %v694_v7, %v632_v34  ;;  %v865_v4 = vmul.f32 0.2, %v2082_v1  ;;  %v866_v7 = vmul.f32 0.2, %v2110_v22 }
 0x120   :  { %1476 = vst [vmem:[%s2243_s2 + $0xb8] sm:$0xff] %v1412_v16  }
 0x121   :  { %v564_v5 = vadd.f32 %v563_v42, %v1912_v29  ;;  %v696_v62 = vadd.f32 %v695_v52, %v633_v51  ;;  %v929_v29 = vsel %vm801_vm12, %v2082_v1, %v865_v4  ;;  %v930_v51 = vsel %vm802_vm13, %v2110_v22, %v866_v7 }
 0x122   :  { %v1442_v26 = vpack.c.bf16 %v929_v29, %v928_v25  ;;  %v642_v42 = vmul.f32 %v1775_v47, %v1775_v47  ;;  %v652_v7 = vmul.f32 %v2060_v14, %v2060_v14 }
 0x123   :  { %v565_v6 = vadd.f32 %v564_v5, %v1949_v8  ;;  %v697_v9 = vadd.f32 %v696_v62, %v634_v56  ;;  %v637_v8 = vmul.f32 %v2002_v46, %v2002_v46  ;;  %v643_v56 = vmul.f32 %v1800_v63, %v1800_v63 }
 0x124   :  { %1482 = vst [vmem:[%s2243_s2 + $0xe8] sm:$0xff] %v1442_v26  }
 0x125   :  { %v698_v3 = vadd.f32 %v697_v9, %v635_v13  ;;  %v566_v12 = vadd.f32 %v565_v6, %v1979_v58  ;;  %v639_v58 = vmul.f32 %v1717_v11, %v1717_v11  ;;  %v2128_v53 = vpop.f32.mrf.mxu3 }
 0x126   :  { %vm803_vm14 = vcmp.gt.f32.partialorder %v2128_v53, 0.0 }
 0x127   :  { %v567_v49 = vadd.f32 %v566_v12, %v2002_v46  ;;  %v699_v30 = vadd.f32 %v698_v3, %v636_v10  ;;  %v640_v46 = vmul.f32 %v1738_v24, %v1738_v24  ;;  %v647_v3 = vmul.f32 %v1906_v23, %v1906_v23 }
 0x128   :  { %v648_v12 = vmul.f32 %v1943_v20, %v1943_v20 }
 0x129   :  { %v568_v33 = vadd.f32 %v567_v49, %v1701_v60  ;;  %v700_v57 = vadd.f32 %v699_v30, %v637_v8  ;;  %v867_v60 = vmul.f32 0.2, %v2128_v53 }
 0x12b   :  { %v569_v31 = vadd.f32 %v568_v33, %v1717_v11  ;;  %v701_v40 = vadd.f32 %v700_v57, %v638_v39  ;;  %v641_v11 = vmul.f32 %v1759_v37, %v1759_v37 }
 0x12d   :  { %v570_v34 = vadd.f32 %v569_v31, %v1738_v24  ;;  %v702_v50 = vadd.f32 %v701_v40, %v639_v58  ;;  %v931_v24 = vsel %vm803_vm14, %v2128_v53, %v867_v60  ;;  %v2150_v4 = vpop.f32.mrf.mxu3  ;;  %v650_v31 = vmul.f32 %v1998_v43, %v1998_v43 }
 0x12e   :  { %v1447_v41 = vpack.c.bf16 %v931_v24, %v930_v51  ;;  %vm804_vm15 = vcmp.gt.f32.partialorder %v2150_v4, 0.0  ;;  %v655_v24 = vmul.f32 %v1802_v0, %v1802_v0 }
 0x12f   :  { %v571_v2 = vadd.f32 %v570_v34, %v1759_v37  ;;  %v703_v21 = vadd.f32 %v702_v50, %v640_v46  ;;  %v644_v37 = vmul.f32 %v1824_v17, %v1824_v17  ;;  %v651_v50 = vmul.f32 %v2032_v28, %v2032_v28 }
 0x130   :  { %1483 = vst [vmem:[%s2243_s2 + $0xf0] sm:$0xff] %v1447_v41  }
 0x131   :  { %v572_v52 = vadd.f32 %v571_v2, %v1775_v47  ;;  %v704_v19 = vadd.f32 %v703_v21, %v641_v11  ;;  %v645_v47 = vmul.f32 %v1852_v35, %v1852_v35  ;;  %v654_v21 = vmul.f32 %v1777_v48, %v1777_v48 }
 0x133   :  { %v573_v5 = vadd.f32 %v572_v52, %v1800_v63  ;;  %v705_v62 = vadd.f32 %v704_v19, %v642_v42  ;;  %v646_v63 = vmul.f32 %v1876_v59, %v1876_v59 }
 0x135   :  { %v706_v16 = vadd.f32 %v705_v62, %v643_v56  ;;  %v574_v25 = vadd.f32 %v573_v5, %v1824_v17  ;;  %v2165_v8 = vpop.f32.mrf.mxu3 }
 0x136   :  { %vm805_vm0 = vcmp.gt.f32.partialorder %v2165_v8, 0.0 }
 0x137   :  { %v575_v6 = vadd.f32 %v574_v25, %v1852_v35  ;;  %v707_v13 = vadd.f32 %v706_v16, %v644_v37  ;;  %v868_v35 = vmul.f32 0.2, %v2150_v4 }
 0x139   :  { %v576_v9 = vadd.f32 %v575_v6, %v1876_v59  ;;  %v708_v29 = vadd.f32 %v707_v13, %v645_v47  ;;  %v869_v59 = vmul.f32 0.2, %v2165_v8  ;;  %v932_v33 = vsel %vm804_vm15, %v2150_v4, %v868_v35 }
 0x13b   :  { %v577_v10 = vadd.f32 %v576_v9, %v1906_v23  ;;  %v709_v17 = vadd.f32 %v708_v29, %v646_v63  ;;  %v649_v23 = vmul.f32 %v1972_v54, %v1972_v54 }
 0x13d   :  { %v578_v26 = vadd.f32 %v577_v10, %v1943_v20  ;;  %v710_v49 = vadd.f32 %v709_v17, %v647_v3  ;;  %v933_v20 = vsel %vm805_vm0, %v2165_v8, %v869_v59  ;;  %v666_v59 = vmul.f32 %v2110_v22, %v2110_v22 }
 0x13e   :  { %v1452_v40 = vpack.c.bf16 %v933_v20, %v932_v33  ;;  %v669_v20 = vmul.f32 %v2165_v8, %v2165_v8 }
 0x13f   :  { %v579_v30 = vadd.f32 %v578_v26, %v1972_v54  ;;  %v711_v39 = vadd.f32 %v710_v49, %v648_v12  ;;  %v665_v26 = vmul.f32 %v2082_v1, %v2082_v1 }
 0x140   :  { %1484 = vst [vmem:[%s2243_s2 + $0xf8] sm:$0xff] %v1452_v40   ;;  %s1524_s2 = smov [#allocation2]  }
 0x141   :  { %v712_v57 = vadd.f32 %v711_v39, %v649_v23  ;;  %v580_v58 = vadd.f32 %v579_v30, %v1998_v43  ;;  %v653_v43 = vmul.f32 %v2080_v45, %v2080_v45  ;;  %v667_v23 = vmul.f32 %v2128_v53, %v2128_v53  ;;  %s1069_s6 = sshll.u32 %s1524_s2, 4  ;;  %s1070_s6 = int_to_ptr.vmem [resolvable:$true] %s1069_s6 }
 0x142   :  { %v668_v39 = vmul.f32 %v2150_v4, %v2150_v4 }
 0x143   :  { %v713_v46 = vadd.f32 %v712_v57, %v650_v31  ;;  %v581_v34 = vadd.f32 %v580_v58, %v2032_v28 }
 0x145   :  { %v714_v54 = vadd.f32 %v713_v46, %v651_v50  ;;  %v582_v60 = vadd.f32 %v581_v34, %v2060_v14  ;;  %v656_v14 = vmul.f32 %v1826_v18, %v1826_v18 }
 0x147   :  { %v583_v11 = vadd.f32 %v582_v60, %v2080_v45  ;;  %v715_v2 = vadd.f32 %v714_v54, %v652_v7  ;;  %v657_v45 = vmul.f32 %v1854_v36, %v1854_v36 }
 0x149   :  { %v584_v28 = vadd.f32 %v583_v11, %v1777_v48  ;;  %v716_v51 = vadd.f32 %v715_v2, %v653_v43  ;;  %v658_v48 = vmul.f32 %v1878_v61, %v1878_v61 }
 0x14b   :  { %v585_v42 = vadd.f32 %v584_v28, %v1802_v0  ;;  %v717_v52 = vadd.f32 %v716_v51, %v654_v21  ;;  %v659_v0 = vmul.f32 %v1908_v27, %v1908_v27 }
 0x14d   :  { %v586_v19 = vadd.f32 %v585_v42, %v1826_v18  ;;  %v718_v41 = vadd.f32 %v717_v52, %v655_v24  ;;  %v660_v18 = vmul.f32 %v1945_v38, %v1945_v38 }
 0x14f   :  { %v587_v56 = vadd.f32 %v586_v19, %v1854_v36  ;;  %v719_v5 = vadd.f32 %v718_v41, %v656_v14  ;;  %v661_v36 = vmul.f32 %v1974_v55, %v1974_v55 }
 0x151   :  { %v588_v62 = vadd.f32 %v587_v56, %v1878_v61  ;;  %v720_v37 = vadd.f32 %v719_v5, %v657_v45  ;;  %v662_v61 = vmul.f32 %v2000_v44, %v2000_v44 }
 0x153   :  { %v589_v16 = vadd.f32 %v588_v62, %v1908_v27  ;;  %v721_v25 = vadd.f32 %v720_v37, %v658_v48  ;;  %v663_v27 = vmul.f32 %v2034_v32, %v2034_v32 }
 0x155   :  { %v722_v47 = vadd.f32 %v721_v25, %v659_v0  ;;  %v590_v6 = vadd.f32 %v589_v16, %v1945_v38  ;;  %v664_v38 = vmul.f32 %v2062_v15, %v2062_v15 }
 0x157   :  { %v591_v13 = vadd.f32 %v590_v6, %v1974_v55  ;;  %v723_v63 = vadd.f32 %v722_v47, %v660_v18 }
 0x159   :  { %v592_v9 = vadd.f32 %v591_v13, %v2000_v44  ;;  %v724_v29 = vadd.f32 %v723_v63, %v661_v36 }
 0x15b   :  { %v593_v3 = vadd.f32 %v592_v9, %v2034_v32  ;;  %v725_v10 = vadd.f32 %v724_v29, %v662_v61 }
 0x15d   :  { %v594_v17 = vadd.f32 %v593_v3, %v2062_v15  ;;  %v726_v12 = vadd.f32 %v725_v10, %v663_v27 }
 0x15f   :  { %v595_v55 = vadd.f32 %v594_v17, %v2082_v1  ;;  %v727_v49 = vadd.f32 %v726_v12, %v664_v38 }
 0x161   :  { %v728_v44 = vadd.f32 %v727_v49, %v665_v26  ;;  %v596_v35 = vadd.f32 %v595_v55, %v2110_v22 }
 0x163   :  { %v729_v32 = vadd.f32 %v728_v44, %v666_v59  ;;  %v597_v30 = vadd.f32 %v596_v35, %v2128_v53 }
 0x165   :  { %v730_v15 = vadd.f32 %v729_v32, %v667_v23  ;;  %v598_v33 = vadd.f32 %v597_v30, %v2150_v4 }
 0x167   :  { %v599_v1 = vadd.f32 %v598_v33, %v2165_v8  ;;  %v731_v57 = vadd.f32 %v730_v15, %v668_v39 }
 0x169   :  { %v600_v58 = vrot.slane %v599_v1, 4  ;;  %v732_v22 = vadd.f32 %v731_v57, %v669_v20 }
 0x16b   :  { %v601_v31 = vadd.f32 %v600_v58, %v599_v1  ;;  %v733_v40 = vrot.slane %v732_v22, 4 }
 0x16d   :  { %v602_v46 = vrot.slane %v601_v31, 2  ;;  %v734_v34 = vadd.f32 %v733_v40, %v732_v22 }
 0x16f   :  { %v603_v50 = vadd.f32 %v602_v46, %v601_v31  ;;  %v735_v53 = vrot.slane %v734_v34, 2 }
 0x171   :  { %v604_v54 = vrot.slane %v603_v50, 1  ;;  %v736_v7 = vadd.f32 %v735_v53, %v734_v34 }
 0x173   :  { %v737_v60 = vrot.slane %v736_v7, 1  ;;  %v605_v4 = vadd.f32 %v604_v54, %v603_v50 }
 0x175   :  { %v738_v8 = vadd.f32 %v737_v60, %v736_v7 }
 0x177   :  { %v740_v11 = vsel %vm739_vm1, %v605_v4, %v738_v8 }
 0x178   :  { %741 = vst [vmem:[#allocation2] sm:$0x3] %v740_v11 }
 0x179   :  { %1074 = dma.vmem_to_hbm [thread:$0]  %s1070_s6, 32, %s1072_s9, [#allocation3]  }
 0x17a   :  { %1522 = dma.done.wait [#allocation3], 32  }
 0x17b   :  { %1523 = vsyncadd [#allocation3], 4294967264 }
 0x17c   :  { %1081 = vsyncpa [#allocation3], 1 }

// kernel: discriminator_forward.10
= control target key start
LH: loop header
LB: loop body
LE: loop exit
PB: predicated region body
PF: predicated region fallthrough
CT: control target
= control target key end

     0   :  { %s338_s0 = inlined_call_operand.vmem [shape: f32[128,128], index: 0, kind: input, shape index: {}]   ;;  %s339_s1 = inlined_call_operand.vmem [shape: f32[1,128], index: 1, kind: input, shape index: {}]   ;;  %s340_s2 = inlined_call_operand.vmem [shape: f32[1,128], index: 2, kind: input, shape index: {}]   ;;  %s341_s3 = inlined_call_operand.vmem [shape: bf16[128,128], index: 3, kind: output, shape index: {}]  }
   0x1   :  { %v14_v0 = vld [vmem:[%s338_s0] sm:$0xff]  ;;  %v15_v1 = vld [vmem:[%s338_s0 + $0x8] sm:$0xff]  ;;  %v16_v4 = vld [vmem:[%s338_s0 + $0x10] sm:$0xff] }
   0x2   :  { %v232_v2 = vld [vmem:[%s339_s1] ss:$0 sm:$0xff]  ;;  %v17_v5 = vld [vmem:[%s338_s0 + $0x18] sm:$0xff]  ;;  %v19_v11 = vld [vmem:[%s338_s0 + $0x28] sm:$0xff] }
   0x3   :  { %v237_v3 = vld [vmem:[%s340_s2] ss:$0 sm:$0xff]  ;;  %v34_v7 = vmul.f32 %v232_v2, %v14_v0  ;;  %v35_v8 = vmul.f32 %v232_v2, %v15_v1  ;;  %v36_v9 = vmul.f32 %v232_v2, %v16_v4  ;;  %v37_v10 = vmul.f32 %v232_v2, %v17_v5  ;;  %v20_v12 = vld [vmem:[%s338_s0 + $0x30] sm:$0xff]  ;;  %v21_v13 = vld [vmem:[%s338_s0 + $0x38] sm:$0xff] }
   0x4   :  { %v18_v6 = vld [vmem:[%s338_s0 + $0x20] sm:$0xff]  ;;  %v39_v15 = vmul.f32 %v232_v2, %v19_v11  ;;  %v40_v16 = vmul.f32 %v232_v2, %v20_v12  ;;  %v41_v17 = vmul.f32 %v232_v2, %v21_v13  ;;  %v23_v37 = vld [vmem:[%s338_s0 + $0x48] sm:$0xff]  ;;  %v24_v38 = vld [vmem:[%s338_s0 + $0x50] sm:$0xff] }
   0x5   :  { %v38_v14 = vmul.f32 %v232_v2, %v18_v6  ;;  %v54_v18 = vadd.f32 %v237_v3, %v34_v7  ;;  %v55_v19 = vadd.f32 %v237_v3, %v35_v8  ;;  %v56_v20 = vadd.f32 %v237_v3, %v36_v9  ;;  %v22_v32 = vld [vmem:[%s338_s0 + $0x40] sm:$0xff]  ;;  %v25_v39 = vld [vmem:[%s338_s0 + $0x58] sm:$0xff]  ;;  %v27_v51 = vld [vmem:[%s338_s0 + $0x68] sm:$0xff] }
   0x6   :  { %v57_v21 = vadd.f32 %v237_v3, %v37_v10  ;;  %v59_v23 = vadd.f32 %v237_v3, %v39_v15  ;;  %v60_v24 = vadd.f32 %v237_v3, %v40_v16  ;;  %v61_v25 = vadd.f32 %v237_v3, %v41_v17  ;;  %v26_v50 = vld [vmem:[%s338_s0 + $0x60] sm:$0xff]  ;;  %v28_v63 = vld [vmem:[%s338_s0 + $0x70] sm:$0xff]  ;;  %v29_v0 = vld [vmem:[%s338_s0 + $0x78] sm:$0xff] }
   0x7   :  { %v58_v22 = vadd.f32 %v237_v3, %v38_v14  ;;  %vm70_vm0 = vcmp.gt.f32.partialorder %v54_v18, 0.0  ;;  %vm71_vm1 = vcmp.gt.f32.partialorder %v55_v19, 0.0  ;;  %v86_v26 = vmul.f32 0.2, %v54_v18 }
   0x8   :  { %v87_v27 = vmul.f32 0.2, %v55_v19  ;;  %vm72_vm2 = vcmp.gt.f32.partialorder %v56_v20, 0.0  ;;  %vm73_vm3 = vcmp.gt.f32.partialorder %v57_v21, 0.0  ;;  %v88_v28 = vmul.f32 0.2, %v56_v20 }
   0x9   :  { %v89_v29 = vmul.f32 0.2, %v57_v21  ;;  %v102_v30 = vsel %vm70_vm0, %v54_v18, %v86_v26  ;;  %vm74_vm4 = vcmp.gt.f32.partialorder %v58_v22, 0.0  ;;  %vm75_vm5 = vcmp.gt.f32.partialorder %v59_v23, 0.0 }
   0xa   :  { %v103_v31 = vsel %vm71_vm1, %v55_v19, %v87_v27  ;;  %v104_v34 = vsel %vm72_vm2, %v56_v20, %v88_v28  ;;  %v90_v36 = vmul.f32 0.2, %v58_v22  ;;  %v91_v41 = vmul.f32 0.2, %v59_v23 }
   0xb   :  { %v157_v33 = vpack.c.bf16 %v103_v31, %v102_v30  ;;  %v105_v35 = vsel %vm73_vm3, %v57_v21, %v89_v29  ;;  %vm76_vm6 = vcmp.gt.f32.partialorder %v60_v24, 0.0  ;;  %vm77_vm7 = vcmp.gt.f32.partialorder %v61_v25, 0.0 }
   0xc   :  { %v162_v40 = vpack.c.bf16 %v105_v35, %v104_v34  ;;  %v106_v42 = vsel %vm74_vm4, %v58_v22, %v90_v36  ;;  %v92_v43 = vmul.f32 0.2, %v60_v24  ;;  %v93_v44 = vmul.f32 0.2, %v61_v25 }
   0xd   :  { %158 = vst [vmem:[%s341_s3] sm:$0xff] %v157_v33   ;;  %v42_v45 = vmul.f32 %v232_v2, %v22_v32  ;;  %v107_v46 = vsel %vm75_vm5, %v59_v23, %v91_v41  ;;  %v43_v47 = vmul.f32 %v232_v2, %v23_v37  ;;  %v44_v48 = vmul.f32 %v232_v2, %v24_v38 }
   0xe   :  { %194 = vst [vmem:[%s341_s3 + $0x8] sm:$0xff] %v162_v40   ;;  %v45_v49 = vmul.f32 %v232_v2, %v25_v39  ;;  %v167_v52 = vpack.c.bf16 %v107_v46, %v106_v42  ;;  %v108_v53 = vsel %vm76_vm6, %v60_v24, %v92_v43  ;;  %v109_v54 = vsel %vm77_vm7, %v61_v25, %v93_v44 }
   0xf   :  { %v62_v55 = vadd.f32 %v237_v3, %v42_v45  ;;  %v172_v56 = vpack.c.bf16 %v109_v54, %v108_v53  ;;  %v63_v57 = vadd.f32 %v237_v3, %v43_v47  ;;  %v64_v58 = vadd.f32 %v237_v3, %v44_v48 }
  0x10   :  { %v65_v59 = vadd.f32 %v237_v3, %v45_v49  ;;  %195 = vst [vmem:[%s341_s3 + $0x10] sm:$0xff] %v167_v52   ;;  %v46_v61 = vmul.f32 %v232_v2, %v26_v50  ;;  %v47_v62 = vmul.f32 %v232_v2, %v27_v51  ;;  %v48_v10 = vmul.f32 %v232_v2, %v28_v63 }
  0x11   :  { %vm78_vm8 = vcmp.gt.f32.partialorder %v62_v55, 0.0  ;;  %v94_v60 = vmul.f32 0.2, %v62_v55  ;;  %196 = vst [vmem:[%s341_s3 + $0x18] sm:$0xff] %v172_v56   ;;  %vm79_vm9 = vcmp.gt.f32.partialorder %v63_v57, 0.0  ;;  %vm80_vm10 = vcmp.gt.f32.partialorder %v64_v58, 0.0 }
  0x12   :  { %v95_v1 = vmul.f32 0.2, %v63_v57  ;;  %vm81_vm11 = vcmp.gt.f32.partialorder %v65_v59, 0.0  ;;  %v96_v5 = vmul.f32 0.2, %v64_v58  ;;  %v66_v7 = vadd.f32 %v237_v3, %v46_v61 }
  0x13   :  { %v110_v4 = vsel %vm78_vm8, %v62_v55, %v94_v60  ;;  %v97_v6 = vmul.f32 0.2, %v65_v59  ;;  %v67_v9 = vadd.f32 %v237_v3, %v47_v62  ;;  %v49_v11 = vmul.f32 %v232_v2, %v29_v0 }
  0x14   :  { %v111_v8 = vsel %vm79_vm9, %v63_v57, %v95_v1  ;;  %v112_v13 = vsel %vm80_vm10, %v64_v58, %v96_v5  ;;  %vm82_vm12 = vcmp.gt.f32.partialorder %v66_v7, 0.0  ;;  %v98_v16 = vmul.f32 0.2, %v66_v7 }
  0x15   :  { %v177_v12 = vpack.c.bf16 %v111_v8, %v110_v4  ;;  %v113_v14 = vsel %vm81_vm11, %v65_v59, %v97_v6  ;;  %vm83_vm13 = vcmp.gt.f32.partialorder %v67_v9, 0.0  ;;  %v99_v17 = vmul.f32 0.2, %v67_v9 }
  0x16   :  { %v182_v15 = vpack.c.bf16 %v113_v14, %v112_v13  ;;  %v68_v18 = vadd.f32 %v237_v3, %v48_v10  ;;  %v69_v19 = vadd.f32 %v237_v3, %v49_v11  ;;  %v114_v2 = vsel %vm82_vm12, %v66_v7, %v98_v16 }
  0x17   :  { %197 = vst [vmem:[%s341_s3 + $0x20] sm:$0xff] %v177_v12   ;;  %v115_v20 = vsel %vm83_vm13, %v67_v9, %v99_v17 }
  0x18   :  { %198 = vst [vmem:[%s341_s3 + $0x28] sm:$0xff] %v182_v15   ;;  %v187_v21 = vpack.c.bf16 %v115_v20, %v114_v2  ;;  %vm84_vm14 = vcmp.gt.f32.partialorder %v68_v18, 0.0  ;;  %vm85_vm15 = vcmp.gt.f32.partialorder %v69_v19, 0.0  ;;  %v100_v22 = vmul.f32 0.2, %v68_v18 }
  0x19   :  { %v101_v23 = vmul.f32 0.2, %v69_v19 }
  0x1a   :  { %199 = vst [vmem:[%s341_s3 + $0x30] sm:$0xff] %v187_v21   ;;  %v116_v24 = vsel %vm84_vm14, %v68_v18, %v100_v22 }
  0x1b   :  { %v117_v25 = vsel %vm85_vm15, %v69_v19, %v101_v23 }
  0x1c   :  { %v192_v26 = vpack.c.bf16 %v117_v25, %v116_v24 }
  0x1e   :  { %200 = vst [vmem:[%s341_s3 + $0x38] sm:$0xff] %v192_v26  }

// kernel: discriminator_forward.9
= control target key start
LH: loop header
LB: loop body
LE: loop exit
PB: predicated region body
PF: predicated region fallthrough
CT: control target
= control target key end

     0   :  { %vm2647_vm0 = vcmask 1040384   ;;  %s5321_s1 = inlined_call_operand.vmem [shape: bf16[2048,128], index: 1, kind: input, shape index: {}]   ;;  %s5322_s0 = inlined_call_operand.vmem [shape: bf16[128,2048], index: 0, kind: input, shape index: {}]   ;;  %s5323_s2 = inlined_call_operand.vmem [shape: f32[128,128], index: 2, kind: output, shape index: {0}]   ;;  %s5324_s3 = inlined_call_operand.vmem [shape: f32[1,2,128], index: 3, kind: output, shape index: {1}]  }
   0x1   :  { %v3833_v0 = vld [vmem:[%s5321_s1 + $0x38] sm:$0xff]  ;;  %v3832_v4 = vld [vmem:[%s5321_s1 + $0x30] sm:$0xff]  ;;  %v3831_v8 = vld [vmem:[%s5321_s1 + $0x28] sm:$0xff] }
   0x2   :  { %v3841_v1 = vld [vmem:[%s5321_s1 + $0x78] sm:$0xff]  ;;  %1805 = vmatpush.bf16.msra.mxu0 %v3833_v0  ;;  %v3840_v5 = vld [vmem:[%s5321_s1 + $0x70] sm:$0xff]  ;;  %v3839_v9 = vld [vmem:[%s5321_s1 + $0x68] sm:$0xff] }
   0x3   :  { %v3849_v2 = vld [vmem:[%s5321_s1 + $0xb8] sm:$0xff]  ;;  %1854 = vmatpush.bf16.msra.mxu1 %v3841_v1  ;;  %v3848_v6 = vld [vmem:[%s5321_s1 + $0xb0] sm:$0xff]  ;;  %v3847_v10 = vld [vmem:[%s5321_s1 + $0xa8] sm:$0xff] }
   0x4   :  { %v3857_v3 = vld [vmem:[%s5321_s1 + $0xf8] sm:$0xff]  ;;  %1903 = vmatpush.bf16.msra.mxu2 %v3849_v2  ;;  %v3856_v7 = vld [vmem:[%s5321_s1 + $0xf0] sm:$0xff]  ;;  %v3855_v11 = vld [vmem:[%s5321_s1 + $0xe8] sm:$0xff] }
   0x5   :  { %1952 = vmatpush.bf16.msra.mxu3 %v3857_v3  ;;  %v3830_v12 = vld [vmem:[%s5321_s1 + $0x20] sm:$0xff]  ;;  %v3829_v16 = vld [vmem:[%s5321_s1 + $0x18] sm:$0xff]  ;;  %v3828_v20 = vld [vmem:[%s5321_s1 + $0x10] sm:$0xff] }
   0x6   :  { %1806 = vmatpush.bf16.msra.mxu0 %v3832_v4  ;;  %v3838_v13 = vld [vmem:[%s5321_s1 + $0x60] sm:$0xff]  ;;  %v3837_v17 = vld [vmem:[%s5321_s1 + $0x58] sm:$0xff]  ;;  %v3836_v21 = vld [vmem:[%s5321_s1 + $0x50] sm:$0xff] }
   0x7   :  { %1855 = vmatpush.bf16.msra.mxu1 %v3840_v5  ;;  %v3846_v14 = vld [vmem:[%s5321_s1 + $0xa0] sm:$0xff]  ;;  %v3845_v18 = vld [vmem:[%s5321_s1 + $0x98] sm:$0xff]  ;;  %v3844_v22 = vld [vmem:[%s5321_s1 + $0x90] sm:$0xff] }
   0x8   :  { %1904 = vmatpush.bf16.msra.mxu2 %v3848_v6  ;;  %v3854_v15 = vld [vmem:[%s5321_s1 + $0xe0] sm:$0xff]  ;;  %v3853_v19 = vld [vmem:[%s5321_s1 + $0xd8] sm:$0xff]  ;;  %v3852_v23 = vld [vmem:[%s5321_s1 + $0xd0] sm:$0xff] }
   0x9   :  { %1953 = vmatpush.bf16.msra.mxu3 %v3856_v7  ;;  %v3827_v24 = vld [vmem:[%s5321_s1 + $0x8] sm:$0xff]  ;;  %v3826_v28 = vld [vmem:[%s5321_s1] sm:$0xff]  ;;  %v3881_v40 = vld [vmem:[%s5321_s1 + $0x1b8] sm:$0xff] }
   0xa   :  { %1807 = vmatpush.bf16.msra.mxu0 %v3831_v8  ;;  %v3835_v25 = vld [vmem:[%s5321_s1 + $0x48] sm:$0xff]  ;;  %v3834_v29 = vld [vmem:[%s5321_s1 + $0x40] sm:$0xff]  ;;  %v3865_v41 = vld [vmem:[%s5321_s1 + $0x138] sm:$0xff] }
   0xb   :  { %1856 = vmatpush.bf16.msra.mxu1 %v3839_v9  ;;  %v3843_v26 = vld [vmem:[%s5321_s1 + $0x88] sm:$0xff]  ;;  %v3842_v30 = vld [vmem:[%s5321_s1 + $0x80] sm:$0xff]  ;;  %v3889_v46 = vld [vmem:[%s5321_s1 + $0x1f8] sm:$0xff] }
   0xc   :  { %1905 = vmatpush.bf16.msra.mxu2 %v3847_v10  ;;  %v3851_v27 = vld [vmem:[%s5321_s1 + $0xc8] sm:$0xff]  ;;  %v3850_v31 = vld [vmem:[%s5321_s1 + $0xc0] sm:$0xff]  ;;  %v3873_v47 = vld [vmem:[%s5321_s1 + $0x178] sm:$0xff] }
   0xd   :  { %1954 = vmatpush.bf16.msra.mxu3 %v3855_v11  ;;  %v2676_v32 = vld [vmem:[%s5322_s0] sm:$0xf]  ;;  %v3698_v34 = vld [vmem:[%s5322_s0 + $0x4] sm:$0xf]  ;;  %v2684_v36 = vld [vmem:[%s5322_s0 + $0x8] sm:$0xf] }
   0xe   :  { %1808 = vmatpush.bf16.msra.mxu0 %v3830_v12  ;;  %v3706_v33 = vld [vmem:[%s5322_s0 + $0x3c] sm:$0xf0]  ;;  %v2678_v35 = vld [vmem:[%s5322_s0 + $0x40] sm:$0xf0]  ;;  %v3707_v37 = vld [vmem:[%s5322_s0 + $0x44] sm:$0xf0] }
   0xf   :  { %1857 = vmatpush.bf16.msra.mxu1 %v3838_v13  ;;  %v3699_v38 = vld [vmem:[%s5322_s0 + $0xc] sm:$0xf]  ;;  %v2677_v42 = vor.u32 %v3706_v33, %v2676_v32  ;;  %v2681_v43 = vor.u32 %v3698_v34, %v2678_v35  ;;  %v2685_v44 = vor.u32 %v3707_v37, %v2684_v36  ;;  %v3880_v48 = vld [vmem:[%s5321_s1 + $0x1b0] sm:$0xff]  ;;  %v2740_v56 = vld [vmem:[%s5322_s0 + $0x80] sm:$0xf] }
  0x10   :  { %1906 = vmatpush.bf16.msra.mxu2 %v3846_v14  ;;  %v2686_v39 = vld [vmem:[%s5322_s0 + $0x48] sm:$0xf0]  ;;  %v3864_v49 = vld [vmem:[%s5321_s1 + $0x130] sm:$0xff]  ;;  %v3722_v57 = vld [vmem:[%s5322_s0 + $0xbc] sm:$0xf0] }
  0x11   :  { %1955 = vmatpush.bf16.msra.mxu3 %v3854_v15  ;;  %v2689_v45 = vor.u32 %v3699_v38, %v2686_v39  ;;  %v3888_v50 = vld [vmem:[%s5321_s1 + $0x1f0] sm:$0xff]  ;;  %v3879_v52 = vld [vmem:[%s5321_s1 + $0x1a8] sm:$0xff]  ;;  %v3714_v58 = vld [vmem:[%s5322_s0 + $0x84] sm:$0xf]  ;;  %v2741_v0 = vor.u32 %v3722_v57, %v2740_v56 }
  0x12   :  { %1809 = vmatpush.bf16.msra.mxu0 %v3829_v16  ;;  %v3872_v51 = vld [vmem:[%s5321_s1 + $0x170] sm:$0xff]  ;;  %v3863_v53 = vld [vmem:[%s5321_s1 + $0x128] sm:$0xff]  ;;  %v2742_v59 = vld [vmem:[%s5322_s0 + $0xc0] sm:$0xf0] }
  0x13   :  { %1858 = vmatpush.bf16.msra.mxu1 %v3837_v17  ;;  %v3887_v54 = vld [vmem:[%s5321_s1 + $0x1e8] sm:$0xff]  ;;  %v2745_v1 = vor.u32 %v3714_v58, %v2742_v59  ;;  %v3878_v4 = vld [vmem:[%s5321_s1 + $0x1a0] sm:$0xff]  ;;  %v3876_v36 = vld [vmem:[%s5321_s1 + $0x190] sm:$0xff] }
  0x14   :  { %1907 = vmatpush.bf16.msra.mxu2 %v3845_v18  ;;  %v3871_v55 = vld [vmem:[%s5321_s1 + $0x168] sm:$0xff]  ;;  %v3862_v5 = vld [vmem:[%s5321_s1 + $0x120] sm:$0xff]  ;;  %v3860_v37 = vld [vmem:[%s5321_s1 + $0x110] sm:$0xff] }
  0x15   :  { %1956 = vmatpush.bf16.msra.mxu3 %v3853_v19  ;;  %v2748_v60 = vld [vmem:[%s5322_s0 + $0x88] sm:$0xf]  ;;  %v3715_v62 = vld [vmem:[%s5322_s0 + $0x8c] sm:$0xf]  ;;  %v3886_v6 = vld [vmem:[%s5321_s1 + $0x1e0] sm:$0xff] }
  0x16   :  { %1810 = vmatpush.bf16.msra.mxu0 %v3828_v20  ;;  %v3723_v61 = vld [vmem:[%s5322_s0 + $0xc4] sm:$0xf0]  ;;  %v2750_v63 = vld [vmem:[%s5322_s0 + $0xc8] sm:$0xf0]  ;;  %v3870_v7 = vld [vmem:[%s5321_s1 + $0x160] sm:$0xff] }
  0x17   :  { %1859 = vmatpush.bf16.msra.mxu1 %v3836_v21  ;;  %v2749_v2 = vor.u32 %v3723_v61, %v2748_v60  ;;  %v2753_v3 = vor.u32 %v3715_v62, %v2750_v63  ;;  %v2804_v8 = vld [vmem:[%s5322_s0 + $0x100] sm:$0xf]  ;;  %v3730_v10 = vld [vmem:[%s5322_s0 + $0x104] sm:$0xf]  ;;  %v2812_v12 = vld [vmem:[%s5322_s0 + $0x108] sm:$0xf] }
  0x18   :  { %1908 = vmatpush.bf16.msra.mxu2 %v3844_v22  ;;  %v3738_v9 = vld [vmem:[%s5322_s0 + $0x13c] sm:$0xf0]  ;;  %v2806_v11 = vld [vmem:[%s5322_s0 + $0x140] sm:$0xf0]  ;;  %v3739_v13 = vld [vmem:[%s5322_s0 + $0x144] sm:$0xf0] }
  0x19   :  { %1957 = vmatpush.bf16.msra.mxu3 %v3852_v23  ;;  %v3731_v14 = vld [vmem:[%s5322_s0 + $0x10c] sm:$0xf]  ;;  %v2805_v16 = vor.u32 %v3738_v9, %v2804_v8  ;;  %v2809_v17 = vor.u32 %v3730_v10, %v2806_v11  ;;  %v2813_v18 = vor.u32 %v3739_v13, %v2812_v12  ;;  %v3877_v20 = vld [vmem:[%s5321_s1 + $0x198] sm:$0xff]  ;;  %v3884_v38 = vld [vmem:[%s5321_s1 + $0x1d0] sm:$0xff] }
  0x1a   :  { %1811 = vmatpush.bf16.msra.mxu0 %v3827_v24  ;;  %v2814_v15 = vld [vmem:[%s5322_s0 + $0x148] sm:$0xf0]  ;;  %v3861_v21 = vld [vmem:[%s5321_s1 + $0x118] sm:$0xff]  ;;  %v2868_v24 = vld [vmem:[%s5322_s0 + $0x180] sm:$0xf] }
  0x1b   :  { %1860 = vmatpush.bf16.msra.mxu1 %v3835_v25  ;;  %v2817_v19 = vor.u32 %v3731_v14, %v2814_v15  ;;  %v3885_v22 = vld [vmem:[%s5321_s1 + $0x1d8] sm:$0xff]  ;;  %v3754_v25 = vld [vmem:[%s5322_s0 + $0x1bc] sm:$0xf0]  ;;  %v3868_v39 = vld [vmem:[%s5321_s1 + $0x150] sm:$0xff] }
  0x1c   :  { %1909 = vmatpush.bf16.msra.mxu2 %v3843_v26  ;;  %v3869_v23 = vld [vmem:[%s5321_s1 + $0x158] sm:$0xff]  ;;  %v3746_v26 = vld [vmem:[%s5322_s0 + $0x184] sm:$0xf]  ;;  %v2869_v32 = vor.u32 %v3754_v25, %v2868_v24  ;;  %v2996_v56 = vld [vmem:[%s5322_s0 + $0x280] sm:$0xf] }
  0x1d   :  { %1958 = vmatpush.bf16.msra.mxu3 %v3851_v27  ;;  %v2870_v27 = vld [vmem:[%s5322_s0 + $0x1c0] sm:$0xf0]  ;;  %v3786_v57 = vld [vmem:[%s5322_s0 + $0x2bc] sm:$0xf0]  ;;  %v3004_v60 = vld [vmem:[%s5322_s0 + $0x288] sm:$0xf] }
  0x1e   :  { %1812 = vmatpush.bf16.msra.mxu0 %v3826_v28  ;;  %v2876_v28 = vld [vmem:[%s5322_s0 + $0x188] sm:$0xf]  ;;  %v2873_v33 = vor.u32 %v3746_v26, %v2870_v27  ;;  %v3778_v58 = vld [vmem:[%s5322_s0 + $0x284] sm:$0xf]  ;;  %v3779_v62 = vld [vmem:[%s5322_s0 + $0x28c] sm:$0xf] }
  0x1f   :  { %1861 = vmatpush.bf16.msra.mxu1 %v3834_v29  ;;  %v3755_v29 = vld [vmem:[%s5322_s0 + $0x1c4] sm:$0xf0]  ;;  %v2998_v59 = vld [vmem:[%s5322_s0 + $0x2c0] sm:$0xf0]  ;;  %v3006_v63 = vld [vmem:[%s5322_s0 + $0x2c8] sm:$0xf0] }
  0x20   :  { %1910 = vmatpush.bf16.msra.mxu2 %v3842_v30  ;;  %v3747_v30 = vld [vmem:[%s5322_s0 + $0x18c] sm:$0xf]  ;;  %v2877_v34 = vor.u32 %v3755_v29, %v2876_v28  ;;  %v3787_v61 = vld [vmem:[%s5322_s0 + $0x2c4] sm:$0xf0]  ;;  %v3060_v8 = vld [vmem:[%s5322_s0 + $0x300] sm:$0xf] }
  0x21   :  { %1959 = vmatpush.bf16.msra.mxu3 %v3850_v31  ;;  %1813 = vmatmul.bf16.vlgmr.msra.gmra.mxu0 %v2677_v42  ;;  %v2878_v31 = vld [vmem:[%s5322_s0 + $0x1c8] sm:$0xf0]  ;;  %v3762_v42 = vld [vmem:[%s5322_s0 + $0x204] sm:$0xf]  ;;  %v3802_v9 = vld [vmem:[%s5322_s0 + $0x33c] sm:$0xf0] }
  0x22   :  { %2001 = vmatpush.bf16.msrb.mxu0 %v3865_v41  ;;  %1862 = vmatmul.bf16.vlgmr.msra.gmra.mxu1 %v2681_v43  ;;  %v2881_v35 = vor.u32 %v3747_v30, %v2878_v31  ;;  %v3770_v41 = vld [vmem:[%s5322_s0 + $0x23c] sm:$0xf0]  ;;  %v2934_v43 = vld [vmem:[%s5322_s0 + $0x240] sm:$0xf0]  ;;  %v3068_v12 = vld [vmem:[%s5322_s0 + $0x308] sm:$0xf] }
  0x23   :  { %1911 = vmatmul.bf16.vlgmr.msra.gmra.mxu2 %v2685_v44  ;;  %2050 = vmatpush.bf16.msrb.mxu1 %v3873_v47  ;;  %v2940_v44 = vld [vmem:[%s5322_s0 + $0x208] sm:$0xf]  ;;  %v2942_v47 = vld [vmem:[%s5322_s0 + $0x248] sm:$0xf0]  ;;  %v3794_v10 = vld [vmem:[%s5322_s0 + $0x304] sm:$0xf] }
  0x24   :  { %2099 = vmatpush.bf16.msrb.mxu2 %v3881_v40  ;;  %1960 = vmatmul.bf16.vlgmr.msra.gmra.mxu3 %v2689_v45  ;;  %v2932_v40 = vld [vmem:[%s5322_s0 + $0x200] sm:$0xf]  ;;  %v3771_v45 = vld [vmem:[%s5322_s0 + $0x244] sm:$0xf0]  ;;  %v3062_v11 = vld [vmem:[%s5322_s0 + $0x340] sm:$0xf0] }
  0x25   :  { %2148 = vmatpush.bf16.msrb.mxu3 %v3889_v46  ;;  %v3763_v46 = vld [vmem:[%s5322_s0 + $0x20c] sm:$0xf]  ;;  %v3803_v13 = vld [vmem:[%s5322_s0 + $0x344] sm:$0xf0]  ;;  %v3124_v24 = vld [vmem:[%s5322_s0 + $0x380] sm:$0xf] }
  0x26   :  { %2002 = vmatpush.bf16.msrb.mxu0 %v3864_v49  ;;  %v2937_v49 = vor.u32 %v3762_v42, %v2934_v43  ;;  %v3795_v14 = vld [vmem:[%s5322_s0 + $0x30c] sm:$0xf]  ;;  %v3818_v25 = vld [vmem:[%s5322_s0 + $0x3bc] sm:$0xf0]  ;;  %v3810_v26 = vld [vmem:[%s5322_s0 + $0x384] sm:$0xf] }
  0x27   :  { %2051 = vmatpush.bf16.msrb.mxu1 %v3872_v51  ;;  %v2945_v51 = vor.u32 %v3763_v46, %v2942_v47  ;;  %v3070_v15 = vld [vmem:[%s5322_s0 + $0x348] sm:$0xf0]  ;;  %v3126_v27 = vld [vmem:[%s5322_s0 + $0x3c0] sm:$0xf0]  ;;  %v3132_v28 = vld [vmem:[%s5322_s0 + $0x388] sm:$0xf] }
  0x28   :  { %2100 = vmatpush.bf16.msrb.mxu2 %v3880_v48  ;;  %v2933_v48 = vor.u32 %v3770_v41, %v2932_v40  ;;  %v3819_v29 = vld [vmem:[%s5322_s0 + $0x3c4] sm:$0xf0]  ;;  %v3811_v30 = vld [vmem:[%s5322_s0 + $0x38c] sm:$0xf]  ;;  %v2692_v40 = vld [vmem:[%s5322_s0 + $0x10] sm:$0xf] }
  0x29   :  { %2149 = vmatpush.bf16.msrb.mxu3 %v3888_v50  ;;  %v2941_v50 = vor.u32 %v3771_v45, %v2940_v44  ;;  %v3134_v31 = vld [vmem:[%s5322_s0 + $0x3c8] sm:$0xf0]  ;;  %v3708_v41 = vld [vmem:[%s5322_s0 + $0x4c] sm:$0xf0]  ;;  %v3700_v42 = vld [vmem:[%s5322_s0 + $0x14] sm:$0xf] }
  0x2a   :  { %2003 = vmatpush.bf16.msrb.mxu0 %v3863_v53  ;;  %v3859_v53 = vld [vmem:[%s5321_s1 + $0x108] sm:$0xff]  ;;  %v2694_v43 = vld [vmem:[%s5322_s0 + $0x50] sm:$0xf0]  ;;  %v2700_v44 = vld [vmem:[%s5322_s0 + $0x18] sm:$0xf] }
  0x2b   :  { %2052 = vmatpush.bf16.msrb.mxu1 %v3871_v55  ;;  %v3867_v55 = vld [vmem:[%s5321_s1 + $0x148] sm:$0xff]  ;;  %v3709_v45 = vld [vmem:[%s5322_s0 + $0x54] sm:$0xf0]  ;;  %v3701_v46 = vld [vmem:[%s5322_s0 + $0x1c] sm:$0xf] }
  0x2c   :  { %2101 = vmatpush.bf16.msrb.mxu2 %v3879_v52  ;;  %v3875_v52 = vld [vmem:[%s5321_s1 + $0x188] sm:$0xff]  ;;  %v2702_v47 = vld [vmem:[%s5322_s0 + $0x58] sm:$0xf0] }
  0x2d   :  { %2150 = vmatpush.bf16.msrb.mxu3 %v3887_v54  ;;  %v3883_v54 = vld [vmem:[%s5321_s1 + $0x1c8] sm:$0xff] }
  0x2e   :  { %2004 = vmatpush.bf16.msrb.mxu0 %v3862_v5  ;;  %v3858_v5 = vld [vmem:[%s5321_s1 + $0x100] sm:$0xff] }
  0x2f   :  { %2053 = vmatpush.bf16.msrb.mxu1 %v3870_v7  ;;  %v3866_v7 = vld [vmem:[%s5321_s1 + $0x140] sm:$0xff] }
  0x30   :  { %2102 = vmatpush.bf16.msrb.mxu2 %v3878_v4  ;;  %v3874_v4 = vld [vmem:[%s5321_s1 + $0x180] sm:$0xff] }
  0x31   :  { %1818 = vmatmul.bf16.gmra.mxu0 %v2741_v0  ;;  %2151 = vmatpush.bf16.msrb.mxu3 %v3886_v6  ;;  %v2997_v0 = vor.u32 %v3786_v57, %v2996_v56  ;;  %v3882_v6 = vld [vmem:[%s5321_s1 + $0x1c0] sm:$0xff]  ;;  %v3895_v56 = vld [vmem:[%s5321_s1 + $0x228] sm:$0xff] }
  0x32   :  { %1867 = vmatmul.bf16.gmra.mxu1 %v2745_v1  ;;  %2005 = vmatpush.bf16.msrb.mxu0 %v3861_v21  ;;  %v3001_v1 = vor.u32 %v3778_v58, %v2998_v59  ;;  %v3897_v21 = vld [vmem:[%s5321_s1 + $0x238] sm:$0xff]  ;;  %v3919_v57 = vld [vmem:[%s5321_s1 + $0x2e8] sm:$0xff] }
  0x33   :  { %1916 = vmatmul.bf16.gmra.mxu2 %v2749_v2  ;;  %2054 = vmatpush.bf16.msrb.mxu1 %v3869_v23  ;;  %v3005_v2 = vor.u32 %v3787_v61, %v3004_v60  ;;  %v3905_v23 = vld [vmem:[%s5321_s1 + $0x278] sm:$0xff] }
  0x34   :  { %1965 = vmatmul.bf16.gmra.mxu3 %v2753_v3  ;;  %2103 = vmatpush.bf16.msrb.mxu2 %v3877_v20  ;;  %v3009_v3 = vor.u32 %v3779_v62, %v3006_v63  ;;  %v3913_v20 = vld [vmem:[%s5321_s1 + $0x2b8] sm:$0xff] }
  0x35   :  { %2152 = vmatpush.bf16.msrb.mxu3 %v3885_v22  ;;  %v3921_v22 = vld [vmem:[%s5321_s1 + $0x2f8] sm:$0xff] }
  0x36   :  { %2006 = vmatpush.bf16.msrb.mxu0 %v3860_v37  ;;  %v3896_v37 = vld [vmem:[%s5321_s1 + $0x230] sm:$0xff] }
  0x37   :  { %2055 = vmatpush.bf16.msrb.mxu1 %v3868_v39  ;;  %v3904_v39 = vld [vmem:[%s5321_s1 + $0x270] sm:$0xff] }
  0x38   :  { %2104 = vmatpush.bf16.msrb.mxu2 %v3876_v36  ;;  %v3912_v36 = vld [vmem:[%s5321_s1 + $0x2b0] sm:$0xff] }
  0x39   :  { %2153 = vmatpush.bf16.msrb.mxu3 %v3884_v38  ;;  %v3920_v38 = vld [vmem:[%s5321_s1 + $0x2f0] sm:$0xff] }
  0x3a   :  { %2007 = vmatpush.bf16.msrb.mxu0 %v3859_v53  ;;  %v2705_v53 = vor.u32 %v3701_v46, %v2702_v47 }
  0x3b   :  { %2056 = vmatpush.bf16.msrb.mxu1 %v3867_v55  ;;  %v3911_v55 = vld [vmem:[%s5321_s1 + $0x2a8] sm:$0xff] }
  0x3c   :  { %2105 = vmatpush.bf16.msrb.mxu2 %v3875_v52  ;;  %v2701_v52 = vor.u32 %v3709_v45, %v2700_v44 }
  0x3d   :  { %2154 = vmatpush.bf16.msrb.mxu3 %v3883_v54 }
  0x3e   :  { %2008 = vmatpush.bf16.msrb.mxu0 %v3858_v5  ;;  %v2758_v5 = vld [vmem:[%s5322_s0 + $0xd0] sm:$0xf0] }
  0x3f   :  { %2057 = vmatpush.bf16.msrb.mxu1 %v3866_v7  ;;  %v3725_v7 = vld [vmem:[%s5322_s0 + $0xd4] sm:$0xf0] }
  0x40   :  { %2106 = vmatpush.bf16.msrb.mxu2 %v3874_v4  ;;  %v3716_v4 = vld [vmem:[%s5322_s0 + $0x94] sm:$0xf] }
  0x41   :  { %1823 = vmatmul.bf16.gmra.mxu0 %v2805_v16  ;;  %2155 = vmatpush.bf16.msrb.mxu3 %v3882_v6  ;;  %v3061_v16 = vor.u32 %v3802_v9, %v3060_v8  ;;  %v2764_v6 = vld [vmem:[%s5322_s0 + $0x98] sm:$0xf]  ;;  %v3717_v8 = vld [vmem:[%s5322_s0 + $0x9c] sm:$0xf] }
  0x42   :  { %1872 = vmatmul.bf16.gmra.mxu1 %v2809_v17  ;;  %v3065_v17 = vor.u32 %v3794_v10, %v3062_v11  ;;  %2197 = vmatpush.bf16.msra.mxu0 %v3897_v21  ;;  %v2766_v9 = vld [vmem:[%s5322_s0 + $0xd8] sm:$0xf0]  ;;  %v3910_v21 = vld [vmem:[%s5321_s1 + $0x2a0] sm:$0xff] }
  0x43   :  { %1921 = vmatmul.bf16.gmra.mxu2 %v2813_v18  ;;  %v3069_v18 = vor.u32 %v3803_v13, %v3068_v12  ;;  %2246 = vmatpush.bf16.msra.mxu1 %v3905_v23  ;;  %v2761_v13 = vor.u32 %v3716_v4, %v2758_v5  ;;  %v3918_v23 = vld [vmem:[%s5321_s1 + $0x2e0] sm:$0xff]  ;;  %v3757_v4 = vld [vmem:[%s5322_s0 + $0x1d4] sm:$0xf0]  ;;  %v3749_v5 = vld [vmem:[%s5322_s0 + $0x19c] sm:$0xf] }
  0x44   :  { %1970 = vmatmul.bf16.gmra.mxu3 %v2817_v19  ;;  %v3073_v19 = vor.u32 %v3795_v14, %v3070_v15  ;;  %2295 = vmatpush.bf16.msra.mxu2 %v3913_v20 }
  0x45   :  { %2344 = vmatpush.bf16.msra.mxu3 %v3921_v22  ;;  %v3894_v22 = vld [vmem:[%s5321_s1 + $0x220] sm:$0xff] }
  0x46   :  { %2198 = vmatpush.bf16.msra.mxu0 %v3896_v37  ;;  %v3741_v37 = vld [vmem:[%s5322_s0 + $0x154] sm:$0xf0] }
  0x47   :  { %2247 = vmatpush.bf16.msra.mxu1 %v3904_v39  ;;  %v2830_v39 = vld [vmem:[%s5322_s0 + $0x158] sm:$0xf0] }
  0x48   :  { %2296 = vmatpush.bf16.msra.mxu2 %v3912_v36  ;;  %v2828_v36 = vld [vmem:[%s5322_s0 + $0x118] sm:$0xf] }
  0x49   :  { %2345 = vmatpush.bf16.msra.mxu3 %v3920_v38  ;;  %v3733_v38 = vld [vmem:[%s5322_s0 + $0x11c] sm:$0xf]  ;;  %v2829_v47 = vor.u32 %v3741_v37, %v2828_v36  ;;  %v3773_v36 = vld [vmem:[%s5322_s0 + $0x254] sm:$0xf0] }
  0x4a   :  { %2199 = vmatpush.bf16.msra.mxu0 %v3895_v56  ;;  %v3765_v37 = vld [vmem:[%s5322_s0 + $0x21c] sm:$0xf] }
  0x4c   :  { %2297 = vmatpush.bf16.msra.mxu2 %v3911_v55 }
  0x4d   :  { %2346 = vmatpush.bf16.msra.mxu3 %v3919_v57 }
  0x4e   :  { %2200 = vmatpush.bf16.msra.mxu0 %v3894_v22 }
  0x50   :  { %2298 = vmatpush.bf16.msra.mxu2 %v3910_v21  ;;  %v3916_v21 = vld [vmem:[%s5321_s1 + $0x2d0] sm:$0xff] }
  0x51   :  { %1828 = vmatmul.bf16.gmra.mxu0 %v2869_v32  ;;  %v3125_v32 = vor.u32 %v3818_v25, %v3124_v24  ;;  %2347 = vmatpush.bf16.msra.mxu3 %v3918_v23 }
  0x52   :  { %1877 = vmatmul.bf16.gmra.mxu1 %v2873_v33  ;;  %v3129_v33 = vor.u32 %v3810_v26, %v3126_v27 }
  0x53   :  { %1926 = vmatmul.bf16.gmra.mxu2 %v2877_v34  ;;  %v3133_v34 = vor.u32 %v3819_v29, %v3132_v28 }
  0x54   :  { %1975 = vmatmul.bf16.gmra.mxu3 %v2881_v35  ;;  %v3137_v35 = vor.u32 %v3811_v30, %v3134_v31  ;;  %v3902_v31 = vld [vmem:[%s5321_s1 + $0x260] sm:$0xff] }
  0x61   :  { %1833 = vmatmul.bf16.gmra.mxu0 %v2933_v48  ;;  %v2693_v48 = vor.u32 %v3708_v41, %v2692_v40 }
  0x62   :  { %1882 = vmatmul.bf16.gmra.mxu1 %v2937_v49  ;;  %v2697_v49 = vor.u32 %v3700_v42, %v2694_v43 }
  0x63   :  { %1931 = vmatmul.bf16.gmra.mxu2 %v2941_v50 }
  0x64   :  { %1980 = vmatmul.bf16.gmra.mxu3 %v2945_v51 }
  0x71   :  { %1838 = vmatmul.bf16.gmra.mxu0 %v2997_v0 }
  0x72   :  { %1887 = vmatmul.bf16.gmra.mxu1 %v3001_v1  ;;  %v3903_v1 = vld [vmem:[%s5321_s1 + $0x268] sm:$0xff] }
  0x73   :  { %1936 = vmatmul.bf16.gmra.mxu2 %v3005_v2  ;;  %v2756_v2 = vld [vmem:[%s5322_s0 + $0x90] sm:$0xf]  ;;  %2248 = vmatpush.bf16.msra.mxu1 %v3903_v1  ;;  %v3748_v1 = vld [vmem:[%s5322_s0 + $0x194] sm:$0xf] }
  0x74   :  { %1985 = vmatmul.bf16.gmra.mxu3 %v3009_v3  ;;  %v3724_v3 = vld [vmem:[%s5322_s0 + $0xcc] sm:$0xf0] }
  0x75   :  { %v2757_v12 = vor.u32 %v3724_v3, %v2756_v2  ;;  %v2886_v2 = vld [vmem:[%s5322_s0 + $0x1d0] sm:$0xf0]  ;;  %v2892_v3 = vld [vmem:[%s5322_s0 + $0x198] sm:$0xf] }
  0x77   :  { %2249 = vmatpush.bf16.msra.mxu1 %v3902_v31  ;;  %v2948_v31 = vld [vmem:[%s5322_s0 + $0x210] sm:$0xf] }
  0x81   :  { %1843 = vmatmul.bf16.gmra.mxu0 %v3061_v16 }
  0x82   :  { %1892 = vmatmul.bf16.gmra.mxu1 %v3065_v17  ;;  %v2765_v17 = vor.u32 %v3725_v7, %v2764_v6  ;;  %v2894_v6 = vld [vmem:[%s5322_s0 + $0x1d8] sm:$0xf0] }
  0x83   :  { %1941 = vmatmul.bf16.gmra.mxu2 %v3069_v18  ;;  %v2769_v18 = vor.u32 %v3717_v8, %v2766_v9 }
  0x84   :  { %1990 = vmatmul.bf16.gmra.mxu3 %v3073_v19 }
  0x91   :  { %1848 = vmatmul.bf16.gmra.mxu0 %v3125_v32  ;;  %v2820_v32 = vld [vmem:[%s5322_s0 + $0x110] sm:$0xf] }
  0x92   :  { %1897 = vmatmul.bf16.gmra.mxu1 %v3129_v33  ;;  %v3740_v33 = vld [vmem:[%s5322_s0 + $0x14c] sm:$0xf0] }
  0x93   :  { %1946 = vmatmul.bf16.gmra.mxu2 %v3133_v34  ;;  %v3732_v34 = vld [vmem:[%s5322_s0 + $0x114] sm:$0xf]  ;;  %v2821_v42 = vor.u32 %v3740_v33, %v2820_v32  ;;  %v3772_v32 = vld [vmem:[%s5322_s0 + $0x24c] sm:$0xf0] }
  0x94   :  { %1995 = vmatmul.bf16.gmra.mxu3 %v3137_v35  ;;  %v2822_v35 = vld [vmem:[%s5322_s0 + $0x150] sm:$0xf0] }
  0x95   :  { %v2825_v43 = vor.u32 %v3732_v34, %v2822_v35  ;;  %v3764_v33 = vld [vmem:[%s5322_s0 + $0x214] sm:$0xf]  ;;  %v2956_v35 = vld [vmem:[%s5322_s0 + $0x218] sm:$0xf] }
  0x96   :  { %v2950_v34 = vld [vmem:[%s5322_s0 + $0x250] sm:$0xf0] }
  0x9e   :  { %v1814_v50 = vpop.f32.mrf.mxu0 }
  0x9f   :  { %v1863_v51 = vpop.f32.mrf.mxu1 }
  0xa0   :  { %v1864_v54 = vadd.f32 %v1863_v51, %v1814_v50  ;;  %v3909_v51 = vld [vmem:[%s5321_s1 + $0x298] sm:$0xff] }
  0xa1   :  { %2009 = vmatmul.bf16.vlgmr.msrb.gmra.mxu0 %v2693_v48  ;;  %v2833_v48 = vor.u32 %v3733_v38, %v2830_v39  ;;  %2299 = vmatpush.bf16.msra.mxu2 %v3909_v51  ;;  %v2958_v38 = vld [vmem:[%s5322_s0 + $0x258] sm:$0xf0]  ;;  %v3907_v51 = vld [vmem:[%s5321_s1 + $0x288] sm:$0xff] }
  0xa2   :  { %2058 = vmatmul.bf16.vlgmr.msrb.gmra.mxu1 %v2697_v49 }
  0xa3   :  { %2107 = vmatmul.bf16.vlgmr.msrb.gmra.mxu2 %v2701_v52  ;;  %v3893_v52 = vld [vmem:[%s5321_s1 + $0x218] sm:$0xff] }
  0xa4   :  { %2156 = vmatmul.bf16.vlgmr.msrb.gmra.mxu3 %v2705_v53  ;;  %v3917_v53 = vld [vmem:[%s5321_s1 + $0x2d8] sm:$0xff]  ;;  %2201 = vmatpush.bf16.msra.mxu0 %v3893_v52  ;;  %v3891_v52 = vld [vmem:[%s5321_s1 + $0x208] sm:$0xff] }
  0xa5   :  { %2348 = vmatpush.bf16.msra.mxu3 %v3917_v53  ;;  %v3915_v53 = vld [vmem:[%s5321_s1 + $0x2c8] sm:$0xff] }
  0xa6   :  { %v1912_v58 = vpop.f32.mrf.mxu2  ;;  %v1816_v61 = vpop.f32.mrf.mxu0 }
  0xa7   :  { %v1961_v59 = vpop.f32.mrf.mxu3  ;;  %v1913_v60 = vadd.f32 %v1912_v58, %v1864_v54  ;;  %v1865_v62 = vpop.f32.mrf.mxu1 }
  0xa8   :  { %v1866_v63 = vadd.f32 %v1865_v62, %v1816_v61  ;;  %v3901_v61 = vld [vmem:[%s5321_s1 + $0x258] sm:$0xff]  ;;  %v2884_v62 = vld [vmem:[%s5322_s0 + $0x190] sm:$0xf] }
  0xa9   :  { %v4415_v0 = vadd.f32 %v1961_v59, %v1913_v60  ;;  %2250 = vmatpush.bf16.msra.mxu1 %v3901_v61  ;;  %2349 = vmatpush.bf16.msra.mxu3 %v3916_v21  ;;  %v3906_v21 = vld [vmem:[%s5321_s1 + $0x280] sm:$0xff] }
  0xad   :  { %2350 = vmatpush.bf16.msra.mxu3 %v3915_v53 }
  0xae   :  { %v1914_v10 = vpop.f32.mrf.mxu2  ;;  %v1819_v15 = vpop.f32.mrf.mxu0 }
  0xaf   :  { %v1963_v11 = vpop.f32.mrf.mxu3  ;;  %v1915_v14 = vadd.f32 %v1914_v10, %v1866_v63  ;;  %v1868_v16 = vpop.f32.mrf.mxu1  ;;  %v3756_v63 = vld [vmem:[%s5322_s0 + $0x1cc] sm:$0xf0]  ;;  %v2889_v10 = vor.u32 %v3748_v1, %v2886_v2  ;;  %v3780_v2 = vld [vmem:[%s5322_s0 + $0x294] sm:$0xf] }
  0xb0   :  { %v1869_v19 = vadd.f32 %v1868_v16, %v1819_v15  ;;  %v2885_v9 = vor.u32 %v3756_v63, %v2884_v62  ;;  %v2897_v15 = vor.u32 %v3749_v5, %v2894_v6  ;;  %v3899_v62 = vld [vmem:[%s5321_s1 + $0x248] sm:$0xff]  ;;  %v3012_v63 = vld [vmem:[%s5322_s0 + $0x290] sm:$0xf]  ;;  %v3789_v5 = vld [vmem:[%s5322_s0 + $0x2d4] sm:$0xf0] }
  0xb1   :  { %v4444_v20 = vadd.f32 %v1963_v11, %v1915_v14  ;;  %2014 = vmatmul.bf16.gmra.mxu0 %v2757_v12  ;;  %v2893_v14 = vor.u32 %v3757_v4, %v2892_v3  ;;  %v3788_v1 = vld [vmem:[%s5322_s0 + $0x2cc] sm:$0xf0]  ;;  %v3014_v3 = vld [vmem:[%s5322_s0 + $0x2d0] sm:$0xf0]  ;;  %v3020_v4 = vld [vmem:[%s5322_s0 + $0x298] sm:$0xf] }
  0xb2   :  { %2063 = vmatmul.bf16.gmra.mxu1 %v2761_v13  ;;  %v3781_v6 = vld [vmem:[%s5322_s0 + $0x29c] sm:$0xf] }
  0xb3   :  { %2112 = vmatmul.bf16.gmra.mxu2 %v2765_v17 }
  0xb4   :  { %2161 = vmatmul.bf16.gmra.mxu3 %v2769_v18  ;;  %v3908_v18 = vld [vmem:[%s5321_s1 + $0x290] sm:$0xff] }
  0xb5   :  { %2300 = vmatpush.bf16.msra.mxu2 %v3908_v18 }
  0xb6   :  { %v1917_v24 = vpop.f32.mrf.mxu2  ;;  %v1821_v27 = vpop.f32.mrf.mxu0 }
  0xb7   :  { %v1966_v25 = vpop.f32.mrf.mxu3  ;;  %v1918_v26 = vadd.f32 %v1917_v24, %v1869_v19  ;;  %v1870_v28 = vpop.f32.mrf.mxu1  ;;  %v3892_v19 = vld [vmem:[%s5321_s1 + $0x210] sm:$0xff] }
  0xb8   :  { %v1871_v29 = vadd.f32 %v1870_v28, %v1821_v27  ;;  %2202 = vmatpush.bf16.msra.mxu0 %v3892_v19 }
  0xb9   :  { %v4455_v30 = vadd.f32 %v1966_v25, %v1918_v26  ;;  %2301 = vmatpush.bf16.msra.mxu2 %v3907_v51 }
  0xbc   :  { %2203 = vmatpush.bf16.msra.mxu0 %v3891_v52 }
  0xbd   :  { %2302 = vmatpush.bf16.msra.mxu2 %v3906_v21 }
  0xbe   :  { %v1919_v40 = vpop.f32.mrf.mxu2  ;;  %v1824_v45 = vpop.f32.mrf.mxu0 }
  0xbf   :  { %v1968_v41 = vpop.f32.mrf.mxu3  ;;  %v1920_v44 = vadd.f32 %v1919_v40, %v1871_v29  ;;  %v1873_v46 = vpop.f32.mrf.mxu1  ;;  %v3900_v29 = vld [vmem:[%s5321_s1 + $0x250] sm:$0xff] }
  0xc0   :  { %v1874_v49 = vadd.f32 %v1873_v46, %v1824_v45  ;;  %2251 = vmatpush.bf16.msra.mxu1 %v3900_v29  ;;  %v2957_v46 = vor.u32 %v3773_v36, %v2956_v35  ;;  %v3804_v35 = vld [vmem:[%s5322_s0 + $0x34c] sm:$0xf0]  ;;  %v3796_v36 = vld [vmem:[%s5322_s0 + $0x314] sm:$0xf] }
  0xc1   :  { %v4484_v50 = vadd.f32 %v1968_v41, %v1920_v44  ;;  %2019 = vmatmul.bf16.gmra.mxu0 %v2821_v42  ;;  %v2949_v41 = vor.u32 %v3772_v32, %v2948_v31  ;;  %v2953_v42 = vor.u32 %v3764_v33, %v2950_v34  ;;  %v3898_v33 = vld [vmem:[%s5321_s1 + $0x240] sm:$0xff]  ;;  %v3076_v34 = vld [vmem:[%s5322_s0 + $0x310] sm:$0xf] }
  0xc2   :  { %2068 = vmatmul.bf16.gmra.mxu1 %v2825_v43 }
  0xc3   :  { %2117 = vmatmul.bf16.gmra.mxu2 %v2829_v47  ;;  %v2961_v47 = vor.u32 %v3765_v37, %v2958_v38  ;;  %v3078_v37 = vld [vmem:[%s5322_s0 + $0x350] sm:$0xf0]  ;;  %v3084_v38 = vld [vmem:[%s5322_s0 + $0x318] sm:$0xf] }
  0xc4   :  { %2166 = vmatmul.bf16.gmra.mxu3 %v2833_v48  ;;  %2252 = vmatpush.bf16.msra.mxu1 %v3899_v62 }
  0xc6   :  { %v1922_v54 = vpop.f32.mrf.mxu2  ;;  %v1826_v57 = vpop.f32.mrf.mxu0 }
  0xc7   :  { %v1971_v55 = vpop.f32.mrf.mxu3  ;;  %v1923_v56 = vadd.f32 %v1922_v54, %v1874_v49  ;;  %v1875_v58 = vpop.f32.mrf.mxu1 }
  0xc8   :  { %v1876_v59 = vadd.f32 %v1875_v58, %v1826_v57  ;;  %2253 = vmatpush.bf16.msra.mxu1 %v3898_v33 }
  0xc9   :  { %v4495_v60 = vadd.f32 %v1971_v55, %v1923_v56 }
  0xce   :  { %v1924_v7 = vpop.f32.mrf.mxu2  ;;  %v1829_v12 = vpop.f32.mrf.mxu0 }
  0xcf   :  { %v1973_v8 = vpop.f32.mrf.mxu3  ;;  %v1925_v11 = vadd.f32 %v1924_v7, %v1876_v59  ;;  %v1878_v13 = vpop.f32.mrf.mxu1  ;;  %v3022_v7 = vld [vmem:[%s5322_s0 + $0x2d8] sm:$0xf0] }
  0xd0   :  { %v1879_v16 = vadd.f32 %v1878_v13, %v1829_v12 }
  0xd1   :  { %v4524_v17 = vadd.f32 %v1973_v8, %v1925_v11  ;;  %2024 = vmatmul.bf16.gmra.mxu0 %v2885_v9  ;;  %v3017_v11 = vor.u32 %v3780_v2, %v3014_v3 }
  0xd2   :  { %2073 = vmatmul.bf16.gmra.mxu1 %v2889_v10  ;;  %v3013_v10 = vor.u32 %v3788_v1, %v3012_v63 }
  0xd3   :  { %2122 = vmatmul.bf16.gmra.mxu2 %v2893_v14 }
  0xd4   :  { %2171 = vmatmul.bf16.gmra.mxu3 %v2897_v15  ;;  %v3021_v15 = vor.u32 %v3789_v5, %v3020_v4  ;;  %v3937_v4 = vld [vmem:[%s5321_s1 + $0x378] sm:$0xff]  ;;  %v3140_v5 = vld [vmem:[%s5322_s0 + $0x390] sm:$0xf] }
  0xd5   :  { %2442 = vmatpush.bf16.msrb.mxu1 %v3937_v4  ;;  %v3943_v4 = vld [vmem:[%s5321_s1 + $0x3a8] sm:$0xff] }
  0xd6   :  { %v1927_v22 = vpop.f32.mrf.mxu2  ;;  %v1831_v25 = vpop.f32.mrf.mxu0 }
  0xd7   :  { %v1976_v23 = vpop.f32.mrf.mxu3  ;;  %v1928_v24 = vadd.f32 %v1927_v22, %v1879_v16  ;;  %v1880_v26 = vpop.f32.mrf.mxu1  ;;  %v3025_v16 = vor.u32 %v3781_v6, %v3022_v7  ;;  %v3890_v22 = vld [vmem:[%s5321_s1 + $0x200] sm:$0xff]  ;;  %v3820_v6 = vld [vmem:[%s5322_s0 + $0x3cc] sm:$0xf0]  ;;  %v3812_v7 = vld [vmem:[%s5322_s0 + $0x394] sm:$0xf] }
  0xd8   :  { %v1881_v27 = vadd.f32 %v1880_v26, %v1831_v25  ;;  %2204 = vmatpush.bf16.msra.mxu0 %v3890_v22 }
  0xd9   :  { %v4535_v28 = vadd.f32 %v1976_v23, %v1928_v24  ;;  %v3914_v23 = vld [vmem:[%s5321_s1 + $0x2c0] sm:$0xff] }
  0xda   :  { %2351 = vmatpush.bf16.msra.mxu3 %v3914_v23 }
  0xde   :  { %v1929_v39 = vpop.f32.mrf.mxu2  ;;  %v1834_v44 = vpop.f32.mrf.mxu0 }
  0xdf   :  { %v1978_v40 = vpop.f32.mrf.mxu3  ;;  %v1930_v43 = vadd.f32 %v1929_v39, %v1881_v27  ;;  %v1883_v45 = vpop.f32.mrf.mxu1  ;;  %v3805_v39 = vld [vmem:[%s5322_s0 + $0x354] sm:$0xf0] }
  0xe0   :  { %v1884_v48 = vadd.f32 %v1883_v45, %v1834_v44  ;;  %v3077_v44 = vor.u32 %v3804_v35, %v3076_v34  ;;  %v3081_v45 = vor.u32 %v3796_v36, %v3078_v37  ;;  %v3085_v51 = vor.u32 %v3805_v39, %v3084_v38 }
  0xe1   :  { %v4564_v49 = vadd.f32 %v1978_v40, %v1930_v43  ;;  %2029 = vmatmul.bf16.gmra.mxu0 %v2949_v41  ;;  %v3797_v40 = vld [vmem:[%s5322_s0 + $0x31c] sm:$0xf] }
  0xe2   :  { %2078 = vmatmul.bf16.gmra.mxu1 %v2953_v42  ;;  %v3086_v41 = vld [vmem:[%s5322_s0 + $0x358] sm:$0xf0] }
  0xe3   :  { %2127 = vmatmul.bf16.gmra.mxu2 %v2957_v46  ;;  %v3089_v52 = vor.u32 %v3797_v40, %v3086_v41  ;;  %v3936_v40 = vld [vmem:[%s5321_s1 + $0x370] sm:$0xff]  ;;  %v2708_v41 = vld [vmem:[%s5322_s0 + $0x20] sm:$0xf] }
  0xe4   :  { %2176 = vmatmul.bf16.gmra.mxu3 %v2961_v47  ;;  %2443 = vmatpush.bf16.msrb.mxu1 %v3936_v40 }
  0xe6   :  { %v1932_v54 = vpop.f32.mrf.mxu2  ;;  %v1836_v57 = vpop.f32.mrf.mxu0 }
  0xe7   :  { %v1981_v55 = vpop.f32.mrf.mxu3  ;;  %v1933_v56 = vadd.f32 %v1932_v54, %v1884_v48  ;;  %v1885_v58 = vpop.f32.mrf.mxu1 }
  0xe8   :  { %v1886_v59 = vadd.f32 %v1885_v58, %v1836_v57  ;;  %v3953_v57 = vld [vmem:[%s5321_s1 + $0x3f8] sm:$0xff] }
  0xe9   :  { %v4575_v61 = vadd.f32 %v1981_v55, %v1933_v56  ;;  %v3945_v55 = vld [vmem:[%s5321_s1 + $0x3b8] sm:$0xff]  ;;  %2540 = vmatpush.bf16.msrb.mxu3 %v3953_v57 }
  0xea   :  { %v3929_v56 = vld [vmem:[%s5321_s1 + $0x338] sm:$0xff]  ;;  %2491 = vmatpush.bf16.msrb.mxu2 %v3945_v55 }
  0xeb   :  { %2393 = vmatpush.bf16.msrb.mxu0 %v3929_v56 }
  0xee   :  { %v1934_v8 = vpop.f32.mrf.mxu2  ;;  %v1839_v13 = vpop.f32.mrf.mxu0 }
  0xef   :  { %v1983_v9 = vpop.f32.mrf.mxu3  ;;  %v1935_v12 = vadd.f32 %v1934_v8, %v1886_v59  ;;  %v1888_v14 = vpop.f32.mrf.mxu1  ;;  %v3142_v8 = vld [vmem:[%s5322_s0 + $0x3d0] sm:$0xf0] }
  0xf0   :  { %v1889_v18 = vadd.f32 %v1888_v14, %v1839_v13 }
  0xf1   :  { %v4604_v19 = vadd.f32 %v1983_v9, %v1935_v12  ;;  %2034 = vmatmul.bf16.gmra.mxu0 %v3013_v10  ;;  %v3148_v9 = vld [vmem:[%s5322_s0 + $0x398] sm:$0xf]  ;;  %v3150_v12 = vld [vmem:[%s5322_s0 + $0x3d8] sm:$0xf0] }
  0xf2   :  { %2083 = vmatmul.bf16.gmra.mxu1 %v3017_v11  ;;  %v3821_v10 = vld [vmem:[%s5322_s0 + $0x3d4] sm:$0xf0]  ;;  %v3813_v11 = vld [vmem:[%s5322_s0 + $0x39c] sm:$0xf] }
  0xf3   :  { %2132 = vmatmul.bf16.gmra.mxu2 %v3021_v15  ;;  %v3141_v15 = vor.u32 %v3820_v6, %v3140_v5  ;;  %v3149_v23 = vor.u32 %v3821_v10, %v3148_v9  ;;  %v3927_v5 = vld [vmem:[%s5321_s1 + $0x328] sm:$0xff] }
  0xf4   :  { %2181 = vmatmul.bf16.gmra.mxu3 %v3025_v16  ;;  %v3145_v16 = vor.u32 %v3812_v7, %v3142_v8  ;;  %v3951_v6 = vld [vmem:[%s5321_s1 + $0x3e8] sm:$0xff] }
  0xf6   :  { %v1937_v24 = vpop.f32.mrf.mxu2  ;;  %v1841_v27 = vpop.f32.mrf.mxu0 }
  0xf7   :  { %v1986_v25 = vpop.f32.mrf.mxu3  ;;  %v1938_v26 = vadd.f32 %v1937_v24, %v1889_v18  ;;  %v1890_v29 = vpop.f32.mrf.mxu1  ;;  %v3153_v24 = vor.u32 %v3813_v11, %v3150_v12 }
  0xf8   :  { %v1891_v31 = vadd.f32 %v1890_v29, %v1841_v27  ;;  %v3944_v27 = vld [vmem:[%s5321_s1 + $0x3b0] sm:$0xff] }
  0xf9   :  { %v4615_v32 = vadd.f32 %v1986_v25, %v1938_v26  ;;  %v3928_v29 = vld [vmem:[%s5321_s1 + $0x330] sm:$0xff]  ;;  %2492 = vmatpush.bf16.msrb.mxu2 %v3944_v27 }
  0xfa   :  { %2394 = vmatpush.bf16.msrb.mxu0 %v3928_v29 }
  0xfd   :  { %2493 = vmatpush.bf16.msrb.mxu2 %v3943_v4 }
  0xfe   :  { %v1939_v42 = vpop.f32.mrf.mxu2  ;;  %v1844_v47 = vpop.f32.mrf.mxu0  ;;  %2395 = vmatpush.bf16.msrb.mxu0 %v3927_v5 }
  0xff   :  { %v1988_v43 = vpop.f32.mrf.mxu3  ;;  %v1940_v46 = vadd.f32 %v1939_v42, %v1891_v31  ;;  %v1893_v48 = vpop.f32.mrf.mxu1  ;;  %v3952_v31 = vld [vmem:[%s5321_s1 + $0x3f0] sm:$0xff]  ;;  %v3710_v42 = vld [vmem:[%s5322_s0 + $0x5c] sm:$0xf0] }
 0x100   :  { %v1894_v53 = vadd.f32 %v1893_v48, %v1844_v47  ;;  %2541 = vmatpush.bf16.msrb.mxu3 %v3952_v31  ;;  %v3703_v47 = vld [vmem:[%s5322_s0 + $0x2c] sm:$0xf] }
 0x101   :  { %v4644_v54 = vadd.f32 %v1988_v43, %v1940_v46  ;;  %2039 = vmatmul.bf16.gmra.mxu0 %v3077_v44  ;;  %v3702_v43 = vld [vmem:[%s5322_s0 + $0x24] sm:$0xf]  ;;  %v3711_v46 = vld [vmem:[%s5322_s0 + $0x64] sm:$0xf0]  ;;  %v2718_v48 = vld [vmem:[%s5322_s0 + $0x68] sm:$0xf0] }
 0x102   :  { %2088 = vmatmul.bf16.gmra.mxu1 %v3081_v45  ;;  %v2710_v44 = vld [vmem:[%s5322_s0 + $0x60] sm:$0xf0]  ;;  %v2716_v45 = vld [vmem:[%s5322_s0 + $0x28] sm:$0xf] }
 0x103   :  { %2137 = vmatmul.bf16.gmra.mxu2 %v3085_v51  ;;  %v2713_v55 = vor.u32 %v3702_v43, %v2710_v44  ;;  %v3926_v43 = vld [vmem:[%s5321_s1 + $0x320] sm:$0xff] }
 0x104   :  { %2186 = vmatmul.bf16.gmra.mxu3 %v3089_v52  ;;  %v3950_v44 = vld [vmem:[%s5321_s1 + $0x3e0] sm:$0xff]  ;;  %2396 = vmatpush.bf16.msrb.mxu0 %v3926_v43 }
 0x105   :  { %2542 = vmatpush.bf16.msrb.mxu3 %v3951_v6 }
 0x106   :  { %v1942_v58 = vpop.f32.mrf.mxu2  ;;  %v1846_v63 = vpop.f32.mrf.mxu0 }
 0x107   :  { %v1991_v59 = vpop.f32.mrf.mxu3  ;;  %v1943_v62 = vadd.f32 %v1942_v58, %v1894_v53  ;;  %v1895_v1 = vpop.f32.mrf.mxu1  ;;  %v2709_v53 = vor.u32 %v3710_v42, %v2708_v41  ;;  %v3942_v42 = vld [vmem:[%s5321_s1 + $0x3a0] sm:$0xff] }
 0x108   :  { %v1896_v2 = vadd.f32 %v1895_v1, %v1846_v63  ;;  %2494 = vmatpush.bf16.msrb.mxu2 %v3942_v42 }
 0x109   :  { %v4655_v3 = vadd.f32 %v1991_v59, %v1943_v62  ;;  %v2717_v59 = vor.u32 %v3711_v46, %v2716_v45  ;;  %v2721_v62 = vor.u32 %v3703_v47, %v2718_v48  ;;  %2543 = vmatpush.bf16.msrb.mxu3 %v3950_v44 }
 0x10e   :  { %v1944_v13 = vpop.f32.mrf.mxu2  ;;  %v1849_v21 = vpop.f32.mrf.mxu0 }
 0x10f   :  { %v1993_v14 = vpop.f32.mrf.mxu3  ;;  %v1945_v18 = vadd.f32 %v1944_v13, %v1896_v2  ;;  %v1898_v22 = vpop.f32.mrf.mxu1  ;;  %v3935_v13 = vld [vmem:[%s5321_s1 + $0x368] sm:$0xff] }
 0x110   :  { %v1899_v25 = vadd.f32 %v1898_v22, %v1849_v21  ;;  %v2780_v21 = vld [vmem:[%s5322_s0 + $0xa8] sm:$0xf]  ;;  %2444 = vmatpush.bf16.msrb.mxu1 %v3935_v13 }
 0x111   :  { %v4684_v26 = vadd.f32 %v1993_v14, %v1945_v18  ;;  %2044 = vmatmul.bf16.gmra.mxu0 %v3141_v15  ;;  %v2772_v15 = vld [vmem:[%s5322_s0 + $0xa0] sm:$0xf]  ;;  %v3718_v18 = vld [vmem:[%s5322_s0 + $0xa4] sm:$0xf]  ;;  %v3727_v22 = vld [vmem:[%s5322_s0 + $0xe4] sm:$0xf0] }
 0x112   :  { %2093 = vmatmul.bf16.gmra.mxu1 %v3145_v16  ;;  %v3726_v16 = vld [vmem:[%s5322_s0 + $0xdc] sm:$0xf0] }
 0x113   :  { %2142 = vmatmul.bf16.gmra.mxu2 %v3149_v23  ;;  %v3719_v23 = vld [vmem:[%s5322_s0 + $0xac] sm:$0xf]  ;;  %v2773_v29 = vor.u32 %v3726_v16, %v2772_v15  ;;  %v3941_v16 = vld [vmem:[%s5321_s1 + $0x398] sm:$0xff] }
 0x114   :  { %2191 = vmatmul.bf16.gmra.mxu3 %v3153_v24  ;;  %v2782_v24 = vld [vmem:[%s5322_s0 + $0xe8] sm:$0xf0]  ;;  %2495 = vmatpush.bf16.msrb.mxu2 %v3941_v16 }
 0x116   :  { %v1947_v33 = vpop.f32.mrf.mxu2  ;;  %v1851_v36 = vpop.f32.mrf.mxu0 }
 0x117   :  { %v1996_v34 = vpop.f32.mrf.mxu3  ;;  %v1948_v35 = vadd.f32 %v1947_v33, %v1899_v25  ;;  %v1900_v37 = vpop.f32.mrf.mxu1 }
 0x118   :  { %v1901_v38 = vadd.f32 %v1900_v37, %v1851_v36  ;;  %v2781_v36 = vor.u32 %v3727_v22, %v2780_v21  ;;  %v2785_v37 = vor.u32 %v3719_v23, %v2782_v24 }
 0x119   :  { %v4695_v39 = vadd.f32 %v1996_v34, %v1948_v35 }
 0x11e   :  { %v1949_v51 = vpop.f32.mrf.mxu2  ;;  %v2010_v57 = vpop.f32.mrf.mxu0 }
 0x11f   :  { %v1998_v52 = vpop.f32.mrf.mxu3  ;;  %v1950_v56 = vadd.f32 %v1949_v51, %v1901_v38  ;;  %v2059_v58 = vpop.f32.mrf.mxu1  ;;  %v2011_v63 = vadd.f32 %v2010_v57, %v4415_v0  ;;  %v3742_v57 = vld [vmem:[%s5322_s0 + $0x15c] sm:$0xf0] }
 0x121   :  { %v4725_v1 = vadd.f32 %v1998_v52, %v1950_v56  ;;  %v2060_v2 = vadd.f32 %v2059_v58, %v2011_v63  ;;  %2205 = vmatmul.bf16.vlgmr.msra.gmra.mxu0 %v2709_v53  ;;  %v3934_v53 = vld [vmem:[%s5321_s1 + $0x360] sm:$0xff]  ;;  %v3735_v63 = vld [vmem:[%s5322_s0 + $0x12c] sm:$0xf] }
 0x122   :  { %2254 = vmatmul.bf16.vlgmr.msra.gmra.mxu1 %v2713_v55  ;;  %v2836_v56 = vld [vmem:[%s5322_s0 + $0x120] sm:$0xf]  ;;  %v3734_v58 = vld [vmem:[%s5322_s0 + $0x124] sm:$0xf] }
 0x123   :  { %2303 = vmatmul.bf16.vlgmr.msra.gmra.mxu2 %v2717_v59  ;;  %v2844_v59 = vld [vmem:[%s5322_s0 + $0x128] sm:$0xf]  ;;  %2445 = vmatpush.bf16.msrb.mxu1 %v3934_v53  ;;  %v2837_v6 = vor.u32 %v3742_v57, %v2836_v56  ;;  %v3940_v57 = vld [vmem:[%s5321_s1 + $0x390] sm:$0xff] }
 0x124   :  { %2352 = vmatmul.bf16.vlgmr.msra.gmra.mxu3 %v2721_v62  ;;  %v3743_v62 = vld [vmem:[%s5322_s0 + $0x164] sm:$0xf0]  ;;  %2496 = vmatpush.bf16.msrb.mxu2 %v3940_v57 }
 0x126   :  { %v2108_v0 = vpop.f32.mrf.mxu2  ;;  %v2012_v9 = vpop.f32.mrf.mxu0 }
 0x127   :  { %v2157_v7 = vpop.f32.mrf.mxu3  ;;  %v2109_v8 = vadd.f32 %v2108_v0, %v2060_v2  ;;  %v2061_v10 = vpop.f32.mrf.mxu1  ;;  %v2013_v11 = vadd.f32 %v2012_v9, %v4444_v20  ;;  %v2774_v20 = vld [vmem:[%s5322_s0 + $0xe0] sm:$0xf0]  ;;  %v2846_v2 = vld [vmem:[%s5322_s0 + $0x168] sm:$0xf0] }
 0x128   :  { %v2777_v31 = vor.u32 %v3718_v18, %v2774_v20  ;;  %v3925_v18 = vld [vmem:[%s5321_s1 + $0x318] sm:$0xff] }
 0x129   :  { %v4737_v12 = vadd.f32 %v2157_v7, %v2109_v8  ;;  %v2062_v14 = vadd.f32 %v2061_v10, %v2013_v11  ;;  %v2845_v10 = vor.u32 %v3743_v62, %v2844_v59  ;;  %v2849_v11 = vor.u32 %v3735_v63, %v2846_v2  ;;  %v3949_v20 = vld [vmem:[%s5321_s1 + $0x3d8] sm:$0xff]  ;;  %2397 = vmatpush.bf16.msrb.mxu0 %v3925_v18 }
 0x12a   :  { %2544 = vmatpush.bf16.msrb.mxu3 %v3949_v20 }
 0x12e   :  { %v2110_v25 = vpop.f32.mrf.mxu2  ;;  %v2015_v34 = vpop.f32.mrf.mxu0 }
 0x12f   :  { %v2159_v27 = vpop.f32.mrf.mxu3  ;;  %v2111_v33 = vadd.f32 %v2110_v25, %v2062_v14  ;;  %v2064_v35 = vpop.f32.mrf.mxu1  ;;  %v2016_v38 = vadd.f32 %v2015_v34, %v4455_v30  ;;  %v3758_v34 = vld [vmem:[%s5322_s0 + $0x1dc] sm:$0xf0] }
 0x131   :  { %v4767_v40 = vadd.f32 %v2159_v27, %v2111_v33  ;;  %v2065_v41 = vadd.f32 %v2064_v35, %v2016_v38  ;;  %2210 = vmatmul.bf16.gmra.mxu0 %v2773_v29  ;;  %v3933_v29 = vld [vmem:[%s5321_s1 + $0x358] sm:$0xff]  ;;  %v2900_v33 = vld [vmem:[%s5322_s0 + $0x1a0] sm:$0xf]  ;;  %v3750_v35 = vld [vmem:[%s5322_s0 + $0x1a4] sm:$0xf] }
 0x132   :  { %2259 = vmatmul.bf16.gmra.mxu1 %v2777_v31  ;;  %v3751_v38 = vld [vmem:[%s5322_s0 + $0x1ac] sm:$0xf]  ;;  %v2901_v44 = vor.u32 %v3758_v34, %v2900_v33 }
 0x133   :  { %2308 = vmatmul.bf16.gmra.mxu2 %v2781_v36  ;;  %v2908_v36 = vld [vmem:[%s5322_s0 + $0x1a8] sm:$0xf]  ;;  %2446 = vmatpush.bf16.msrb.mxu1 %v3933_v29 }
 0x134   :  { %2357 = vmatmul.bf16.gmra.mxu3 %v2785_v37  ;;  %v3759_v37 = vld [vmem:[%s5322_s0 + $0x1e4] sm:$0xf0] }
 0x135   :  { %v3939_v34 = vld [vmem:[%s5321_s1 + $0x388] sm:$0xff] }
 0x136   :  { %v2113_v30 = vpop.f32.mrf.mxu2  ;;  %v2017_v47 = vpop.f32.mrf.mxu0  ;;  %2497 = vmatpush.bf16.msrb.mxu2 %v3939_v34 }
 0x137   :  { %v2162_v45 = vpop.f32.mrf.mxu3  ;;  %v2114_v46 = vadd.f32 %v2113_v30, %v2065_v41  ;;  %v2066_v48 = vpop.f32.mrf.mxu1  ;;  %v2018_v51 = vadd.f32 %v2017_v47, %v4484_v50  ;;  %v2838_v50 = vld [vmem:[%s5322_s0 + $0x160] sm:$0xf0]  ;;  %v2910_v41 = vld [vmem:[%s5322_s0 + $0x1e8] sm:$0xf0] }
 0x138   :  { %v2841_v0 = vor.u32 %v3734_v58, %v2838_v50  ;;  %v3924_v58 = vld [vmem:[%s5321_s1 + $0x310] sm:$0xff] }
 0x139   :  { %v4779_v52 = vadd.f32 %v2162_v45, %v2114_v46  ;;  %v2067_v55 = vadd.f32 %v2066_v48, %v2018_v51  ;;  %v2909_v48 = vor.u32 %v3759_v37, %v2908_v36  ;;  %v2913_v51 = vor.u32 %v3751_v38, %v2910_v41  ;;  %v3948_v50 = vld [vmem:[%s5321_s1 + $0x3d0] sm:$0xff]  ;;  %2398 = vmatpush.bf16.msrb.mxu0 %v3924_v58 }
 0x13a   :  { %2545 = vmatpush.bf16.msrb.mxu3 %v3948_v50 }
 0x13e   :  { %v2115_v4 = vpop.f32.mrf.mxu2  ;;  %v2020_v8 = vpop.f32.mrf.mxu0 }
 0x13f   :  { %v2164_v5 = vpop.f32.mrf.mxu3  ;;  %v2116_v7 = vadd.f32 %v2115_v4, %v2067_v55  ;;  %v2069_v9 = vpop.f32.mrf.mxu1  ;;  %v2021_v13 = vadd.f32 %v2020_v8, %v4495_v60  ;;  %v3774_v8 = vld [vmem:[%s5322_s0 + $0x25c] sm:$0xf0] }
 0x141   :  { %v4809_v14 = vadd.f32 %v2164_v5, %v2116_v7  ;;  %v2070_v15 = vadd.f32 %v2069_v9, %v2021_v13  ;;  %2215 = vmatmul.bf16.gmra.mxu0 %v2837_v6  ;;  %v3932_v6 = vld [vmem:[%s5321_s1 + $0x350] sm:$0xff]  ;;  %v2964_v7 = vld [vmem:[%s5322_s0 + $0x220] sm:$0xf]  ;;  %v3766_v9 = vld [vmem:[%s5322_s0 + $0x224] sm:$0xf] }
 0x142   :  { %2264 = vmatmul.bf16.gmra.mxu1 %v2841_v0  ;;  %v3767_v13 = vld [vmem:[%s5322_s0 + $0x22c] sm:$0xf]  ;;  %v2965_v20 = vor.u32 %v3774_v8, %v2964_v7  ;;  %v3938_v8 = vld [vmem:[%s5321_s1 + $0x380] sm:$0xff] }
 0x143   :  { %2313 = vmatmul.bf16.gmra.mxu2 %v2845_v10  ;;  %v2972_v10 = vld [vmem:[%s5322_s0 + $0x228] sm:$0xf]  ;;  %2447 = vmatpush.bf16.msrb.mxu1 %v3932_v6 }
 0x144   :  { %2362 = vmatmul.bf16.gmra.mxu3 %v2849_v11  ;;  %v3775_v11 = vld [vmem:[%s5322_s0 + $0x264] sm:$0xf0]  ;;  %2498 = vmatpush.bf16.msrb.mxu2 %v3938_v8 }
 0x146   :  { %v2118_v60 = vpop.f32.mrf.mxu2  ;;  %v2022_v23 = vpop.f32.mrf.mxu0 }
 0x147   :  { %v2167_v21 = vpop.f32.mrf.mxu3  ;;  %v2119_v22 = vadd.f32 %v2118_v60, %v2070_v15  ;;  %v2071_v24 = vpop.f32.mrf.mxu1  ;;  %v2023_v25 = vadd.f32 %v2022_v23, %v4524_v17  ;;  %v2902_v17 = vld [vmem:[%s5322_s0 + $0x1e0] sm:$0xf0]  ;;  %v2974_v15 = vld [vmem:[%s5322_s0 + $0x268] sm:$0xf0] }
 0x148   :  { %v2905_v30 = vor.u32 %v3750_v35, %v2902_v17  ;;  %v3923_v35 = vld [vmem:[%s5321_s1 + $0x308] sm:$0xff] }
 0x149   :  { %v4821_v27 = vadd.f32 %v2167_v21, %v2119_v22  ;;  %v2072_v31 = vadd.f32 %v2071_v24, %v2023_v25  ;;  %v2973_v24 = vor.u32 %v3775_v11, %v2972_v10  ;;  %v2977_v25 = vor.u32 %v3767_v13, %v2974_v15  ;;  %v3947_v17 = vld [vmem:[%s5321_s1 + $0x3c8] sm:$0xff]  ;;  %2399 = vmatpush.bf16.msrb.mxu0 %v3923_v35 }
 0x14a   :  { %2546 = vmatpush.bf16.msrb.mxu3 %v3947_v17 }
 0x14e   :  { %v2120_v42 = vpop.f32.mrf.mxu2  ;;  %v2025_v46 = vpop.f32.mrf.mxu0 }
 0x14f   :  { %v2169_v43 = vpop.f32.mrf.mxu3  ;;  %v2121_v45 = vadd.f32 %v2120_v42, %v2072_v31  ;;  %v2074_v47 = vpop.f32.mrf.mxu1  ;;  %v2026_v53 = vadd.f32 %v2025_v46, %v4535_v28  ;;  %v3790_v46 = vld [vmem:[%s5322_s0 + $0x2dc] sm:$0xf0] }
 0x151   :  { %v4851_v55 = vadd.f32 %v2169_v43, %v2121_v45  ;;  %v2075_v56 = vadd.f32 %v2074_v47, %v2026_v53  ;;  %2220 = vmatmul.bf16.gmra.mxu0 %v2901_v44  ;;  %v3931_v44 = vld [vmem:[%s5321_s1 + $0x348] sm:$0xff]  ;;  %v3028_v45 = vld [vmem:[%s5322_s0 + $0x2a0] sm:$0xf]  ;;  %v3782_v47 = vld [vmem:[%s5322_s0 + $0x2a4] sm:$0xf] }
 0x152   :  { %2269 = vmatmul.bf16.gmra.mxu1 %v2905_v30  ;;  %v3783_v53 = vld [vmem:[%s5322_s0 + $0x2ac] sm:$0xf]  ;;  %v3029_v50 = vor.u32 %v3790_v46, %v3028_v45 }
 0x153   :  { %2318 = vmatmul.bf16.gmra.mxu2 %v2909_v48  ;;  %v3036_v48 = vld [vmem:[%s5322_s0 + $0x2a8] sm:$0xf]  ;;  %2448 = vmatpush.bf16.msrb.mxu1 %v3931_v44 }
 0x154   :  { %2367 = vmatmul.bf16.gmra.mxu3 %v2913_v51  ;;  %v3791_v51 = vld [vmem:[%s5322_s0 + $0x2e4] sm:$0xf0] }
 0x156   :  { %v2123_v28 = vpop.f32.mrf.mxu2  ;;  %v2027_v63 = vpop.f32.mrf.mxu0 }
 0x157   :  { %v2172_v59 = vpop.f32.mrf.mxu3  ;;  %v2124_v62 = vadd.f32 %v2123_v28, %v2075_v56  ;;  %v2076_v2 = vpop.f32.mrf.mxu1  ;;  %v2028_v4 = vadd.f32 %v2027_v63, %v4564_v49  ;;  %v2966_v49 = vld [vmem:[%s5322_s0 + $0x260] sm:$0xf0]  ;;  %v3038_v56 = vld [vmem:[%s5322_s0 + $0x2e8] sm:$0xf0] }
 0x158   :  { %v2969_v60 = vor.u32 %v3766_v9, %v2966_v49  ;;  %v3922_v9 = vld [vmem:[%s5321_s1 + $0x300] sm:$0xff] }
 0x159   :  { %v4863_v5 = vadd.f32 %v2172_v59, %v2124_v62  ;;  %v2077_v0 = vadd.f32 %v2076_v2, %v2028_v4  ;;  %v3037_v2 = vor.u32 %v3791_v51, %v3036_v48  ;;  %v3041_v4 = vor.u32 %v3783_v53, %v3038_v56  ;;  %v3946_v49 = vld [vmem:[%s5321_s1 + $0x3c0] sm:$0xff]  ;;  %2400 = vmatpush.bf16.msrb.mxu0 %v3922_v9 }
 0x15a   :  { %2547 = vmatpush.bf16.msrb.mxu3 %v3946_v49 }
 0x15e   :  { %v2125_v16 = vpop.f32.mrf.mxu2  ;;  %v2030_v22 = vpop.f32.mrf.mxu0 }
 0x15f   :  { %v2174_v18 = vpop.f32.mrf.mxu3  ;;  %v2126_v21 = vadd.f32 %v2125_v16, %v2077_v0  ;;  %v2079_v23 = vpop.f32.mrf.mxu1  ;;  %v2031_v29 = vadd.f32 %v2030_v22, %v4575_v61  ;;  %v3806_v22 = vld [vmem:[%s5322_s0 + $0x35c] sm:$0xf0] }
 0x161   :  { %v4893_v31 = vadd.f32 %v2174_v18, %v2126_v21  ;;  %v2080_v33 = vadd.f32 %v2079_v23, %v2031_v29  ;;  %2225 = vmatmul.bf16.gmra.mxu0 %v2965_v20  ;;  %v3930_v20 = vld [vmem:[%s5321_s1 + $0x340] sm:$0xff]  ;;  %v3799_v29 = vld [vmem:[%s5322_s0 + $0x32c] sm:$0xf] }
 0x162   :  { %2274 = vmatmul.bf16.gmra.mxu1 %v2969_v60  ;;  %v3092_v21 = vld [vmem:[%s5322_s0 + $0x320] sm:$0xf]  ;;  %v3798_v23 = vld [vmem:[%s5322_s0 + $0x324] sm:$0xf] }
 0x163   :  { %2323 = vmatmul.bf16.gmra.mxu2 %v2973_v24  ;;  %v3100_v24 = vld [vmem:[%s5322_s0 + $0x328] sm:$0xf]  ;;  %2449 = vmatpush.bf16.msrb.mxu1 %v3930_v20  ;;  %v3093_v17 = vor.u32 %v3806_v22, %v3092_v21 }
 0x164   :  { %2372 = vmatmul.bf16.gmra.mxu3 %v2977_v25  ;;  %v3807_v25 = vld [vmem:[%s5322_s0 + $0x364] sm:$0xf0] }
 0x166   :  { %v2128_v61 = vpop.f32.mrf.mxu2  ;;  %v2032_v38 = vpop.f32.mrf.mxu0 }
 0x167   :  { %v2177_v36 = vpop.f32.mrf.mxu3  ;;  %v2129_v37 = vadd.f32 %v2128_v61, %v2080_v33  ;;  %v2081_v41 = vpop.f32.mrf.mxu1  ;;  %v2033_v42 = vadd.f32 %v2032_v38, %v4604_v19  ;;  %v3030_v19 = vld [vmem:[%s5322_s0 + $0x2e0] sm:$0xf0]  ;;  %v3102_v33 = vld [vmem:[%s5322_s0 + $0x368] sm:$0xf0] }
 0x168   :  { %v3033_v28 = vor.u32 %v3782_v47, %v3030_v19 }
 0x169   :  { %v4905_v43 = vadd.f32 %v2177_v36, %v2129_v37  ;;  %v2082_v30 = vadd.f32 %v2081_v41, %v2033_v42  ;;  %v3101_v41 = vor.u32 %v3807_v25, %v3100_v24  ;;  %v3105_v42 = vor.u32 %v3799_v29, %v3102_v33  ;;  %v3712_v25 = vld [vmem:[%s5322_s0 + $0x6c] sm:$0xf0]  ;;  %v3704_v29 = vld [vmem:[%s5322_s0 + $0x34] sm:$0xf] }
 0x16a   :  { %v2726_v33 = vld [vmem:[%s5322_s0 + $0x70] sm:$0xf0] }
 0x16e   :  { %v2130_v57 = vpop.f32.mrf.mxu2  ;;  %v2035_v62 = vpop.f32.mrf.mxu0 }
 0x16f   :  { %v2179_v58 = vpop.f32.mrf.mxu3  ;;  %v2131_v59 = vadd.f32 %v2130_v57, %v2082_v30  ;;  %v2084_v63 = vpop.f32.mrf.mxu1  ;;  %v2036_v6 = vadd.f32 %v2035_v62, %v4615_v32  ;;  %v3815_v62 = vld [vmem:[%s5322_s0 + $0x3ac] sm:$0xf] }
 0x171   :  { %v4935_v0 = vadd.f32 %v2179_v58, %v2131_v59  ;;  %v2085_v7 = vadd.f32 %v2084_v63, %v2036_v6  ;;  %2230 = vmatmul.bf16.gmra.mxu0 %v3029_v50  ;;  %v3822_v58 = vld [vmem:[%s5322_s0 + $0x3dc] sm:$0xf0]  ;;  %v3814_v50 = vld [vmem:[%s5322_s0 + $0x3a4] sm:$0xf]  ;;  %v3823_v59 = vld [vmem:[%s5322_s0 + $0x3e4] sm:$0xf0] }
 0x172   :  { %2279 = vmatmul.bf16.gmra.mxu1 %v3033_v28  ;;  %v3158_v28 = vld [vmem:[%s5322_s0 + $0x3e0] sm:$0xf0]  ;;  %v3166_v63 = vld [vmem:[%s5322_s0 + $0x3e8] sm:$0xf0] }
 0x173   :  { %2328 = vmatmul.bf16.gmra.mxu2 %v3037_v2 }
 0x174   :  { %2377 = vmatmul.bf16.gmra.mxu3 %v3041_v4 }
 0x176   :  { %v2133_v32 = vpop.f32.mrf.mxu2  ;;  %v2037_v13 = vpop.f32.mrf.mxu0 }
 0x177   :  { %v2182_v10 = vpop.f32.mrf.mxu3  ;;  %v2134_v11 = vadd.f32 %v2133_v32, %v2085_v7  ;;  %v2086_v15 = vpop.f32.mrf.mxu1  ;;  %v2038_v16 = vadd.f32 %v2037_v13, %v4644_v54  ;;  %v3094_v54 = vld [vmem:[%s5322_s0 + $0x360] sm:$0xf0]  ;;  %v3161_v7 = vor.u32 %v3814_v50, %v3158_v28 }
 0x178   :  { %v3097_v61 = vor.u32 %v3798_v23, %v3094_v54 }
 0x179   :  { %v4947_v18 = vadd.f32 %v2182_v10, %v2134_v11  ;;  %v2087_v60 = vadd.f32 %v2086_v15, %v2038_v16  ;;  %v3169_v10 = vor.u32 %v3815_v62, %v3166_v63  ;;  %v3720_v62 = vld [vmem:[%s5322_s0 + $0xb4] sm:$0xf] }
 0x17a   :  { %v2790_v63 = vld [vmem:[%s5322_s0 + $0xf0] sm:$0xf0] }
 0x17e   :  { %v2135_v34 = vpop.f32.mrf.mxu2  ;;  %v2040_v37 = vpop.f32.mrf.mxu0 }
 0x17f   :  { %v2184_v35 = vpop.f32.mrf.mxu3  ;;  %v2136_v36 = vadd.f32 %v2135_v34, %v2087_v60  ;;  %v2089_v38 = vpop.f32.mrf.mxu1  ;;  %v2041_v44 = vadd.f32 %v2040_v37, %v4655_v3  ;;  %v3156_v3 = vld [vmem:[%s5322_s0 + $0x3a0] sm:$0xf]  ;;  %v3713_v34 = vld [vmem:[%s5322_s0 + $0x74] sm:$0xf0] }
 0x180   :  { %v3157_v6 = vor.u32 %v3822_v58, %v3156_v3 }
 0x181   :  { %v4977_v30 = vadd.f32 %v2184_v35, %v2136_v36  ;;  %v2090_v45 = vadd.f32 %v2089_v38, %v2041_v44  ;;  %2235 = vmatmul.bf16.gmra.mxu0 %v3093_v17  ;;  %v3705_v35 = vld [vmem:[%s5322_s0 + $0x3c] sm:$0xf]  ;;  %v2729_v38 = vor.u32 %v3704_v29, %v2726_v33 }
 0x182   :  { %2284 = vmatmul.bf16.gmra.mxu1 %v3097_v61  ;;  %v2734_v17 = vld [vmem:[%s5322_s0 + $0x78] sm:$0xf0] }
 0x183   :  { %2333 = vmatmul.bf16.gmra.mxu2 %v3101_v41 }
 0x184   :  { %2382 = vmatmul.bf16.gmra.mxu3 %v3105_v42 }
 0x186   :  { %v2138_v46 = vpop.f32.mrf.mxu2  ;;  %v2042_v48 = vpop.f32.mrf.mxu0 }
 0x187   :  { %v2187_v47 = vpop.f32.mrf.mxu3  ;;  %v2139_v19 = vadd.f32 %v2138_v46, %v2090_v45  ;;  %v2091_v51 = vpop.f32.mrf.mxu1  ;;  %v2043_v53 = vadd.f32 %v2042_v48, %v4684_v26  ;;  %v3164_v26 = vld [vmem:[%s5322_s0 + $0x3a8] sm:$0xf]  ;;  %v2737_v46 = vor.u32 %v3705_v35, %v2734_v17  ;;  %v3736_v35 = vld [vmem:[%s5322_s0 + $0x134] sm:$0xf] }
 0x188   :  { %v3165_v32 = vor.u32 %v3823_v59, %v3164_v26  ;;  %v3728_v59 = vld [vmem:[%s5322_s0 + $0xec] sm:$0xf0]  ;;  %v2854_v17 = vld [vmem:[%s5322_s0 + $0x170] sm:$0xf0] }
 0x189   :  { %v4980_v56 = vadd.f32 %v2187_v47, %v2139_v19  ;;  %v2092_v57 = vadd.f32 %v2091_v51, %v2043_v53 }
 0x18e   :  { %v2140_v2 = vpop.f32.mrf.mxu2  ;;  %v2045_v9 = vpop.f32.mrf.mxu0 }
 0x18f   :  { %v2189_v4 = vpop.f32.mrf.mxu3  ;;  %v2141_v8 = vadd.f32 %v2140_v2, %v2092_v57  ;;  %v2094_v49 = vpop.f32.mrf.mxu1  ;;  %v2046_v11 = vadd.f32 %v2045_v9, %v4695_v39  ;;  %v2724_v39 = vld [vmem:[%s5322_s0 + $0x30] sm:$0xf]  ;;  %v3729_v2 = vld [vmem:[%s5322_s0 + $0xf4] sm:$0xf0] }
 0x190   :  { %v2725_v37 = vor.u32 %v3712_v25, %v2724_v39 }
 0x191   :  { %v5007_v13 = vadd.f32 %v2189_v4, %v2141_v8  ;;  %v2095_v15 = vadd.f32 %v2094_v49, %v2046_v11  ;;  %2240 = vmatmul.bf16.gmra.mxu0 %v3157_v6  ;;  %v3721_v4 = vld [vmem:[%s5322_s0 + $0xbc] sm:$0xf]  ;;  %v2793_v49 = vor.u32 %v3720_v62, %v2790_v63 }
 0x192   :  { %2289 = vmatmul.bf16.gmra.mxu1 %v3161_v7  ;;  %v2798_v6 = vld [vmem:[%s5322_s0 + $0xf8] sm:$0xf0] }
 0x193   :  { %2338 = vmatmul.bf16.gmra.mxu2 %v3165_v32 }
 0x194   :  { %2387 = vmatmul.bf16.gmra.mxu3 %v3169_v10 }
 0x196   :  { %v2143_v16 = vpop.f32.mrf.mxu2  ;;  %v2047_v21 = vpop.f32.mrf.mxu0 }
 0x197   :  { %v2192_v20 = vpop.f32.mrf.mxu3  ;;  %v2144_v60 = vadd.f32 %v2143_v16, %v2095_v15  ;;  %v2096_v22 = vpop.f32.mrf.mxu1  ;;  %v2048_v23 = vadd.f32 %v2047_v21, %v4725_v1  ;;  %v2732_v1 = vld [vmem:[%s5322_s0 + $0x38] sm:$0xf]  ;;  %v2801_v16 = vor.u32 %v3721_v4, %v2798_v6  ;;  %v3752_v4 = vld [vmem:[%s5322_s0 + $0x1b4] sm:$0xf] }
 0x198   :  { %v2733_v45 = vor.u32 %v3713_v34, %v2732_v1  ;;  %v3744_v34 = vld [vmem:[%s5322_s0 + $0x16c] sm:$0xf0]  ;;  %v2918_v6 = vld [vmem:[%s5322_s0 + $0x1f0] sm:$0xf0] }
 0x199   :  { %v5010_v54 = vadd.f32 %v2192_v20, %v2144_v60  ;;  %v2097_v24 = vadd.f32 %v2096_v22, %v2048_v23 }
 0x19e   :  { %v2145_v61 = vpop.f32.mrf.mxu2  ;;  %v2206_v42 = vpop.f32.mrf.mxu0 }
 0x19f   :  { %v2194_v36 = vpop.f32.mrf.mxu3  ;;  %v2146_v41 = vadd.f32 %v2145_v61, %v2097_v24  ;;  %v2255_v44 = vpop.f32.mrf.mxu1  ;;  %v2207_v47 = vadd.f32 %v2206_v42, %v4737_v12  ;;  %v2788_v12 = vld [vmem:[%s5322_s0 + $0xb0] sm:$0xf]  ;;  %v3745_v61 = vld [vmem:[%s5322_s0 + $0x174] sm:$0xf0] }
 0x1a0   :  { %v2789_v9 = vor.u32 %v3728_v59, %v2788_v12 }
 0x1a1   :  { %v5037_v19 = vadd.f32 %v2194_v36, %v2146_v41  ;;  %v2256_v48 = vadd.f32 %v2255_v44, %v2207_v47  ;;  %2401 = vmatmul.bf16.vlgmr.msrb.gmra.mxu0 %v2725_v37  ;;  %v3737_v36 = vld [vmem:[%s5322_s0 + $0x13c] sm:$0xf]  ;;  %v2857_v44 = vor.u32 %v3736_v35, %v2854_v17 }
 0x1a2   :  { %2450 = vmatmul.bf16.vlgmr.msrb.gmra.mxu1 %v2729_v38  ;;  %v2862_v37 = vld [vmem:[%s5322_s0 + $0x178] sm:$0xf0] }
 0x1a3   :  { %2499 = vmatmul.bf16.vlgmr.msrb.gmra.mxu2 %v2733_v45 }
 0x1a4   :  { %2548 = vmatmul.bf16.vlgmr.msrb.gmra.mxu3 %v2737_v46 }
 0x1a6   :  { %v2304_v51 = vpop.f32.mrf.mxu2  ;;  %v2208_v3 = vpop.f32.mrf.mxu0 }
 0x1a7   :  { %v2353_v53 = vpop.f32.mrf.mxu3  ;;  %v2305_v57 = vadd.f32 %v2304_v51, %v2256_v48  ;;  %v2257_v58 = vpop.f32.mrf.mxu1  ;;  %v2209_v50 = vadd.f32 %v2208_v3, %v4767_v40  ;;  %v2796_v40 = vld [vmem:[%s5322_s0 + $0xb8] sm:$0xf]  ;;  %v2865_v51 = vor.u32 %v3737_v36, %v2862_v37  ;;  %v3768_v36 = vld [vmem:[%s5322_s0 + $0x234] sm:$0xf] }
 0x1a8   :  { %v2797_v15 = vor.u32 %v3729_v2, %v2796_v40  ;;  %v3760_v2 = vld [vmem:[%s5322_s0 + $0x1ec] sm:$0xf0]  ;;  %v2982_v37 = vld [vmem:[%s5322_s0 + $0x270] sm:$0xf0] }
 0x1a9   :  { %v5040_v28 = vadd.f32 %v2353_v53, %v2305_v57  ;;  %v2258_v26 = vadd.f32 %v2257_v58, %v2209_v50 }
 0x1ae   :  { %v2306_v7 = vpop.f32.mrf.mxu2  ;;  %v2211_v10 = vpop.f32.mrf.mxu0 }
 0x1af   :  { %v2355_v8 = vpop.f32.mrf.mxu3  ;;  %v2307_v32 = vadd.f32 %v2306_v7, %v2258_v26  ;;  %v2260_v11 = vpop.f32.mrf.mxu1  ;;  %v2212_v20 = vadd.f32 %v2211_v10, %v4779_v52  ;;  %v2852_v52 = vld [vmem:[%s5322_s0 + $0x130] sm:$0xf]  ;;  %v3761_v7 = vld [vmem:[%s5322_s0 + $0x1f4] sm:$0xf0] }
 0x1b0   :  { %v2853_v42 = vor.u32 %v3744_v34, %v2852_v52 }
 0x1b1   :  { %v5067_v60 = vadd.f32 %v2355_v8, %v2307_v32  ;;  %v2261_v21 = vadd.f32 %v2260_v11, %v2212_v20  ;;  %2406 = vmatmul.bf16.gmra.mxu0 %v2789_v9  ;;  %v3753_v8 = vld [vmem:[%s5322_s0 + $0x1bc] sm:$0xf]  ;;  %v2921_v11 = vor.u32 %v3752_v4, %v2918_v6 }
 0x1b2   :  { %2455 = vmatmul.bf16.gmra.mxu1 %v2793_v49  ;;  %v2926_v9 = vld [vmem:[%s5322_s0 + $0x1f8] sm:$0xf0] }
 0x1b3   :  { %2504 = vmatmul.bf16.gmra.mxu2 %v2797_v15 }
 0x1b4   :  { %2553 = vmatmul.bf16.gmra.mxu3 %v2801_v16 }
 0x1b6   :  { %v2309_v22 = vpop.f32.mrf.mxu2  ;;  %v2213_v39 = vpop.f32.mrf.mxu0 }
 0x1b7   :  { %v2358_v23 = vpop.f32.mrf.mxu3  ;;  %v2310_v24 = vadd.f32 %v2309_v22, %v2261_v21  ;;  %v2262_v25 = vpop.f32.mrf.mxu1  ;;  %v2214_v29 = vadd.f32 %v2213_v39, %v4809_v14  ;;  %v2860_v14 = vld [vmem:[%s5322_s0 + $0x138] sm:$0xf]  ;;  %v2929_v22 = vor.u32 %v3753_v8, %v2926_v9  ;;  %v3784_v8 = vld [vmem:[%s5322_s0 + $0x2b4] sm:$0xf] }
 0x1b8   :  { %v2861_v48 = vor.u32 %v3745_v61, %v2860_v14  ;;  %v3776_v61 = vld [vmem:[%s5322_s0 + $0x26c] sm:$0xf0]  ;;  %v3046_v9 = vld [vmem:[%s5322_s0 + $0x2f0] sm:$0xf0] }
 0x1b9   :  { %v5070_v33 = vadd.f32 %v2358_v23, %v2310_v24  ;;  %v2263_v1 = vadd.f32 %v2262_v25, %v2214_v29 }
 0x1be   :  { %v2311_v38 = vpop.f32.mrf.mxu2  ;;  %v2216_v46 = vpop.f32.mrf.mxu0 }
 0x1bf   :  { %v2360_v41 = vpop.f32.mrf.mxu3  ;;  %v2312_v45 = vadd.f32 %v2311_v38, %v2263_v1  ;;  %v2265_v47 = vpop.f32.mrf.mxu1  ;;  %v2217_v53 = vadd.f32 %v2216_v46, %v4821_v27  ;;  %v2916_v27 = vld [vmem:[%s5322_s0 + $0x1b0] sm:$0xf]  ;;  %v3777_v38 = vld [vmem:[%s5322_s0 + $0x274] sm:$0xf0] }
 0x1c0   :  { %v2917_v10 = vor.u32 %v3760_v2, %v2916_v27 }
 0x1c1   :  { %v5097_v57 = vadd.f32 %v2360_v41, %v2312_v45  ;;  %v2266_v3 = vadd.f32 %v2265_v47, %v2217_v53  ;;  %2411 = vmatmul.bf16.gmra.mxu0 %v2853_v42  ;;  %v3769_v41 = vld [vmem:[%s5322_s0 + $0x23c] sm:$0xf]  ;;  %v2985_v47 = vor.u32 %v3768_v36, %v2982_v37 }
 0x1c2   :  { %2460 = vmatmul.bf16.gmra.mxu1 %v2857_v44  ;;  %v2990_v42 = vld [vmem:[%s5322_s0 + $0x278] sm:$0xf0] }
 0x1c3   :  { %2509 = vmatmul.bf16.gmra.mxu2 %v2861_v48 }
 0x1c4   :  { %2558 = vmatmul.bf16.gmra.mxu3 %v2865_v51 }
 0x1c6   :  { %v2314_v58 = vpop.f32.mrf.mxu2  ;;  %v2218_v12 = vpop.f32.mrf.mxu0 }
 0x1c7   :  { %v2363_v50 = vpop.f32.mrf.mxu3  ;;  %v2315_v26 = vadd.f32 %v2314_v58, %v2266_v3  ;;  %v2267_v59 = vpop.f32.mrf.mxu1  ;;  %v2219_v62 = vadd.f32 %v2218_v12, %v4851_v55  ;;  %v2924_v55 = vld [vmem:[%s5322_s0 + $0x1b8] sm:$0xf]  ;;  %v2993_v58 = vor.u32 %v3769_v41, %v2990_v42  ;;  %v3800_v41 = vld [vmem:[%s5322_s0 + $0x334] sm:$0xf] }
 0x1c8   :  { %v2925_v21 = vor.u32 %v3761_v7, %v2924_v55  ;;  %v3792_v7 = vld [vmem:[%s5322_s0 + $0x2ec] sm:$0xf0]  ;;  %v3110_v42 = vld [vmem:[%s5322_s0 + $0x370] sm:$0xf0] }
 0x1c9   :  { %v5100_v63 = vadd.f32 %v2363_v50, %v2315_v26  ;;  %v2268_v40 = vadd.f32 %v2267_v59, %v2219_v62 }
 0x1ce   :  { %v2316_v49 = vpop.f32.mrf.mxu2  ;;  %v2221_v16 = vpop.f32.mrf.mxu0 }
 0x1cf   :  { %v2365_v32 = vpop.f32.mrf.mxu3  ;;  %v2317_v15 = vadd.f32 %v2316_v49, %v2268_v40  ;;  %v2270_v20 = vpop.f32.mrf.mxu1  ;;  %v2222_v23 = vadd.f32 %v2221_v16, %v4863_v5  ;;  %v2980_v5 = vld [vmem:[%s5322_s0 + $0x230] sm:$0xf]  ;;  %v3793_v49 = vld [vmem:[%s5322_s0 + $0x2f4] sm:$0xf0] }
 0x1d0   :  { %v2981_v46 = vor.u32 %v3776_v61, %v2980_v5 }
 0x1d1   :  { %v5127_v24 = vadd.f32 %v2365_v32, %v2317_v15  ;;  %v2271_v39 = vadd.f32 %v2270_v20, %v2222_v23  ;;  %2416 = vmatmul.bf16.gmra.mxu0 %v2917_v10  ;;  %v3785_v32 = vld [vmem:[%s5322_s0 + $0x2bc] sm:$0xf]  ;;  %v3049_v20 = vor.u32 %v3784_v8, %v3046_v9 }
 0x1d2   :  { %2465 = vmatmul.bf16.gmra.mxu1 %v2921_v11  ;;  %v3054_v10 = vld [vmem:[%s5322_s0 + $0x2f8] sm:$0xf0] }
 0x1d3   :  { %2514 = vmatmul.bf16.gmra.mxu2 %v2925_v21 }
 0x1d4   :  { %2563 = vmatmul.bf16.gmra.mxu3 %v2929_v22 }
 0x1d6   :  { %v2319_v25 = vpop.f32.mrf.mxu2  ;;  %v2223_v52 = vpop.f32.mrf.mxu0 }
 0x1d7   :  { %v2368_v29 = vpop.f32.mrf.mxu3  ;;  %v2320_v1 = vadd.f32 %v2319_v25, %v2271_v39  ;;  %v2272_v34 = vpop.f32.mrf.mxu1  ;;  %v2224_v35 = vadd.f32 %v2223_v52, %v4893_v31  ;;  %v2988_v31 = vld [vmem:[%s5322_s0 + $0x238] sm:$0xf]  ;;  %v3057_v25 = vor.u32 %v3785_v32, %v3054_v10  ;;  %v3816_v32 = vld [vmem:[%s5322_s0 + $0x3b4] sm:$0xf] }
 0x1d8   :  { %v2989_v3 = vor.u32 %v3777_v38, %v2988_v31  ;;  %v3808_v38 = vld [vmem:[%s5322_s0 + $0x36c] sm:$0xf0]  ;;  %v3174_v10 = vld [vmem:[%s5322_s0 + $0x3f0] sm:$0xf0] }
 0x1d9   :  { %v5130_v17 = vadd.f32 %v2368_v29, %v2320_v1  ;;  %v2273_v14 = vadd.f32 %v2272_v34, %v2224_v35 }
 0x1de   :  { %v2321_v44 = vpop.f32.mrf.mxu2  ;;  %v2226_v51 = vpop.f32.mrf.mxu0 }
 0x1df   :  { %v2370_v45 = vpop.f32.mrf.mxu3  ;;  %v2322_v48 = vadd.f32 %v2321_v44, %v2273_v14  ;;  %v2275_v53 = vpop.f32.mrf.mxu1  ;;  %v2227_v50 = vadd.f32 %v2226_v51, %v4905_v43  ;;  %v3044_v43 = vld [vmem:[%s5322_s0 + $0x2b0] sm:$0xf]  ;;  %v3809_v44 = vld [vmem:[%s5322_s0 + $0x374] sm:$0xf0] }
 0x1e0   :  { %v3045_v16 = vor.u32 %v3792_v7, %v3044_v43 }
 0x1e1   :  { %v5157_v26 = vadd.f32 %v2370_v45, %v2322_v48  ;;  %v2276_v12 = vadd.f32 %v2275_v53, %v2227_v50  ;;  %2421 = vmatmul.bf16.gmra.mxu0 %v2981_v46  ;;  %v3801_v45 = vld [vmem:[%s5322_s0 + $0x33c] sm:$0xf]  ;;  %v3113_v53 = vor.u32 %v3800_v41, %v3110_v42 }
 0x1e2   :  { %2470 = vmatmul.bf16.gmra.mxu1 %v2985_v47  ;;  %v3118_v46 = vld [vmem:[%s5322_s0 + $0x378] sm:$0xf0] }
 0x1e3   :  { %2519 = vmatmul.bf16.gmra.mxu2 %v2989_v3 }
 0x1e4   :  { %2568 = vmatmul.bf16.gmra.mxu3 %v2993_v58 }
 0x1e6   :  { %v2324_v59 = vpop.f32.mrf.mxu2  ;;  %v2228_v27 = vpop.f32.mrf.mxu0 }
 0x1e7   :  { %v2373_v62 = vpop.f32.mrf.mxu3  ;;  %v2325_v40 = vadd.f32 %v2324_v59, %v2276_v12  ;;  %v2277_v2 = vpop.f32.mrf.mxu1  ;;  %v2229_v4 = vadd.f32 %v2228_v27, %v4935_v0  ;;  %v3052_v0 = vld [vmem:[%s5322_s0 + $0x2b8] sm:$0xf]  ;;  %v3121_v59 = vor.u32 %v3801_v45, %v3118_v46 }
 0x1e8   :  { %v3053_v39 = vor.u32 %v3793_v49, %v3052_v0  ;;  %v3824_v49 = vld [vmem:[%s5322_s0 + $0x3ec] sm:$0xf0] }
 0x1e9   :  { %v5160_v6 = vadd.f32 %v2373_v62, %v2325_v40  ;;  %v2278_v55 = vadd.f32 %v2277_v2, %v2229_v4 }
 0x1ee   :  { %v2326_v11 = vpop.f32.mrf.mxu2  ;;  %v2231_v22 = vpop.f32.mrf.mxu0 }
 0x1ef   :  { %v2375_v15 = vpop.f32.mrf.mxu3  ;;  %v2327_v21 = vadd.f32 %v2326_v11, %v2278_v55  ;;  %v2280_v23 = vpop.f32.mrf.mxu1  ;;  %v2232_v29 = vadd.f32 %v2231_v22, %v4947_v18  ;;  %v3108_v18 = vld [vmem:[%s5322_s0 + $0x330] sm:$0xf]  ;;  %v3825_v11 = vld [vmem:[%s5322_s0 + $0x3f4] sm:$0xf0] }
 0x1f0   :  { %v3109_v51 = vor.u32 %v3808_v38, %v3108_v18 }
 0x1f1   :  { %v5187_v1 = vadd.f32 %v2375_v15, %v2327_v21  ;;  %v2281_v52 = vadd.f32 %v2280_v23, %v2232_v29  ;;  %2426 = vmatmul.bf16.gmra.mxu0 %v3045_v16  ;;  %v3817_v15 = vld [vmem:[%s5322_s0 + $0x3bc] sm:$0xf]  ;;  %v3177_v23 = vor.u32 %v3816_v32, %v3174_v10 }
 0x1f2   :  { %2475 = vmatmul.bf16.gmra.mxu1 %v3049_v20  ;;  %v3182_v16 = vld [vmem:[%s5322_s0 + $0x3f8] sm:$0xf0] }
 0x1f3   :  { %2524 = vmatmul.bf16.gmra.mxu2 %v3053_v39 }
 0x1f4   :  { %2573 = vmatmul.bf16.gmra.mxu3 %v3057_v25 }
 0x1f6   :  { %v2329_v34 = vpop.f32.mrf.mxu2  ;;  %v2233_v5 = vpop.f32.mrf.mxu0 }
 0x1f7   :  { %v2378_v35 = vpop.f32.mrf.mxu3  ;;  %v2330_v14 = vadd.f32 %v2329_v34, %v2281_v52  ;;  %v2282_v61 = vpop.f32.mrf.mxu1  ;;  %v2234_v36 = vadd.f32 %v2233_v5, %v4977_v30  ;;  %v3116_v30 = vld [vmem:[%s5322_s0 + $0x338] sm:$0xf]  ;;  %v3185_v34 = vor.u32 %v3817_v15, %v3182_v16 }
 0x1f8   :  { %v3117_v12 = vor.u32 %v3809_v44, %v3116_v30 }
 0x1f9   :  { %v5190_v37 = vadd.f32 %v2378_v35, %v2330_v14  ;;  %v2283_v31 = vadd.f32 %v2282_v61, %v2234_v36 }
 0x1fe   :  { %v2331_v47 = vpop.f32.mrf.mxu2  ;;  %v2236_v58 = vpop.f32.mrf.mxu0 }
 0x1ff   :  { %v2380_v48 = vpop.f32.mrf.mxu3  ;;  %v2332_v3 = vadd.f32 %v2331_v47, %v2283_v31  ;;  %v2285_v50 = vpop.f32.mrf.mxu1  ;;  %v2237_v62 = vadd.f32 %v2236_v58, %v4980_v56  ;;  %v3172_v56 = vld [vmem:[%s5322_s0 + $0x3b0] sm:$0xf] }
 0x200   :  { %v3173_v22 = vor.u32 %v3824_v49, %v3172_v56 }
 0x201   :  { %v5217_v40 = vadd.f32 %v2380_v48, %v2332_v3  ;;  %v2286_v27 = vadd.f32 %v2285_v50, %v2237_v62  ;;  %2431 = vmatmul.bf16.gmra.mxu0 %v3109_v51 }
 0x202   :  { %2480 = vmatmul.bf16.gmra.mxu1 %v3113_v53 }
 0x203   :  { %2529 = vmatmul.bf16.gmra.mxu2 %v3117_v12 }
 0x204   :  { %2578 = vmatmul.bf16.gmra.mxu3 %v3121_v59 }
 0x206   :  { %v2334_v2 = vpop.f32.mrf.mxu2  ;;  %v2238_v43 = vpop.f32.mrf.mxu0 }
 0x207   :  { %v2383_v4 = vpop.f32.mrf.mxu3  ;;  %v2335_v55 = vadd.f32 %v2334_v2, %v2286_v27  ;;  %v2287_v7 = vpop.f32.mrf.mxu1  ;;  %v2239_v8 = vadd.f32 %v2238_v43, %v5007_v13  ;;  %v3180_v13 = vld [vmem:[%s5322_s0 + $0x3b8] sm:$0xf] }
 0x208   :  { %v3181_v52 = vor.u32 %v3825_v11, %v3180_v13 }
 0x209   :  { %v5220_v9 = vadd.f32 %v2383_v4, %v2335_v55  ;;  %v2288_v0 = vadd.f32 %v2287_v7, %v2239_v8 }
 0x20e   :  { %v2336_v20 = vpop.f32.mrf.mxu2  ;;  %v2241_v25 = vpop.f32.mrf.mxu0 }
 0x20f   :  { %v2385_v21 = vpop.f32.mrf.mxu3  ;;  %v2337_v39 = vadd.f32 %v2336_v20, %v2288_v0  ;;  %v2290_v29 = vpop.f32.mrf.mxu1  ;;  %v2242_v35 = vadd.f32 %v2241_v25, %v5010_v54 }
 0x211   :  { %v5247_v14 = vadd.f32 %v2385_v21, %v2337_v39  ;;  %v2291_v5 = vadd.f32 %v2290_v29, %v2242_v35  ;;  %2436 = vmatmul.bf16.gmra.mxu0 %v3173_v22 }
 0x212   :  { %2485 = vmatmul.bf16.gmra.mxu1 %v3177_v23 }
 0x213   :  { %2534 = vmatmul.bf16.gmra.mxu2 %v3181_v52 }
 0x214   :  { %2583 = vmatmul.bf16.gmra.mxu3 %v3185_v34 }
 0x216   :  { %v2339_v61 = vpop.f32.mrf.mxu2  ;;  %v2243_v18 = vpop.f32.mrf.mxu0 }
 0x217   :  { %v2388_v36 = vpop.f32.mrf.mxu3  ;;  %v2340_v31 = vadd.f32 %v2339_v61, %v2291_v5  ;;  %v2292_v38 = vpop.f32.mrf.mxu1  ;;  %v2244_v41 = vadd.f32 %v2243_v18, %v5037_v19 }
 0x219   :  { %v5250_v42 = vadd.f32 %v2388_v36, %v2340_v31  ;;  %v2293_v30 = vadd.f32 %v2292_v38, %v2244_v41 }
 0x21e   :  { %v2341_v44 = vpop.f32.mrf.mxu2  ;;  %v2402_v46 = vpop.f32.mrf.mxu0 }
 0x21f   :  { %v2390_v45 = vpop.f32.mrf.mxu3  ;;  %v2342_v54 = vadd.f32 %v2341_v44, %v2293_v30  ;;  %v2451_v47 = vpop.f32.mrf.mxu1  ;;  %v2403_v51 = vadd.f32 %v2402_v46, %v5040_v28 }
 0x221   :  { %v5252_v48 = vadd.f32 %v2390_v45, %v2342_v54  ;;  %v2452_v53 = vadd.f32 %v2451_v47, %v2403_v51 }
 0x226   :  { %v2500_v3 = vpop.f32.mrf.mxu2  ;;  %v2404_v12 = vpop.f32.mrf.mxu0 }
 0x227   :  { %v2549_v58 = vpop.f32.mrf.mxu3  ;;  %v2501_v50 = vadd.f32 %v2500_v3, %v2452_v53  ;;  %v2453_v59 = vpop.f32.mrf.mxu1  ;;  %v2405_v19 = vadd.f32 %v2404_v12, %v5067_v60 }
 0x229   :  { %v2550_v62 = vadd.f32 %v2549_v58, %v2501_v50  ;;  %v2454_v27 = vadd.f32 %v2453_v59, %v2405_v19 }
 0x22b   :  { %2650 = vst [vmem:[%s5323_s2] sm:$0xff] %v2550_v62  ;;  %v2610_v0 = vmul.f32 %v2550_v62, %v2550_v62 }
 0x22e   :  { %v2502_v2 = vpop.f32.mrf.mxu2  ;;  %v2407_v43 = vpop.f32.mrf.mxu0 }
 0x22f   :  { %v2551_v4 = vpop.f32.mrf.mxu3  ;;  %v2503_v55 = vadd.f32 %v2502_v2, %v2454_v27  ;;  %v2456_v7 = vpop.f32.mrf.mxu1  ;;  %v2408_v8 = vadd.f32 %v2407_v43, %v5070_v33 }
 0x231   :  { %v2552_v28 = vadd.f32 %v2551_v4, %v2503_v55  ;;  %v2457_v32 = vadd.f32 %v2456_v7, %v2408_v8 }
 0x233   :  { %v2589_v56 = vadd.f32 %v2552_v28, %v2550_v62  ;;  %v2611_v49 = vmul.f32 %v2552_v28, %v2552_v28  ;;  %2651 = vst [vmem:[%s5323_s2 + $0x8] sm:$0xff] %v2552_v28 }
 0x235   :  { %v2626_v60 = vadd.f32 %v2611_v49, %v2610_v0 }
 0x236   :  { %v2505_v10 = vpop.f32.mrf.mxu2  ;;  %v2409_v15 = vpop.f32.mrf.mxu0 }
 0x237   :  { %v2554_v13 = vpop.f32.mrf.mxu3  ;;  %v2506_v11 = vadd.f32 %v2505_v10, %v2457_v32  ;;  %v2458_v16 = vpop.f32.mrf.mxu1  ;;  %v2410_v21 = vadd.f32 %v2409_v15, %v5097_v57 }
 0x239   :  { %v2555_v20 = vadd.f32 %v2554_v13, %v2506_v11  ;;  %v2459_v39 = vadd.f32 %v2458_v16, %v2410_v21 }
 0x23b   :  { %v2590_v22 = vadd.f32 %v2589_v56, %v2555_v20  ;;  %v2612_v23 = vmul.f32 %v2555_v20, %v2555_v20  ;;  %2652 = vst [vmem:[%s5323_s2 + $0x10] sm:$0xff] %v2555_v20 }
 0x23d   :  { %v2627_v33 = vadd.f32 %v2626_v60, %v2612_v23 }
 0x23e   :  { %v2507_v25 = vpop.f32.mrf.mxu2  ;;  %v2412_v34 = vpop.f32.mrf.mxu0 }
 0x23f   :  { %v2556_v29 = vpop.f32.mrf.mxu3  ;;  %v2508_v52 = vadd.f32 %v2507_v25, %v2459_v39  ;;  %v2461_v35 = vpop.f32.mrf.mxu1  ;;  %v2413_v61 = vadd.f32 %v2412_v34, %v5100_v63 }
 0x241   :  { %v2557_v5 = vadd.f32 %v2556_v29, %v2508_v52  ;;  %v2462_v18 = vadd.f32 %v2461_v35, %v2413_v61 }
 0x243   :  { %v2591_v36 = vadd.f32 %v2590_v22, %v2557_v5  ;;  %v2613_v31 = vmul.f32 %v2557_v5, %v2557_v5  ;;  %2653 = vst [vmem:[%s5323_s2 + $0x18] sm:$0xff] %v2557_v5 }
 0x245   :  { %v2628_v57 = vadd.f32 %v2627_v33, %v2613_v31 }
 0x246   :  { %v2510_v38 = vpop.f32.mrf.mxu2  ;;  %v2414_v44 = vpop.f32.mrf.mxu0 }
 0x247   :  { %v2559_v41 = vpop.f32.mrf.mxu3  ;;  %v2511_v30 = vadd.f32 %v2510_v38, %v2462_v18  ;;  %v2463_v45 = vpop.f32.mrf.mxu1  ;;  %v2415_v46 = vadd.f32 %v2414_v44, %v5127_v24 }
 0x249   :  { %v2560_v54 = vadd.f32 %v2559_v41, %v2511_v30  ;;  %v2464_v53 = vadd.f32 %v2463_v45, %v2415_v46 }
 0x24b   :  { %v2592_v47 = vadd.f32 %v2591_v36, %v2560_v54  ;;  %v2614_v51 = vmul.f32 %v2560_v54, %v2560_v54  ;;  %2654 = vst [vmem:[%s5323_s2 + $0x20] sm:$0xff] %v2560_v54 }
 0x24d   :  { %v2629_v63 = vadd.f32 %v2628_v57, %v2614_v51 }
 0x24e   :  { %v2512_v3 = vpop.f32.mrf.mxu2  ;;  %v2417_v12 = vpop.f32.mrf.mxu0 }
 0x24f   :  { %v2561_v58 = vpop.f32.mrf.mxu3  ;;  %v2513_v50 = vadd.f32 %v2512_v3, %v2464_v53  ;;  %v2466_v59 = vpop.f32.mrf.mxu1  ;;  %v2418_v19 = vadd.f32 %v2417_v12, %v5130_v17 }
 0x251   :  { %v2562_v62 = vadd.f32 %v2561_v58, %v2513_v50  ;;  %v2467_v4 = vadd.f32 %v2466_v59, %v2418_v19 }
 0x253   :  { %v2593_v27 = vadd.f32 %v2592_v47, %v2562_v62  ;;  %v2615_v2 = vmul.f32 %v2562_v62, %v2562_v62  ;;  %2655 = vst [vmem:[%s5323_s2 + $0x28] sm:$0xff] %v2562_v62 }
 0x255   :  { %v2630_v24 = vadd.f32 %v2629_v63, %v2615_v2 }
 0x256   :  { %v2515_v55 = vpop.f32.mrf.mxu2  ;;  %v2419_v28 = vpop.f32.mrf.mxu0 }
 0x257   :  { %v2564_v43 = vpop.f32.mrf.mxu3  ;;  %v2516_v7 = vadd.f32 %v2515_v55, %v2467_v4  ;;  %v2468_v8 = vpop.f32.mrf.mxu1  ;;  %v2420_v56 = vadd.f32 %v2419_v28, %v5157_v26 }
 0x259   :  { %v2565_v0 = vadd.f32 %v2564_v43, %v2516_v7  ;;  %v2469_v32 = vadd.f32 %v2468_v8, %v2420_v56 }
 0x25b   :  { %v2594_v49 = vadd.f32 %v2593_v27, %v2565_v0  ;;  %v2616_v60 = vmul.f32 %v2565_v0, %v2565_v0  ;;  %2656 = vst [vmem:[%s5323_s2 + $0x30] sm:$0xff] %v2565_v0 }
 0x25d   :  { %v2631_v17 = vadd.f32 %v2630_v24, %v2616_v60 }
 0x25e   :  { %v2517_v10 = vpop.f32.mrf.mxu2  ;;  %v2422_v15 = vpop.f32.mrf.mxu0 }
 0x25f   :  { %v2566_v13 = vpop.f32.mrf.mxu3  ;;  %v2518_v11 = vadd.f32 %v2517_v10, %v2469_v32  ;;  %v2471_v16 = vpop.f32.mrf.mxu1  ;;  %v2423_v21 = vadd.f32 %v2422_v15, %v5160_v6 }
 0x261   :  { %v2567_v20 = vadd.f32 %v2566_v13, %v2518_v11  ;;  %v2472_v33 = vadd.f32 %v2471_v16, %v2423_v21 }
 0x263   :  { %v2595_v22 = vadd.f32 %v2594_v49, %v2567_v20  ;;  %v2617_v23 = vmul.f32 %v2567_v20, %v2567_v20  ;;  %2657 = vst [vmem:[%s5323_s2 + $0x38] sm:$0xff] %v2567_v20 }
 0x265   :  { %v2632_v26 = vadd.f32 %v2631_v17, %v2617_v23 }
 0x266   :  { %v2520_v39 = vpop.f32.mrf.mxu2  ;;  %v2424_v52 = vpop.f32.mrf.mxu0 }
 0x267   :  { %v2569_v25 = vpop.f32.mrf.mxu3  ;;  %v2521_v29 = vadd.f32 %v2520_v39, %v2472_v33  ;;  %v2473_v34 = vpop.f32.mrf.mxu1  ;;  %v2425_v5 = vadd.f32 %v2424_v52, %v5187_v1 }
 0x269   :  { %v2570_v35 = vadd.f32 %v2569_v25, %v2521_v29  ;;  %v2474_v31 = vadd.f32 %v2473_v34, %v2425_v5 }
 0x26b   :  { %v2596_v61 = vadd.f32 %v2595_v22, %v2570_v35  ;;  %v2618_v36 = vmul.f32 %v2570_v35, %v2570_v35  ;;  %2658 = vst [vmem:[%s5323_s2 + $0x40] sm:$0xff] %v2570_v35 }
 0x26d   :  { %v2633_v6 = vadd.f32 %v2632_v26, %v2618_v36 }
 0x26e   :  { %v2522_v57 = vpop.f32.mrf.mxu2  ;;  %v2427_v41 = vpop.f32.mrf.mxu0 }
 0x26f   :  { %v2571_v18 = vpop.f32.mrf.mxu3  ;;  %v2523_v38 = vadd.f32 %v2522_v57, %v2474_v31  ;;  %v2476_v30 = vpop.f32.mrf.mxu1  ;;  %v2428_v45 = vadd.f32 %v2427_v41, %v5190_v37 }
 0x271   :  { %v2572_v44 = vadd.f32 %v2571_v18, %v2523_v38  ;;  %v2477_v47 = vadd.f32 %v2476_v30, %v2428_v45 }
 0x273   :  { %v2597_v54 = vadd.f32 %v2596_v61, %v2572_v44  ;;  %v2619_v46 = vmul.f32 %v2572_v44, %v2572_v44  ;;  %2659 = vst [vmem:[%s5323_s2 + $0x48] sm:$0xff] %v2572_v44 }
 0x275   :  { %v2634_v1 = vadd.f32 %v2633_v6, %v2619_v46 }
 0x276   :  { %v2525_v51 = vpop.f32.mrf.mxu2  ;;  %v2429_v3 = vpop.f32.mrf.mxu0 }
 0x277   :  { %v2574_v63 = vpop.f32.mrf.mxu3  ;;  %v2526_v53 = vadd.f32 %v2525_v51, %v2477_v47  ;;  %v2478_v58 = vpop.f32.mrf.mxu1  ;;  %v2430_v12 = vadd.f32 %v2429_v3, %v5217_v40 }
 0x279   :  { %v2575_v50 = vadd.f32 %v2574_v63, %v2526_v53  ;;  %v2479_v19 = vadd.f32 %v2478_v58, %v2430_v12 }
 0x27b   :  { %v2598_v59 = vadd.f32 %v2597_v54, %v2575_v50  ;;  %v2620_v62 = vmul.f32 %v2575_v50, %v2575_v50  ;;  %2660 = vst [vmem:[%s5323_s2 + $0x50] sm:$0xff] %v2575_v50 }
 0x27d   :  { %v2635_v37 = vadd.f32 %v2634_v1, %v2620_v62 }
 0x27e   :  { %v2527_v27 = vpop.f32.mrf.mxu2  ;;  %v2432_v4 = vpop.f32.mrf.mxu0 }
 0x27f   :  { %v2576_v2 = vpop.f32.mrf.mxu3  ;;  %v2528_v24 = vadd.f32 %v2527_v27, %v2479_v19  ;;  %v2481_v55 = vpop.f32.mrf.mxu1  ;;  %v2433_v7 = vadd.f32 %v2432_v4, %v5220_v9 }
 0x281   :  { %v2577_v43 = vadd.f32 %v2576_v2, %v2528_v24  ;;  %v2482_v0 = vadd.f32 %v2481_v55, %v2433_v7 }
 0x283   :  { %v2599_v28 = vadd.f32 %v2598_v59, %v2577_v43  ;;  %v2621_v8 = vmul.f32 %v2577_v43, %v2577_v43  ;;  %2661 = vst [vmem:[%s5323_s2 + $0x58] sm:$0xff] %v2577_v43 }
 0x285   :  { %v2636_v40 = vadd.f32 %v2635_v37, %v2621_v8 }
 0x286   :  { %v2530_v56 = vpop.f32.mrf.mxu2  ;;  %v2434_v17 = vpop.f32.mrf.mxu0 }
 0x287   :  { %v2579_v49 = vpop.f32.mrf.mxu3  ;;  %v2531_v60 = vadd.f32 %v2530_v56, %v2482_v0  ;;  %v2483_v32 = vpop.f32.mrf.mxu1  ;;  %v2435_v13 = vadd.f32 %v2434_v17, %v5247_v14 }
 0x289   :  { %v2580_v10 = vadd.f32 %v2579_v49, %v2531_v60  ;;  %v2484_v16 = vadd.f32 %v2483_v32, %v2435_v13 }
 0x28b   :  { %v2600_v11 = vadd.f32 %v2599_v28, %v2580_v10  ;;  %v2622_v15 = vmul.f32 %v2580_v10, %v2580_v10  ;;  %2662 = vst [vmem:[%s5323_s2 + $0x60] sm:$0xff] %v2580_v10 }
 0x28d   :  { %v2637_v9 = vadd.f32 %v2636_v40, %v2622_v15 }
 0x28e   :  { %v2532_v20 = vpop.f32.mrf.mxu2  ;;  %v2437_v23 = vpop.f32.mrf.mxu0 }
 0x28f   :  { %v2581_v21 = vpop.f32.mrf.mxu3  ;;  %v2533_v22 = vadd.f32 %v2532_v20, %v2484_v16  ;;  %v2438_v33 = vadd.f32 %v2437_v23, %v5250_v42  ;;  %v2486_v39 = vpop.f32.mrf.mxu1 }
 0x291   :  { %v2582_v26 = vadd.f32 %v2581_v21, %v2533_v22  ;;  %v2487_v52 = vadd.f32 %v2486_v39, %v2438_v33 }
 0x293   :  { %v2601_v25 = vadd.f32 %v2600_v11, %v2582_v26  ;;  %v2623_v29 = vmul.f32 %v2582_v26, %v2582_v26  ;;  %2663 = vst [vmem:[%s5323_s2 + $0x68] sm:$0xff] %v2582_v26 }
 0x295   :  { %v2638_v14 = vadd.f32 %v2637_v9, %v2623_v29 }
 0x296   :  { %v2535_v34 = vpop.f32.mrf.mxu2  ;;  %v2439_v61 = vpop.f32.mrf.mxu0 }
 0x297   :  { %v2584_v35 = vpop.f32.mrf.mxu3  ;;  %v2536_v5 = vadd.f32 %v2535_v34, %v2487_v52  ;;  %v2440_v6 = vadd.f32 %v2439_v61, %v5252_v48  ;;  %v2488_v42 = vpop.f32.mrf.mxu1 }
 0x299   :  { %v2585_v36 = vadd.f32 %v2584_v35, %v2536_v5  ;;  %v2489_v38 = vadd.f32 %v2488_v42, %v2440_v6 }
 0x29b   :  { %v2602_v31 = vadd.f32 %v2601_v25, %v2585_v36  ;;  %v2624_v57 = vmul.f32 %v2585_v36, %v2585_v36  ;;  %2664 = vst [vmem:[%s5323_s2 + $0x70] sm:$0xff] %v2585_v36 }
 0x29d   :  { %v2639_v18 = vadd.f32 %v2638_v14, %v2624_v57 }
 0x29e   :  { %v2537_v41 = vpop.f32.mrf.mxu2 }
 0x29f   :  { %v2538_v30 = vadd.f32 %v2537_v41, %v2489_v38  ;;  %v2586_v44 = vpop.f32.mrf.mxu3 }
 0x2a1   :  { %v2587_v45 = vadd.f32 %v2586_v44, %v2538_v30 }
 0x2a3   :  { %v2603_v54 = vadd.f32 %v2602_v31, %v2587_v45  ;;  %v2625_v46 = vmul.f32 %v2587_v45, %v2587_v45  ;;  %2665 = vst [vmem:[%s5323_s2 + $0x78] sm:$0xff] %v2587_v45 }
 0x2a5   :  { %v2604_v48 = vrot.slane %v2603_v54, 4  ;;  %v2640_v1 = vadd.f32 %v2639_v18, %v2625_v46 }
 0x2a7   :  { %v2605_v47 = vadd.f32 %v2604_v48, %v2603_v54  ;;  %v2641_v51 = vrot.slane %v2640_v1, 4 }
 0x2a9   :  { %v2606_v63 = vrot.slane %v2605_v47, 2  ;;  %v2642_v53 = vadd.f32 %v2641_v51, %v2640_v1 }
 0x2ab   :  { %v2607_v3 = vadd.f32 %v2606_v63, %v2605_v47  ;;  %v2643_v58 = vrot.slane %v2642_v53, 2 }
 0x2ad   :  { %v2608_v50 = vrot.slane %v2607_v3, 1  ;;  %v2644_v12 = vadd.f32 %v2643_v58, %v2642_v53 }
 0x2af   :  { %v2645_v59 = vrot.slane %v2644_v12, 1  ;;  %v2609_v62 = vadd.f32 %v2608_v50, %v2607_v3 }
 0x2b1   :  { %v2646_v37 = vadd.f32 %v2645_v59, %v2644_v12 }
 0x2b3   :  { %v2648_v19 = vsel %vm2647_vm0, %v2609_v62, %v2646_v37 }
 0x2b4   :  { %2649 = vst [vmem:[%s5324_s3] sm:$0x3] %v2648_v19 }

// kernel: discriminator_forward.12
= control target key start
LH: loop header
LB: loop body
LE: loop exit
PB: predicated region body
PF: predicated region fallthrough
CT: control target
= control target key end

     0   :  { %s115_s0 = inlined_call_operand.vmem [shape: f32[32,128], index: 0, kind: input, shape index: {}]   ;;  %s116_s1 = inlined_call_operand.vmem [shape: f32[1,128], index: 1, kind: input, shape index: {}]   ;;  %s117_s2 = inlined_call_operand.vmem [shape: f32[1,128], index: 2, kind: input, shape index: {}]   ;;  %s118_s3 = inlined_call_operand.vmem [shape: bf16[32,128], index: 3, kind: output, shape index: {}]  }
   0x1   :  { %v14_v0 = vld [vmem:[%s115_s0] sm:$0xff]  ;;  %v15_v1 = vld [vmem:[%s115_s0 + $0x8] sm:$0xff]  ;;  %v16_v4 = vld [vmem:[%s115_s0 + $0x10] sm:$0xff] }
   0x2   :  { %v69_v2 = vld [vmem:[%s116_s1] ss:$0 sm:$0xff]  ;;  %v17_v5 = vld [vmem:[%s115_s0 + $0x18] sm:$0xff] }
   0x3   :  { %v70_v3 = vld [vmem:[%s117_s2] ss:$0 sm:$0xff]  ;;  %v22_v6 = vmul.f32 %v69_v2, %v14_v0  ;;  %v23_v7 = vmul.f32 %v69_v2, %v15_v1  ;;  %v24_v8 = vmul.f32 %v69_v2, %v16_v4  ;;  %v25_v9 = vmul.f32 %v69_v2, %v17_v5 }
   0x5   :  { %v30_v10 = vadd.f32 %v70_v3, %v22_v6  ;;  %v31_v11 = vadd.f32 %v70_v3, %v23_v7  ;;  %v32_v12 = vadd.f32 %v70_v3, %v24_v8  ;;  %v33_v13 = vadd.f32 %v70_v3, %v25_v9 }
   0x7   :  { %vm34_vm0 = vcmp.gt.f32.partialorder %v30_v10, 0.0  ;;  %vm35_vm1 = vcmp.gt.f32.partialorder %v31_v11, 0.0  ;;  %v38_v14 = vmul.f32 0.2, %v30_v10  ;;  %v39_v15 = vmul.f32 0.2, %v31_v11 }
   0x8   :  { %vm36_vm2 = vcmp.gt.f32.partialorder %v32_v12, 0.0  ;;  %vm37_vm3 = vcmp.gt.f32.partialorder %v33_v13, 0.0  ;;  %v40_v16 = vmul.f32 0.2, %v32_v12  ;;  %v41_v17 = vmul.f32 0.2, %v33_v13 }
   0x9   :  { %v42_v18 = vsel %vm34_vm0, %v30_v10, %v38_v14  ;;  %v43_v19 = vsel %vm35_vm1, %v31_v11, %v39_v15 }
   0xa   :  { %v61_v20 = vpack.c.bf16 %v43_v19, %v42_v18  ;;  %v44_v21 = vsel %vm36_vm2, %v32_v12, %v40_v16  ;;  %v45_v22 = vsel %vm37_vm3, %v33_v13, %v41_v17 }
   0xb   :  { %v66_v23 = vpack.c.bf16 %v45_v22, %v44_v21 }
   0xc   :  { %62 = vst [vmem:[%s118_s3] sm:$0xff] %v61_v20  }
   0xd   :  { %68 = vst [vmem:[%s118_s3 + $0x8] sm:$0xff] %v66_v23  }

// kernel: discriminator_forward.11
= control target key start
LH: loop header
LB: loop body
LE: loop exit
PB: predicated region body
PF: predicated region fallthrough
CT: control target
= control target key end

     0   :  { %vm1555_vm0 = vcmask 1040384   ;;  %s2981_s1 = inlined_call_operand.vmem [shape: bf16[2048,128], index: 1, kind: input, shape index: {}]   ;;  %s2982_s0 = inlined_call_operand.vmem [shape: bf16[32,2048], index: 0, kind: input, shape index: {}]   ;;  %s2983_s2 = inlined_call_operand.vmem [shape: f32[32,128], index: 2, kind: output, shape index: {0}]   ;;  %s2984_s3 = inlined_call_operand.vmem [shape: f32[1,2,128], index: 3, kind: output, shape index: {1}]  }
   0x1   :  { %v2249_v0 = vld [vmem:[%s2981_s1 + $0x38] sm:$0xff]  ;;  %v2248_v4 = vld [vmem:[%s2981_s1 + $0x30] sm:$0xff]  ;;  %v2247_v8 = vld [vmem:[%s2981_s1 + $0x28] sm:$0xff] }
   0x2   :  { %v2257_v1 = vld [vmem:[%s2981_s1 + $0x78] sm:$0xff]  ;;  %1229 = vmatpush.bf16.msra.mxu0 %v2249_v0  ;;  %v2256_v5 = vld [vmem:[%s2981_s1 + $0x70] sm:$0xff]  ;;  %v2255_v9 = vld [vmem:[%s2981_s1 + $0x68] sm:$0xff] }
   0x3   :  { %v2265_v2 = vld [vmem:[%s2981_s1 + $0xb8] sm:$0xff]  ;;  %1248 = vmatpush.bf16.msra.mxu1 %v2257_v1  ;;  %v2264_v6 = vld [vmem:[%s2981_s1 + $0xb0] sm:$0xff]  ;;  %v2263_v10 = vld [vmem:[%s2981_s1 + $0xa8] sm:$0xff] }
   0x4   :  { %v2273_v3 = vld [vmem:[%s2981_s1 + $0xf8] sm:$0xff]  ;;  %1267 = vmatpush.bf16.msra.mxu2 %v2265_v2  ;;  %v2272_v7 = vld [vmem:[%s2981_s1 + $0xf0] sm:$0xff]  ;;  %v2271_v11 = vld [vmem:[%s2981_s1 + $0xe8] sm:$0xff] }
   0x5   :  { %1286 = vmatpush.bf16.msra.mxu3 %v2273_v3  ;;  %v2246_v12 = vld [vmem:[%s2981_s1 + $0x20] sm:$0xff]  ;;  %v2245_v16 = vld [vmem:[%s2981_s1 + $0x18] sm:$0xff]  ;;  %v2244_v20 = vld [vmem:[%s2981_s1 + $0x10] sm:$0xff] }
   0x6   :  { %1230 = vmatpush.bf16.msra.mxu0 %v2248_v4  ;;  %v2254_v13 = vld [vmem:[%s2981_s1 + $0x60] sm:$0xff]  ;;  %v2253_v17 = vld [vmem:[%s2981_s1 + $0x58] sm:$0xff]  ;;  %v2252_v21 = vld [vmem:[%s2981_s1 + $0x50] sm:$0xff] }
   0x7   :  { %1249 = vmatpush.bf16.msra.mxu1 %v2256_v5  ;;  %v2262_v14 = vld [vmem:[%s2981_s1 + $0xa0] sm:$0xff]  ;;  %v2261_v18 = vld [vmem:[%s2981_s1 + $0x98] sm:$0xff]  ;;  %v2260_v22 = vld [vmem:[%s2981_s1 + $0x90] sm:$0xff] }
   0x8   :  { %1268 = vmatpush.bf16.msra.mxu2 %v2264_v6  ;;  %v2270_v15 = vld [vmem:[%s2981_s1 + $0xe0] sm:$0xff]  ;;  %v2269_v19 = vld [vmem:[%s2981_s1 + $0xd8] sm:$0xff]  ;;  %v2268_v23 = vld [vmem:[%s2981_s1 + $0xd0] sm:$0xff] }
   0x9   :  { %1287 = vmatpush.bf16.msra.mxu3 %v2272_v7  ;;  %v2243_v24 = vld [vmem:[%s2981_s1 + $0x8] sm:$0xff]  ;;  %v2242_v28 = vld [vmem:[%s2981_s1] sm:$0xff]  ;;  %v2297_v40 = vld [vmem:[%s2981_s1 + $0x1b8] sm:$0xff] }
   0xa   :  { %1231 = vmatpush.bf16.msra.mxu0 %v2247_v8  ;;  %v2251_v25 = vld [vmem:[%s2981_s1 + $0x48] sm:$0xff]  ;;  %v2250_v29 = vld [vmem:[%s2981_s1 + $0x40] sm:$0xff]  ;;  %v2281_v41 = vld [vmem:[%s2981_s1 + $0x138] sm:$0xff] }
   0xb   :  { %1250 = vmatpush.bf16.msra.mxu1 %v2255_v9  ;;  %v2259_v26 = vld [vmem:[%s2981_s1 + $0x88] sm:$0xff]  ;;  %v2258_v30 = vld [vmem:[%s2981_s1 + $0x80] sm:$0xff]  ;;  %v2289_v46 = vld [vmem:[%s2981_s1 + $0x178] sm:$0xff] }
   0xc   :  { %1269 = vmatpush.bf16.msra.mxu2 %v2263_v10  ;;  %v2267_v27 = vld [vmem:[%s2981_s1 + $0xc8] sm:$0xff]  ;;  %v2266_v31 = vld [vmem:[%s2981_s1 + $0xc0] sm:$0xff]  ;;  %v2305_v47 = vld [vmem:[%s2981_s1 + $0x1f8] sm:$0xff] }
   0xd   :  { %1288 = vmatpush.bf16.msra.mxu3 %v2271_v11  ;;  %v1572_v32 = vld [vmem:[%s2982_s0] sm:$0xf]  ;;  %v2210_v34 = vld [vmem:[%s2982_s0 + $0x4] sm:$0xf]  ;;  %v1580_v36 = vld [vmem:[%s2982_s0 + $0x8] sm:$0xf] }
   0xe   :  { %1232 = vmatpush.bf16.msra.mxu0 %v2246_v12  ;;  %v2218_v33 = vld [vmem:[%s2982_s0 + $0x3c] sm:$0xf0]  ;;  %v1574_v35 = vld [vmem:[%s2982_s0 + $0x40] sm:$0xf0]  ;;  %v2219_v37 = vld [vmem:[%s2982_s0 + $0x44] sm:$0xf0] }
   0xf   :  { %1251 = vmatpush.bf16.msra.mxu1 %v2254_v13  ;;  %v2211_v38 = vld [vmem:[%s2982_s0 + $0xc] sm:$0xf]  ;;  %v1573_v42 = vor.u32 %v2218_v33, %v1572_v32  ;;  %v1577_v43 = vor.u32 %v2210_v34, %v1574_v35  ;;  %v1581_v44 = vor.u32 %v2219_v37, %v1580_v36  ;;  %v2296_v48 = vld [vmem:[%s2981_s1 + $0x1b0] sm:$0xff]  ;;  %v2294_v56 = vld [vmem:[%s2981_s1 + $0x1a0] sm:$0xff] }
  0x10   :  { %1270 = vmatpush.bf16.msra.mxu2 %v2262_v14  ;;  %v1582_v39 = vld [vmem:[%s2982_s0 + $0x48] sm:$0xf0]  ;;  %v2280_v49 = vld [vmem:[%s2981_s1 + $0x130] sm:$0xff]  ;;  %v2278_v57 = vld [vmem:[%s2981_s1 + $0x120] sm:$0xff] }
  0x11   :  { %1289 = vmatpush.bf16.msra.mxu3 %v2270_v15  ;;  %v1585_v45 = vor.u32 %v2211_v38, %v1582_v39  ;;  %v2288_v50 = vld [vmem:[%s2981_s1 + $0x170] sm:$0xff]  ;;  %v2295_v52 = vld [vmem:[%s2981_s1 + $0x1a8] sm:$0xff]  ;;  %v2286_v58 = vld [vmem:[%s2981_s1 + $0x160] sm:$0xff] }
  0x12   :  { %1233 = vmatpush.bf16.msra.mxu0 %v2245_v16  ;;  %v2304_v51 = vld [vmem:[%s2981_s1 + $0x1f0] sm:$0xff]  ;;  %v2279_v53 = vld [vmem:[%s2981_s1 + $0x128] sm:$0xff]  ;;  %v2302_v59 = vld [vmem:[%s2981_s1 + $0x1e0] sm:$0xff] }
  0x13   :  { %1252 = vmatpush.bf16.msra.mxu1 %v2253_v17  ;;  %v2287_v54 = vld [vmem:[%s2981_s1 + $0x168] sm:$0xff]  ;;  %v1636_v60 = vld [vmem:[%s2982_s0 + $0x80] sm:$0xf]  ;;  %v2226_v62 = vld [vmem:[%s2982_s0 + $0x84] sm:$0xf] }
  0x14   :  { %1271 = vmatpush.bf16.msra.mxu2 %v2261_v18  ;;  %v2303_v55 = vld [vmem:[%s2981_s1 + $0x1e8] sm:$0xff]  ;;  %v2234_v61 = vld [vmem:[%s2982_s0 + $0xbc] sm:$0xf0]  ;;  %v1638_v63 = vld [vmem:[%s2982_s0 + $0xc0] sm:$0xf0] }
  0x15   :  { %1290 = vmatpush.bf16.msra.mxu3 %v2269_v19  ;;  %v1644_v0 = vld [vmem:[%s2982_s0 + $0x88] sm:$0xf]  ;;  %v2227_v2 = vld [vmem:[%s2982_s0 + $0x8c] sm:$0xf]  ;;  %v2293_v4 = vld [vmem:[%s2981_s1 + $0x198] sm:$0xff]  ;;  %v1637_v6 = vor.u32 %v2234_v61, %v1636_v60  ;;  %v1641_v7 = vor.u32 %v2226_v62, %v1638_v63 }
  0x16   :  { %1234 = vmatpush.bf16.msra.mxu0 %v2244_v20  ;;  %v2235_v1 = vld [vmem:[%s2982_s0 + $0xc4] sm:$0xf0]  ;;  %v1646_v3 = vld [vmem:[%s2982_s0 + $0xc8] sm:$0xf0]  ;;  %v2277_v5 = vld [vmem:[%s2981_s1 + $0x118] sm:$0xff] }
  0x17   :  { %1253 = vmatpush.bf16.msra.mxu1 %v2252_v21  ;;  %v1645_v8 = vor.u32 %v2235_v1, %v1644_v0  ;;  %v1649_v9 = vor.u32 %v2227_v2, %v1646_v3  ;;  %v2285_v10 = vld [vmem:[%s2981_s1 + $0x158] sm:$0xff]  ;;  %v2292_v12 = vld [vmem:[%s2981_s1 + $0x190] sm:$0xff]  ;;  %v2291_v16 = vld [vmem:[%s2981_s1 + $0x188] sm:$0xff] }
  0x18   :  { %1272 = vmatpush.bf16.msra.mxu2 %v2260_v22  ;;  %v2301_v11 = vld [vmem:[%s2981_s1 + $0x1d8] sm:$0xff]  ;;  %v2276_v13 = vld [vmem:[%s2981_s1 + $0x110] sm:$0xff]  ;;  %v2275_v17 = vld [vmem:[%s2981_s1 + $0x108] sm:$0xff] }
  0x19   :  { %1291 = vmatpush.bf16.msra.mxu3 %v2268_v23  ;;  %v2284_v14 = vld [vmem:[%s2981_s1 + $0x150] sm:$0xff]  ;;  %v2283_v18 = vld [vmem:[%s2981_s1 + $0x148] sm:$0xff]  ;;  %v2290_v20 = vld [vmem:[%s2981_s1 + $0x180] sm:$0xff] }
  0x1a   :  { %1235 = vmatpush.bf16.msra.mxu0 %v2243_v24  ;;  %v2300_v15 = vld [vmem:[%s2981_s1 + $0x1d0] sm:$0xff]  ;;  %v2299_v19 = vld [vmem:[%s2981_s1 + $0x1c8] sm:$0xff]  ;;  %v2274_v21 = vld [vmem:[%s2981_s1 + $0x100] sm:$0xff] }
  0x1b   :  { %1254 = vmatpush.bf16.msra.mxu1 %v2251_v25  ;;  %v2282_v22 = vld [vmem:[%s2981_s1 + $0x140] sm:$0xff]  ;;  %v1588_v24 = vld [vmem:[%s2982_s0 + $0x10] sm:$0xf]  ;;  %v2329_v25 = vld [vmem:[%s2981_s1 + $0x2b8] sm:$0xff] }
  0x1c   :  { %1273 = vmatpush.bf16.msra.mxu2 %v2259_v26  ;;  %v2298_v23 = vld [vmem:[%s2981_s1 + $0x1c0] sm:$0xff]  ;;  %v2313_v26 = vld [vmem:[%s2981_s1 + $0x238] sm:$0xff]  ;;  %v2328_v37 = vld [vmem:[%s2981_s1 + $0x2b0] sm:$0xff] }
  0x1d   :  { %1292 = vmatpush.bf16.msra.mxu3 %v2267_v27  ;;  %v2220_v27 = vld [vmem:[%s2982_s0 + $0x4c] sm:$0xf0]  ;;  %v2213_v32 = vld [vmem:[%s2982_s0 + $0x1c] sm:$0xf] }
  0x1e   :  { %1236 = vmatpush.bf16.msra.mxu0 %v2242_v28  ;;  %v2212_v28 = vld [vmem:[%s2982_s0 + $0x14] sm:$0xf]  ;;  %v1598_v33 = vld [vmem:[%s2982_s0 + $0x58] sm:$0xf0]  ;;  %v1589_v36 = vor.u32 %v2220_v27, %v1588_v24  ;;  %v1606_v24 = vld [vmem:[%s2982_s0 + $0x60] sm:$0xf0] }
  0x1f   :  { %1255 = vmatpush.bf16.msra.mxu1 %v2250_v29  ;;  %v1590_v29 = vld [vmem:[%s2982_s0 + $0x50] sm:$0xf0]  ;;  %v2321_v34 = vld [vmem:[%s2981_s1 + $0x278] sm:$0xff]  ;;  %v2215_v27 = vld [vmem:[%s2982_s0 + $0x2c] sm:$0xf] }
  0x20   :  { %1274 = vmatpush.bf16.msra.mxu2 %v2258_v30  ;;  %v1596_v30 = vld [vmem:[%s2982_s0 + $0x18] sm:$0xf]  ;;  %v1593_v38 = vor.u32 %v2212_v28, %v1590_v29  ;;  %v1662_v61 = vld [vmem:[%s2982_s0 + $0xd8] sm:$0xf0]  ;;  %v2324_v1 = vld [vmem:[%s2981_s1 + $0x290] sm:$0xff] }
  0x21   :  { %1293 = vmatpush.bf16.msra.mxu3 %v2266_v31  ;;  %1237 = vmatmul.bf16.vlgmr.msra.gmra.mxu0 %v1573_v42  ;;  %v2221_v31 = vld [vmem:[%s2982_s0 + $0x54] sm:$0xf0]  ;;  %v2320_v42 = vld [vmem:[%s2981_s1 + $0x270] sm:$0xff]  ;;  %v1614_v28 = vld [vmem:[%s2982_s0 + $0x68] sm:$0xf0] }
  0x22   :  { %1305 = vmatpush.bf16.msrb.mxu0 %v2281_v41  ;;  %1256 = vmatmul.bf16.vlgmr.msra.gmra.mxu1 %v1577_v43  ;;  %v2337_v35 = vld [vmem:[%s2981_s1 + $0x2f8] sm:$0xff]  ;;  %v1597_v39 = vor.u32 %v2221_v31, %v1596_v30  ;;  %v2312_v41 = vld [vmem:[%s2981_s1 + $0x230] sm:$0xff] }
  0x23   :  { %1275 = vmatmul.bf16.vlgmr.msra.gmra.mxu2 %v1581_v44  ;;  %1324 = vmatpush.bf16.msrb.mxu1 %v2289_v46  ;;  %v2336_v43 = vld [vmem:[%s2981_s1 + $0x2f0] sm:$0xff]  ;;  %v2327_v44 = vld [vmem:[%s2981_s1 + $0x2a8] sm:$0xff]  ;;  %v2309_v60 = vld [vmem:[%s2981_s1 + $0x218] sm:$0xff] }
  0x24   :  { %1343 = vmatpush.bf16.msrb.mxu2 %v2297_v40  ;;  %1294 = vmatmul.bf16.vlgmr.msra.gmra.mxu3 %v1585_v45  ;;  %v1601_v40 = vor.u32 %v2213_v32, %v1598_v33  ;;  %v2311_v45 = vld [vmem:[%s2981_s1 + $0x228] sm:$0xff]  ;;  %v2317_v62 = vld [vmem:[%s2981_s1 + $0x258] sm:$0xff]  ;;  %v2352_v30 = vld [vmem:[%s2981_s1 + $0x370] sm:$0xff]  ;;  %v1617_v33 = vor.u32 %v2215_v27, %v1614_v28 }
  0x25   :  { %1362 = vmatpush.bf16.msrb.mxu3 %v2305_v47  ;;  %v2319_v46 = vld [vmem:[%s2981_s1 + $0x268] sm:$0xff]  ;;  %v2333_v63 = vld [vmem:[%s2981_s1 + $0x2d8] sm:$0xff] }
  0x26   :  { %1306 = vmatpush.bf16.msrb.mxu0 %v2280_v49  ;;  %v2335_v47 = vld [vmem:[%s2981_s1 + $0x2e8] sm:$0xff]  ;;  %v2310_v49 = vld [vmem:[%s2981_s1 + $0x220] sm:$0xff]  ;;  %v1694_v27 = vld [vmem:[%s2982_s0 + $0xf8] sm:$0xf0] }
  0x27   :  { %1325 = vmatpush.bf16.msrb.mxu1 %v2288_v50  ;;  %v2318_v50 = vld [vmem:[%s2981_s1 + $0x260] sm:$0xff] }
  0x28   :  { %1344 = vmatpush.bf16.msrb.mxu2 %v2296_v48  ;;  %v2326_v48 = vld [vmem:[%s2981_s1 + $0x2a0] sm:$0xff] }
  0x29   :  { %1363 = vmatpush.bf16.msrb.mxu3 %v2304_v51  ;;  %v2334_v51 = vld [vmem:[%s2981_s1 + $0x2e0] sm:$0xff] }
  0x2a   :  { %1307 = vmatpush.bf16.msrb.mxu0 %v2279_v53  ;;  %v2236_v53 = vld [vmem:[%s2982_s0 + $0xcc] sm:$0xf0] }
  0x2b   :  { %1326 = vmatpush.bf16.msrb.mxu1 %v2287_v54  ;;  %v2325_v54 = vld [vmem:[%s2981_s1 + $0x298] sm:$0xff] }
  0x2c   :  { %1345 = vmatpush.bf16.msrb.mxu2 %v2295_v52  ;;  %v1652_v52 = vld [vmem:[%s2982_s0 + $0x90] sm:$0xf] }
  0x2d   :  { %1364 = vmatpush.bf16.msrb.mxu3 %v2303_v55  ;;  %v2228_v55 = vld [vmem:[%s2982_s0 + $0x94] sm:$0xf]  ;;  %v1653_v0 = vor.u32 %v2236_v53, %v1652_v52  ;;  %v2231_v52 = vld [vmem:[%s2982_s0 + $0xac] sm:$0xf]  ;;  %v2341_v53 = vld [vmem:[%s2981_s1 + $0x318] sm:$0xff] }
  0x2e   :  { %1308 = vmatpush.bf16.msrb.mxu0 %v2278_v57  ;;  %v1660_v57 = vld [vmem:[%s2982_s0 + $0x98] sm:$0xf] }
  0x2f   :  { %1327 = vmatpush.bf16.msrb.mxu1 %v2286_v58  ;;  %v2237_v58 = vld [vmem:[%s2982_s0 + $0xd4] sm:$0xf0] }
  0x30   :  { %1346 = vmatpush.bf16.msrb.mxu2 %v2294_v56  ;;  %v1654_v56 = vld [vmem:[%s2982_s0 + $0xd0] sm:$0xf0]  ;;  %v1661_v3 = vor.u32 %v2237_v58, %v1660_v57 }
  0x31   :  { %1365 = vmatpush.bf16.msrb.mxu3 %v2302_v59  ;;  %1242 = vmatmul.bf16.gmra.mxu0 %v1637_v6  ;;  %v2229_v59 = vld [vmem:[%s2982_s0 + $0x9c] sm:$0xf]  ;;  %v1657_v2 = vor.u32 %v2228_v55, %v1654_v56  ;;  %v2316_v6 = vld [vmem:[%s2981_s1 + $0x250] sm:$0xff] }
  0x32   :  { %1309 = vmatpush.bf16.msrb.mxu0 %v2277_v5  ;;  %1261 = vmatmul.bf16.gmra.mxu1 %v1641_v7  ;;  %v2308_v5 = vld [vmem:[%s2981_s1 + $0x210] sm:$0xff]  ;;  %v2365_v55 = vld [vmem:[%s2981_s1 + $0x3d8] sm:$0xff] }
  0x33   :  { %1280 = vmatmul.bf16.gmra.mxu2 %v1645_v8  ;;  %1328 = vmatpush.bf16.msrb.mxu1 %v2285_v10  ;;  %v2332_v7 = vld [vmem:[%s2981_s1 + $0x2d0] sm:$0xff]  ;;  %v2323_v8 = vld [vmem:[%s2981_s1 + $0x288] sm:$0xff] }
  0x34   :  { %1347 = vmatpush.bf16.msrb.mxu2 %v2293_v4  ;;  %1299 = vmatmul.bf16.gmra.mxu3 %v1649_v9  ;;  %v1665_v4 = vor.u32 %v2229_v59, %v1662_v61  ;;  %v2307_v9 = vld [vmem:[%s2981_s1 + $0x208] sm:$0xff]  ;;  %v2356_v56 = vld [vmem:[%s2981_s1 + $0x390] sm:$0xff] }
  0x35   :  { %1366 = vmatpush.bf16.msrb.mxu3 %v2301_v11  ;;  %v2315_v10 = vld [vmem:[%s2981_s1 + $0x248] sm:$0xff]  ;;  %v2348_v58 = vld [vmem:[%s2981_s1 + $0x350] sm:$0xff] }
  0x36   :  { %1310 = vmatpush.bf16.msrb.mxu0 %v2276_v13  ;;  %v2331_v11 = vld [vmem:[%s2981_s1 + $0x2c8] sm:$0xff]  ;;  %v2361_v13 = vld [vmem:[%s2981_s1 + $0x3b8] sm:$0xff] }
  0x37   :  { %1329 = vmatpush.bf16.msrb.mxu1 %v2284_v14  ;;  %v2306_v14 = vld [vmem:[%s2981_s1 + $0x200] sm:$0xff] }
  0x38   :  { %1348 = vmatpush.bf16.msrb.mxu2 %v2292_v12  ;;  %v2322_v12 = vld [vmem:[%s2981_s1 + $0x280] sm:$0xff] }
  0x39   :  { %1367 = vmatpush.bf16.msrb.mxu3 %v2300_v15  ;;  %v2314_v15 = vld [vmem:[%s2981_s1 + $0x240] sm:$0xff] }
  0x3a   :  { %1311 = vmatpush.bf16.msrb.mxu0 %v2275_v17  ;;  %v1604_v17 = vld [vmem:[%s2982_s0 + $0x20] sm:$0xf] }
  0x3b   :  { %1330 = vmatpush.bf16.msrb.mxu1 %v2283_v18  ;;  %v2222_v18 = vld [vmem:[%s2982_s0 + $0x5c] sm:$0xf0] }
  0x3c   :  { %1349 = vmatpush.bf16.msrb.mxu2 %v2291_v16  ;;  %v2330_v16 = vld [vmem:[%s2981_s1 + $0x2c0] sm:$0xff]  ;;  %v1605_v29 = vor.u32 %v2222_v18, %v1604_v17 }
  0x3d   :  { %1368 = vmatpush.bf16.msrb.mxu3 %v2299_v19  ;;  %v2345_v19 = vld [vmem:[%s2981_s1 + $0x338] sm:$0xff] }
  0x3e   :  { %1312 = vmatpush.bf16.msrb.mxu0 %v2274_v21  ;;  %v2214_v21 = vld [vmem:[%s2982_s0 + $0x24] sm:$0xf] }
  0x3f   :  { %1331 = vmatpush.bf16.msrb.mxu1 %v2282_v22  ;;  %v2369_v22 = vld [vmem:[%s2981_s1 + $0x3f8] sm:$0xff]  ;;  %v1609_v31 = vor.u32 %v2214_v21, %v1606_v24  ;;  %v2240_v21 = vld [vmem:[%s2982_s0 + $0xec] sm:$0xf0] }
  0x40   :  { %1350 = vmatpush.bf16.msrb.mxu2 %v2290_v20  ;;  %v2353_v20 = vld [vmem:[%s2981_s1 + $0x378] sm:$0xff] }
  0x41   :  { %1369 = vmatpush.bf16.msrb.mxu3 %v2298_v23  ;;  %1313 = vmatmul.bf16.vlgmr.msrb.gmra.mxu0 %v1589_v36  ;;  %v2360_v23 = vld [vmem:[%s2981_s1 + $0x3b0] sm:$0xff]  ;;  %v2359_v36 = vld [vmem:[%s2981_s1 + $0x3a8] sm:$0xff]  ;;  %v1692_v24 = vld [vmem:[%s2982_s0 + $0xb8] sm:$0xf] }
  0x42   :  { %1381 = vmatpush.bf16.msra.mxu0 %v2313_v26  ;;  %1332 = vmatmul.bf16.vlgmr.msrb.gmra.mxu1 %v1593_v38  ;;  %v2223_v26 = vld [vmem:[%s2982_s0 + $0x64] sm:$0xf0] }
  0x43   :  { %1400 = vmatpush.bf16.msra.mxu1 %v2321_v34  ;;  %1351 = vmatmul.bf16.vlgmr.msrb.gmra.mxu2 %v1597_v39  ;;  %v2344_v34 = vld [vmem:[%s2981_s1 + $0x330] sm:$0xff]  ;;  %v2343_v38 = vld [vmem:[%s2981_s1 + $0x328] sm:$0xff] }
  0x44   :  { %1419 = vmatpush.bf16.msra.mxu2 %v2329_v25  ;;  %1370 = vmatmul.bf16.vlgmr.msrb.gmra.mxu3 %v1601_v40  ;;  %v1612_v25 = vld [vmem:[%s2982_s0 + $0x28] sm:$0xf]  ;;  %v2358_v40 = vld [vmem:[%s2981_s1 + $0x3a0] sm:$0xff] }
  0x45   :  { %1438 = vmatpush.bf16.msra.mxu3 %v2337_v35  ;;  %v1613_v32 = vor.u32 %v2223_v26, %v1612_v25  ;;  %v2368_v35 = vld [vmem:[%s2981_s1 + $0x3f0] sm:$0xff]  ;;  %v2367_v39 = vld [vmem:[%s2981_s1 + $0x3e8] sm:$0xff]  ;;  %v2241_v25 = vld [vmem:[%s2982_s0 + $0xf4] sm:$0xf0] }
  0x46   :  { %1382 = vmatpush.bf16.msra.mxu0 %v2312_v41  ;;  %v2350_v41 = vld [vmem:[%s2981_s1 + $0x360] sm:$0xff]  ;;  %v2233_v26 = vld [vmem:[%s2982_s0 + $0xbc] sm:$0xf] }
  0x47   :  { %1401 = vmatpush.bf16.msra.mxu1 %v2320_v42  ;;  %v2342_v42 = vld [vmem:[%s2981_s1 + $0x320] sm:$0xff] }
  0x48   :  { %1420 = vmatpush.bf16.msra.mxu2 %v2328_v37  ;;  %v2351_v37 = vld [vmem:[%s2981_s1 + $0x368] sm:$0xff] }
  0x49   :  { %1439 = vmatpush.bf16.msra.mxu3 %v2336_v43  ;;  %v2366_v43 = vld [vmem:[%s2981_s1 + $0x3e0] sm:$0xff] }
  0x4a   :  { %1383 = vmatpush.bf16.msra.mxu0 %v2311_v45  ;;  %v1668_v45 = vld [vmem:[%s2982_s0 + $0xa0] sm:$0xf] }
  0x4b   :  { %1402 = vmatpush.bf16.msra.mxu1 %v2319_v46  ;;  %v2238_v46 = vld [vmem:[%s2982_s0 + $0xdc] sm:$0xf0] }
  0x4c   :  { %1421 = vmatpush.bf16.msra.mxu2 %v2327_v44  ;;  %v2357_v44 = vld [vmem:[%s2981_s1 + $0x398] sm:$0xff]  ;;  %v1669_v57 = vor.u32 %v2238_v46, %v1668_v45 }
  0x4d   :  { %1440 = vmatpush.bf16.msra.mxu3 %v2335_v47  ;;  %v2349_v47 = vld [vmem:[%s2981_s1 + $0x358] sm:$0xff] }
  0x4e   :  { %1384 = vmatpush.bf16.msra.mxu0 %v2310_v49  ;;  %v1670_v49 = vld [vmem:[%s2982_s0 + $0xe0] sm:$0xf0] }
  0x4f   :  { %1403 = vmatpush.bf16.msra.mxu1 %v2318_v50  ;;  %v1676_v50 = vld [vmem:[%s2982_s0 + $0xa8] sm:$0xf] }
  0x50   :  { %1422 = vmatpush.bf16.msra.mxu2 %v2326_v48  ;;  %v2230_v48 = vld [vmem:[%s2982_s0 + $0xa4] sm:$0xf] }
  0x51   :  { %1441 = vmatpush.bf16.msra.mxu3 %v2334_v51  ;;  %1318 = vmatmul.bf16.gmra.mxu0 %v1653_v0  ;;  %v2239_v51 = vld [vmem:[%s2982_s0 + $0xe4] sm:$0xf0]  ;;  %v1673_v59 = vor.u32 %v2230_v48, %v1670_v49 }
  0x52   :  { %1385 = vmatpush.bf16.msra.mxu0 %v2309_v60  ;;  %1337 = vmatmul.bf16.gmra.mxu1 %v1657_v2  ;;  %v1677_v60 = vor.u32 %v2239_v51, %v1676_v50  ;;  %v2355_v0 = vld [vmem:[%s2981_s1 + $0x388] sm:$0xff] }
  0x53   :  { %1404 = vmatpush.bf16.msra.mxu1 %v2317_v62  ;;  %1356 = vmatmul.bf16.gmra.mxu2 %v1661_v3  ;;  %v2340_v62 = vld [vmem:[%s2981_s1 + $0x310] sm:$0xff]  ;;  %v2339_v2 = vld [vmem:[%s2981_s1 + $0x308] sm:$0xff] }
  0x54   :  { %1423 = vmatpush.bf16.msra.mxu2 %v2325_v54  ;;  %1375 = vmatmul.bf16.gmra.mxu3 %v1665_v4  ;;  %v1678_v54 = vld [vmem:[%s2982_s0 + $0xe8] sm:$0xf0]  ;;  %v2354_v4 = vld [vmem:[%s2981_s1 + $0x380] sm:$0xff] }
  0x55   :  { %1442 = vmatpush.bf16.msra.mxu3 %v2333_v63  ;;  %v1681_v61 = vor.u32 %v2231_v52, %v1678_v54  ;;  %v2364_v63 = vld [vmem:[%s2981_s1 + $0x3d0] sm:$0xff]  ;;  %v2363_v3 = vld [vmem:[%s2981_s1 + $0x3c8] sm:$0xff] }
  0x56   :  { %1386 = vmatpush.bf16.msra.mxu0 %v2308_v5  ;;  %v2346_v5 = vld [vmem:[%s2981_s1 + $0x340] sm:$0xff] }
  0x57   :  { %1405 = vmatpush.bf16.msra.mxu1 %v2316_v6  ;;  %v2338_v6 = vld [vmem:[%s2981_s1 + $0x300] sm:$0xff] }
  0x58   :  { %1424 = vmatpush.bf16.msra.mxu2 %v2324_v1  ;;  %v2347_v1 = vld [vmem:[%s2981_s1 + $0x348] sm:$0xff] }
  0x59   :  { %1443 = vmatpush.bf16.msra.mxu3 %v2332_v7  ;;  %v2362_v7 = vld [vmem:[%s2981_s1 + $0x3c0] sm:$0xff] }
  0x5a   :  { %1387 = vmatpush.bf16.msra.mxu0 %v2307_v9  ;;  %v2224_v9 = vld [vmem:[%s2982_s0 + $0x6c] sm:$0xf0] }
  0x5b   :  { %1406 = vmatpush.bf16.msra.mxu1 %v2315_v10  ;;  %v2216_v10 = vld [vmem:[%s2982_s0 + $0x34] sm:$0xf] }
  0x5c   :  { %1425 = vmatpush.bf16.msra.mxu2 %v2323_v8  ;;  %v1620_v8 = vld [vmem:[%s2982_s0 + $0x30] sm:$0xf] }
  0x5d   :  { %1444 = vmatpush.bf16.msra.mxu3 %v2331_v11  ;;  %v1622_v11 = vld [vmem:[%s2982_s0 + $0x70] sm:$0xf0] }
  0x5e   :  { %1388 = vmatpush.bf16.msra.mxu0 %v2306_v14  ;;  %v2217_v14 = vld [vmem:[%s2982_s0 + $0x3c] sm:$0xf]  ;;  %v1625_v17 = vor.u32 %v2216_v10, %v1622_v11 }
  0x5f   :  { %1407 = vmatpush.bf16.msra.mxu1 %v2314_v15  ;;  %v1630_v15 = vld [vmem:[%s2982_s0 + $0x78] sm:$0xf0] }
  0x60   :  { %1426 = vmatpush.bf16.msra.mxu2 %v2322_v12  ;;  %v1628_v12 = vld [vmem:[%s2982_s0 + $0x38] sm:$0xf] }
  0x61   :  { %1445 = vmatpush.bf16.msra.mxu3 %v2330_v16  ;;  %1389 = vmatmul.bf16.vlgmr.msra.gmra.mxu0 %v1605_v29  ;;  %v1621_v16 = vor.u32 %v2224_v9, %v1620_v8 }
  0x62   :  { %1457 = vmatpush.bf16.msrb.mxu0 %v2345_v19  ;;  %1408 = vmatmul.bf16.vlgmr.msra.gmra.mxu1 %v1609_v31  ;;  %v1633_v19 = vor.u32 %v2217_v14, %v1630_v15  ;;  %v1697_v31 = vor.u32 %v2233_v26, %v1694_v27 }
  0x63   :  { %1476 = vmatpush.bf16.msrb.mxu1 %v2353_v20  ;;  %1427 = vmatmul.bf16.vlgmr.msra.gmra.mxu2 %v1613_v32  ;;  %v1684_v20 = vld [vmem:[%s2982_s0 + $0xb0] sm:$0xf] }
  0x64   :  { %1495 = vmatpush.bf16.msrb.mxu2 %v2361_v13  ;;  %1446 = vmatmul.bf16.vlgmr.msra.gmra.mxu3 %v1617_v33  ;;  %v2225_v13 = vld [vmem:[%s2982_s0 + $0x74] sm:$0xf0]  ;;  %v1685_v28 = vor.u32 %v2240_v21, %v1684_v20 }
  0x65   :  { %1514 = vmatpush.bf16.msrb.mxu3 %v2369_v22  ;;  %v1629_v18 = vor.u32 %v2225_v13, %v1628_v12  ;;  %v2232_v22 = vld [vmem:[%s2982_s0 + $0xb4] sm:$0xf] }
  0x66   :  { %1458 = vmatpush.bf16.msrb.mxu0 %v2344_v34 }
  0x67   :  { %1477 = vmatpush.bf16.msrb.mxu1 %v2352_v30  ;;  %v1693_v30 = vor.u32 %v2241_v25, %v1692_v24 }
  0x68   :  { %1496 = vmatpush.bf16.msrb.mxu2 %v2360_v23  ;;  %v1686_v23 = vld [vmem:[%s2982_s0 + $0xf0] sm:$0xf0] }
  0x69   :  { %1515 = vmatpush.bf16.msrb.mxu3 %v2368_v35  ;;  %v1689_v29 = vor.u32 %v2232_v22, %v1686_v23 }
  0x6a   :  { %1459 = vmatpush.bf16.msrb.mxu0 %v2343_v38 }
  0x6b   :  { %1478 = vmatpush.bf16.msrb.mxu1 %v2351_v37 }
  0x6c   :  { %1497 = vmatpush.bf16.msrb.mxu2 %v2359_v36 }
  0x6d   :  { %1516 = vmatpush.bf16.msrb.mxu3 %v2367_v39 }
  0x6e   :  { %1460 = vmatpush.bf16.msrb.mxu0 %v2342_v42 }
  0x6f   :  { %1479 = vmatpush.bf16.msrb.mxu1 %v2350_v41 }
  0x70   :  { %1498 = vmatpush.bf16.msrb.mxu2 %v2358_v40 }
  0x71   :  { %1517 = vmatpush.bf16.msrb.mxu3 %v2366_v43  ;;  %1394 = vmatmul.bf16.gmra.mxu0 %v1669_v57 }
  0x72   :  { %1461 = vmatpush.bf16.msrb.mxu0 %v2341_v53  ;;  %1413 = vmatmul.bf16.gmra.mxu1 %v1673_v59 }
  0x73   :  { %1480 = vmatpush.bf16.msrb.mxu1 %v2349_v47  ;;  %1432 = vmatmul.bf16.gmra.mxu2 %v1677_v60 }
  0x74   :  { %1499 = vmatpush.bf16.msrb.mxu2 %v2357_v44  ;;  %1451 = vmatmul.bf16.gmra.mxu3 %v1681_v61 }
  0x75   :  { %1518 = vmatpush.bf16.msrb.mxu3 %v2365_v55 }
  0x76   :  { %1462 = vmatpush.bf16.msrb.mxu0 %v2340_v62 }
  0x77   :  { %1481 = vmatpush.bf16.msrb.mxu1 %v2348_v58 }
  0x78   :  { %1500 = vmatpush.bf16.msrb.mxu2 %v2356_v56 }
  0x79   :  { %1519 = vmatpush.bf16.msrb.mxu3 %v2364_v63 }
  0x7a   :  { %1463 = vmatpush.bf16.msrb.mxu0 %v2339_v2 }
  0x7b   :  { %1482 = vmatpush.bf16.msrb.mxu1 %v2347_v1 }
  0x7c   :  { %1501 = vmatpush.bf16.msrb.mxu2 %v2355_v0 }
  0x7d   :  { %1520 = vmatpush.bf16.msrb.mxu3 %v2363_v3 }
  0x7e   :  { %1464 = vmatpush.bf16.msrb.mxu0 %v2338_v6 }
  0x7f   :  { %1483 = vmatpush.bf16.msrb.mxu1 %v2346_v5 }
  0x80   :  { %1502 = vmatpush.bf16.msrb.mxu2 %v2354_v4 }
  0x81   :  { %1521 = vmatpush.bf16.msrb.mxu3 %v2362_v7  ;;  %1465 = vmatmul.bf16.vlgmr.msrb.gmra.mxu0 %v1621_v16 }
  0x82   :  { %1484 = vmatmul.bf16.vlgmr.msrb.gmra.mxu1 %v1625_v17 }
  0x83   :  { %1503 = vmatmul.bf16.vlgmr.msrb.gmra.mxu2 %v1629_v18 }
  0x84   :  { %1522 = vmatmul.bf16.vlgmr.msrb.gmra.mxu3 %v1633_v19 }
  0x91   :  { %1470 = vmatmul.bf16.gmra.mxu0 %v1685_v28 }
  0x92   :  { %1489 = vmatmul.bf16.gmra.mxu1 %v1689_v29 }
  0x93   :  { %1508 = vmatmul.bf16.gmra.mxu2 %v1693_v30 }
  0x94   :  { %1527 = vmatmul.bf16.gmra.mxu3 %v1697_v31 }
  0x9e   :  { %v1238_v32 = vpop.f32.mrf.mxu0 }
  0x9f   :  { %v1257_v33 = vpop.f32.mrf.mxu1 }
  0xa0   :  { %v1258_v34 = vadd.f32 %v1257_v33, %v1238_v32 }
  0xa6   :  { %v1276_v35 = vpop.f32.mrf.mxu2  ;;  %v1240_v38 = vpop.f32.mrf.mxu0 }
  0xa7   :  { %v1295_v36 = vpop.f32.mrf.mxu3  ;;  %v1277_v37 = vadd.f32 %v1276_v35, %v1258_v34  ;;  %v1259_v39 = vpop.f32.mrf.mxu1 }
  0xa8   :  { %v1260_v40 = vadd.f32 %v1259_v39, %v1240_v38 }
  0xa9   :  { %v1296_v41 = vadd.f32 %v1295_v36, %v1277_v37 }
  0xae   :  { %v1278_v42 = vpop.f32.mrf.mxu2  ;;  %v1243_v45 = vpop.f32.mrf.mxu0 }
  0xaf   :  { %v1297_v43 = vpop.f32.mrf.mxu3  ;;  %v1279_v44 = vadd.f32 %v1278_v42, %v1260_v40  ;;  %v1262_v46 = vpop.f32.mrf.mxu1 }
  0xb0   :  { %v1263_v47 = vadd.f32 %v1262_v46, %v1243_v45 }
  0xb1   :  { %v1298_v48 = vadd.f32 %v1297_v43, %v1279_v44 }
  0xb6   :  { %v1281_v49 = vpop.f32.mrf.mxu2  ;;  %v1245_v52 = vpop.f32.mrf.mxu0 }
  0xb7   :  { %v1300_v50 = vpop.f32.mrf.mxu3  ;;  %v1282_v51 = vadd.f32 %v1281_v49, %v1263_v47  ;;  %v1264_v53 = vpop.f32.mrf.mxu1 }
  0xb8   :  { %v1265_v54 = vadd.f32 %v1264_v53, %v1245_v52 }
  0xb9   :  { %v1301_v55 = vadd.f32 %v1300_v50, %v1282_v51 }
  0xbe   :  { %v1283_v56 = vpop.f32.mrf.mxu2  ;;  %v1314_v59 = vpop.f32.mrf.mxu0 }
  0xbf   :  { %v1302_v57 = vpop.f32.mrf.mxu3  ;;  %v1284_v58 = vadd.f32 %v1283_v56, %v1265_v54  ;;  %v1333_v60 = vpop.f32.mrf.mxu1  ;;  %v1315_v18 = vadd.f32 %v1314_v59, %v1296_v41 }
  0xc1   :  { %v1303_v61 = vadd.f32 %v1302_v57, %v1284_v58  ;;  %v1334_v19 = vadd.f32 %v1333_v60, %v1315_v18 }
  0xc6   :  { %v1352_v62 = vpop.f32.mrf.mxu2  ;;  %v1316_v0 = vpop.f32.mrf.mxu0 }
  0xc7   :  { %v1371_v63 = vpop.f32.mrf.mxu3  ;;  %v1335_v1 = vpop.f32.mrf.mxu1  ;;  %v1353_v21 = vadd.f32 %v1352_v62, %v1334_v19  ;;  %v1317_v25 = vadd.f32 %v1316_v0, %v1298_v48 }
  0xc9   :  { %v1372_v26 = vadd.f32 %v1371_v63, %v1353_v21  ;;  %v1336_v27 = vadd.f32 %v1335_v1, %v1317_v25 }
  0xce   :  { %v1354_v2 = vpop.f32.mrf.mxu2  ;;  %v1319_v4 = vpop.f32.mrf.mxu0 }
  0xcf   :  { %v1373_v3 = vpop.f32.mrf.mxu3  ;;  %v1338_v5 = vpop.f32.mrf.mxu1  ;;  %v1355_v30 = vadd.f32 %v1354_v2, %v1336_v27  ;;  %v1320_v34 = vadd.f32 %v1319_v4, %v1301_v55 }
  0xd1   :  { %v1374_v36 = vadd.f32 %v1373_v3, %v1355_v30  ;;  %v1339_v38 = vadd.f32 %v1338_v5, %v1320_v34 }
  0xd6   :  { %v1357_v6 = vpop.f32.mrf.mxu2  ;;  %v1321_v8 = vpop.f32.mrf.mxu0 }
  0xd7   :  { %v1376_v7 = vpop.f32.mrf.mxu3  ;;  %v1340_v9 = vpop.f32.mrf.mxu1  ;;  %v1358_v41 = vadd.f32 %v1357_v6, %v1339_v38  ;;  %v1322_v46 = vadd.f32 %v1321_v8, %v1303_v61 }
  0xd9   :  { %v1377_v49 = vadd.f32 %v1376_v7, %v1358_v41  ;;  %v1341_v51 = vadd.f32 %v1340_v9, %v1322_v46 }
  0xde   :  { %v1359_v10 = vpop.f32.mrf.mxu2  ;;  %v1390_v12 = vpop.f32.mrf.mxu0 }
  0xdf   :  { %v1378_v11 = vpop.f32.mrf.mxu3  ;;  %v1409_v13 = vpop.f32.mrf.mxu1  ;;  %v1391_v28 = vadd.f32 %v1390_v12, %v1372_v26  ;;  %v1360_v55 = vadd.f32 %v1359_v10, %v1341_v51 }
  0xe1   :  { %v1410_v35 = vadd.f32 %v1409_v13, %v1391_v28  ;;  %v1379_v1 = vadd.f32 %v1378_v11, %v1360_v55 }
  0xe6   :  { %v1428_v14 = vpop.f32.mrf.mxu2  ;;  %v1392_v16 = vpop.f32.mrf.mxu0 }
  0xe7   :  { %v1447_v15 = vpop.f32.mrf.mxu3  ;;  %v1411_v17 = vpop.f32.mrf.mxu1  ;;  %v1429_v37 = vadd.f32 %v1428_v14, %v1410_v35  ;;  %v1393_v39 = vadd.f32 %v1392_v16, %v1374_v36 }
  0xe9   :  { %v1448_v42 = vadd.f32 %v1447_v15, %v1429_v37  ;;  %v1412_v47 = vadd.f32 %v1411_v17, %v1393_v39 }
  0xee   :  { %v1430_v20 = vpop.f32.mrf.mxu2  ;;  %v1395_v23 = vpop.f32.mrf.mxu0 }
  0xef   :  { %v1449_v22 = vpop.f32.mrf.mxu3  ;;  %v1414_v24 = vpop.f32.mrf.mxu1  ;;  %v1431_v50 = vadd.f32 %v1430_v20, %v1412_v47  ;;  %v1396_v52 = vadd.f32 %v1395_v23, %v1377_v49 }
  0xf1   :  { %v1450_v56 = vadd.f32 %v1449_v22, %v1431_v50  ;;  %v1415_v62 = vadd.f32 %v1414_v24, %v1396_v52 }
  0xf6   :  { %v1433_v29 = vpop.f32.mrf.mxu2  ;;  %v1397_v32 = vpop.f32.mrf.mxu0 }
  0xf7   :  { %v1452_v31 = vpop.f32.mrf.mxu3  ;;  %v1416_v33 = vpop.f32.mrf.mxu1  ;;  %v1434_v2 = vadd.f32 %v1433_v29, %v1415_v62  ;;  %v1398_v61 = vadd.f32 %v1397_v32, %v1379_v1 }
  0xf9   :  { %v1453_v5 = vadd.f32 %v1452_v31, %v1434_v2  ;;  %v1417_v9 = vadd.f32 %v1416_v33, %v1398_v61 }
  0xfe   :  { %v1435_v40 = vpop.f32.mrf.mxu2  ;;  %v1466_v44 = vpop.f32.mrf.mxu0 }
  0xff   :  { %v1454_v43 = vpop.f32.mrf.mxu3  ;;  %v1485_v45 = vpop.f32.mrf.mxu1  ;;  %v1467_v48 = vadd.f32 %v1466_v44, %v1448_v42  ;;  %v1436_v14 = vadd.f32 %v1435_v40, %v1417_v9 }
 0x101   :  { %v1486_v53 = vadd.f32 %v1485_v45, %v1467_v48  ;;  %v1455_v20 = vadd.f32 %v1454_v43, %v1436_v14 }
 0x106   :  { %v1504_v54 = vpop.f32.mrf.mxu2  ;;  %v1468_v59 = vpop.f32.mrf.mxu0 }
 0x107   :  { %v1505_v57 = vadd.f32 %v1504_v54, %v1486_v53  ;;  %v1523_v58 = vpop.f32.mrf.mxu3  ;;  %v1487_v60 = vpop.f32.mrf.mxu1  ;;  %v1469_v0 = vadd.f32 %v1468_v59, %v1450_v56 }
 0x109   :  { %v1524_v63 = vadd.f32 %v1523_v58, %v1505_v57  ;;  %v1488_v3 = vadd.f32 %v1487_v60, %v1469_v0 }
 0x10b   :  { %1558 = vst [vmem:[%s2983_s2] sm:$0xff] %v1524_v63  ;;  %v1542_v15 = vmul.f32 %v1524_v63, %v1524_v63 }
 0x10e   :  { %v1506_v4 = vpop.f32.mrf.mxu2  ;;  %v1471_v8 = vpop.f32.mrf.mxu0 }
 0x10f   :  { %v1507_v6 = vadd.f32 %v1506_v4, %v1488_v3  ;;  %v1525_v7 = vpop.f32.mrf.mxu3  ;;  %v1472_v12 = vadd.f32 %v1471_v8, %v1453_v5  ;;  %v1490_v13 = vpop.f32.mrf.mxu1 }
 0x111   :  { %v1526_v10 = vadd.f32 %v1525_v7, %v1507_v6  ;;  %v1491_v18 = vadd.f32 %v1490_v13, %v1472_v12 }
 0x113   :  { %v1533_v16 = vadd.f32 %v1526_v10, %v1524_v63  ;;  %v1543_v11 = vmul.f32 %v1526_v10, %v1526_v10  ;;  %1559 = vst [vmem:[%s2983_s2 + $0x8] sm:$0xff] %v1526_v10 }
 0x115   :  { %v1546_v17 = vadd.f32 %v1543_v11, %v1542_v15 }
 0x116   :  { %v1509_v19 = vpop.f32.mrf.mxu2  ;;  %v1473_v23 = vpop.f32.mrf.mxu0 }
 0x117   :  { %v1510_v21 = vadd.f32 %v1509_v19, %v1491_v18  ;;  %v1528_v22 = vpop.f32.mrf.mxu3  ;;  %v1474_v25 = vadd.f32 %v1473_v23, %v1455_v20  ;;  %v1492_v28 = vpop.f32.mrf.mxu1 }
 0x119   :  { %v1529_v24 = vadd.f32 %v1528_v22, %v1510_v21  ;;  %v1493_v30 = vadd.f32 %v1492_v28, %v1474_v25 }
 0x11b   :  { %v1534_v26 = vadd.f32 %v1533_v16, %v1529_v24  ;;  %v1544_v27 = vmul.f32 %v1529_v24, %v1529_v24  ;;  %1560 = vst [vmem:[%s2983_s2 + $0x10] sm:$0xff] %v1529_v24 }
 0x11d   :  { %v1547_v29 = vadd.f32 %v1546_v17, %v1544_v27 }
 0x11e   :  { %v1511_v31 = vpop.f32.mrf.mxu2 }
 0x11f   :  { %v1512_v32 = vadd.f32 %v1511_v31, %v1493_v30  ;;  %v1530_v33 = vpop.f32.mrf.mxu3 }
 0x121   :  { %v1531_v34 = vadd.f32 %v1530_v33, %v1512_v32 }
 0x123   :  { %v1535_v35 = vadd.f32 %v1534_v26, %v1531_v34  ;;  %v1545_v36 = vmul.f32 %v1531_v34, %v1531_v34  ;;  %1561 = vst [vmem:[%s2983_s2 + $0x18] sm:$0xff] %v1531_v34 }
 0x125   :  { %v1536_v37 = vrot.slane %v1535_v35, 4  ;;  %v1548_v38 = vadd.f32 %v1547_v29, %v1545_v36 }
 0x127   :  { %v1537_v39 = vadd.f32 %v1536_v37, %v1535_v35  ;;  %v1549_v40 = vrot.slane %v1548_v38, 4 }
 0x129   :  { %v1538_v41 = vrot.slane %v1537_v39, 2  ;;  %v1550_v42 = vadd.f32 %v1549_v40, %v1548_v38 }
 0x12b   :  { %v1539_v43 = vadd.f32 %v1538_v41, %v1537_v39  ;;  %v1551_v44 = vrot.slane %v1550_v42, 2 }
 0x12d   :  { %v1540_v45 = vrot.slane %v1539_v43, 1  ;;  %v1552_v46 = vadd.f32 %v1551_v44, %v1550_v42 }
 0x12f   :  { %v1553_v47 = vrot.slane %v1552_v46, 1  ;;  %v1541_v48 = vadd.f32 %v1540_v45, %v1539_v43 }
 0x131   :  { %v1554_v49 = vadd.f32 %v1553_v47, %v1552_v46 }
 0x133   :  { %v1556_v50 = vsel %vm1555_vm0, %v1541_v48, %v1554_v49 }
 0x134   :  { %1557 = vst [vmem:[%s2984_s3] sm:$0x3] %v1556_v50 }

// kernel: discriminator_forward.14
= control target key start
LH: loop header
LB: loop body
LE: loop exit
PB: predicated region body
PF: predicated region fallthrough
CT: control target
= control target key end

     0   :  { %s98_s0 = inlined_call_operand.vmem [shape: f32[24,128], index: 0, kind: input, shape index: {}]   ;;  %s99_s1 = inlined_call_operand.vmem [shape: f32[1,128], index: 1, kind: input, shape index: {}]   ;;  %s100_s2 = inlined_call_operand.vmem [shape: f32[1,128], index: 2, kind: input, shape index: {}]   ;;  %s101_s3 = inlined_call_operand.vmem [shape: bf16[24,128], index: 3, kind: output, shape index: {}]  }
   0x1   :  { %v14_v0 = vld [vmem:[%s98_s0] sm:$0xff]  ;;  %v15_v1 = vld [vmem:[%s98_s0 + $0x8] sm:$0xff]  ;;  %v16_v4 = vld [vmem:[%s98_s0 + $0x10] sm:$0xff] }
   0x2   :  { %v55_v2 = vld [vmem:[%s99_s1] ss:$0 sm:$0xff] }
   0x3   :  { %v56_v3 = vld [vmem:[%s100_s2] ss:$0 sm:$0xff]  ;;  %v21_v5 = vmul.f32 %v55_v2, %v14_v0  ;;  %v22_v6 = vmul.f32 %v55_v2, %v15_v1  ;;  %v23_v7 = vmul.f32 %v55_v2, %v16_v4 }
   0x5   :  { %v28_v8 = vadd.f32 %v56_v3, %v21_v5  ;;  %v29_v9 = vadd.f32 %v56_v3, %v22_v6  ;;  %v30_v10 = vadd.f32 %v56_v3, %v23_v7 }
   0x7   :  { %vm31_vm0 = vcmp.gt.f32.partialorder %v28_v8, 0.0  ;;  %vm32_vm1 = vcmp.gt.f32.partialorder %v29_v9, 0.0  ;;  %v34_v11 = vmul.f32 0.2, %v28_v8  ;;  %v35_v12 = vmul.f32 0.2, %v29_v9 }
   0x8   :  { %vm33_vm2 = vcmp.gt.f32.partialorder %v30_v10, 0.0  ;;  %v36_v13 = vmul.f32 0.2, %v30_v10 }
   0x9   :  { %v37_v14 = vsel %vm31_vm0, %v28_v8, %v34_v11  ;;  %v38_v15 = vsel %vm32_vm1, %v29_v9, %v35_v12 }
   0xa   :  { %v53_v16 = vpack.c.bf16 %v38_v15, %v37_v14  ;;  %v39_v17 = vsel %vm33_vm2, %v30_v10, %v36_v13 }
   0xb   :  { %v42_v18 = vpack.c.bf16 %v39_v17, %v39_v17 }
   0xc   :  { %54 = vst [vmem:[%s101_s3] sm:$0xff] %v53_v16  }
   0xd   :  { %45 = vst [vmem:[%s101_s3 + $0x8] sm:$0xf] %v42_v18 }

// kernel: discriminator_forward.13
= control target key start
LH: loop header
LB: loop body
LE: loop exit
PB: predicated region body
PF: predicated region fallthrough
CT: control target
= control target key end

     0   :  { %vm1504_vm0 = vcmask 1040384   ;;  %s2774_s1 = inlined_call_operand.vmem [shape: bf16[2048,128], index: 1, kind: input, shape index: {}]   ;;  %s2775_s0 = inlined_call_operand.vmem [shape: bf16[24,2048], index: 0, kind: input, shape index: {}]   ;;  %s2776_s2 = inlined_call_operand.vmem [shape: f32[24,128], index: 2, kind: output, shape index: {0}]   ;;  %s2777_s3 = inlined_call_operand.vmem [shape: f32[1,2,128], index: 3, kind: output, shape index: {1}]  }
   0x1   :  { %v2117_v0 = vld [vmem:[%s2774_s1 + $0x38] sm:$0xff]  ;;  %v2116_v4 = vld [vmem:[%s2774_s1 + $0x30] sm:$0xff]  ;;  %v2115_v8 = vld [vmem:[%s2774_s1 + $0x28] sm:$0xff] }
   0x2   :  { %v2125_v1 = vld [vmem:[%s2774_s1 + $0x78] sm:$0xff]  ;;  %1197 = vmatpush.bf16.msra.mxu0 %v2117_v0  ;;  %v2124_v5 = vld [vmem:[%s2774_s1 + $0x70] sm:$0xff]  ;;  %v2123_v9 = vld [vmem:[%s2774_s1 + $0x68] sm:$0xff] }
   0x3   :  { %v2133_v2 = vld [vmem:[%s2774_s1 + $0xb8] sm:$0xff]  ;;  %1215 = vmatpush.bf16.msra.mxu1 %v2125_v1  ;;  %v2132_v6 = vld [vmem:[%s2774_s1 + $0xb0] sm:$0xff]  ;;  %v2131_v10 = vld [vmem:[%s2774_s1 + $0xa8] sm:$0xff] }
   0x4   :  { %v2141_v3 = vld [vmem:[%s2774_s1 + $0xf8] sm:$0xff]  ;;  %1233 = vmatpush.bf16.msra.mxu2 %v2133_v2  ;;  %v2140_v7 = vld [vmem:[%s2774_s1 + $0xf0] sm:$0xff]  ;;  %v2139_v11 = vld [vmem:[%s2774_s1 + $0xe8] sm:$0xff] }
   0x5   :  { %1251 = vmatpush.bf16.msra.mxu3 %v2141_v3  ;;  %v2114_v12 = vld [vmem:[%s2774_s1 + $0x20] sm:$0xff]  ;;  %v2113_v16 = vld [vmem:[%s2774_s1 + $0x18] sm:$0xff]  ;;  %v2112_v20 = vld [vmem:[%s2774_s1 + $0x10] sm:$0xff] }
   0x6   :  { %1198 = vmatpush.bf16.msra.mxu0 %v2116_v4  ;;  %v2122_v13 = vld [vmem:[%s2774_s1 + $0x60] sm:$0xff]  ;;  %v2121_v17 = vld [vmem:[%s2774_s1 + $0x58] sm:$0xff]  ;;  %v2120_v21 = vld [vmem:[%s2774_s1 + $0x50] sm:$0xff] }
   0x7   :  { %1216 = vmatpush.bf16.msra.mxu1 %v2124_v5  ;;  %v2130_v14 = vld [vmem:[%s2774_s1 + $0xa0] sm:$0xff]  ;;  %v2129_v18 = vld [vmem:[%s2774_s1 + $0x98] sm:$0xff]  ;;  %v2128_v22 = vld [vmem:[%s2774_s1 + $0x90] sm:$0xff] }
   0x8   :  { %1234 = vmatpush.bf16.msra.mxu2 %v2132_v6  ;;  %v2138_v15 = vld [vmem:[%s2774_s1 + $0xe0] sm:$0xff]  ;;  %v2137_v19 = vld [vmem:[%s2774_s1 + $0xd8] sm:$0xff]  ;;  %v2136_v23 = vld [vmem:[%s2774_s1 + $0xd0] sm:$0xff] }
   0x9   :  { %1252 = vmatpush.bf16.msra.mxu3 %v2140_v7  ;;  %v2111_v24 = vld [vmem:[%s2774_s1 + $0x8] sm:$0xff]  ;;  %v2110_v28 = vld [vmem:[%s2774_s1] sm:$0xff]  ;;  %v2165_v40 = vld [vmem:[%s2774_s1 + $0x1b8] sm:$0xff] }
   0xa   :  { %1199 = vmatpush.bf16.msra.mxu0 %v2115_v8  ;;  %v2119_v25 = vld [vmem:[%s2774_s1 + $0x48] sm:$0xff]  ;;  %v2118_v29 = vld [vmem:[%s2774_s1 + $0x40] sm:$0xff]  ;;  %v2149_v41 = vld [vmem:[%s2774_s1 + $0x138] sm:$0xff] }
   0xb   :  { %1217 = vmatpush.bf16.msra.mxu1 %v2123_v9  ;;  %v2127_v26 = vld [vmem:[%s2774_s1 + $0x88] sm:$0xff]  ;;  %v2126_v30 = vld [vmem:[%s2774_s1 + $0x80] sm:$0xff]  ;;  %v2157_v46 = vld [vmem:[%s2774_s1 + $0x178] sm:$0xff] }
   0xc   :  { %1235 = vmatpush.bf16.msra.mxu2 %v2131_v10  ;;  %v2135_v27 = vld [vmem:[%s2774_s1 + $0xc8] sm:$0xff]  ;;  %v2134_v31 = vld [vmem:[%s2774_s1 + $0xc0] sm:$0xff]  ;;  %v2173_v47 = vld [vmem:[%s2774_s1 + $0x1f8] sm:$0xff] }
   0xd   :  { %1253 = vmatpush.bf16.msra.mxu3 %v2139_v11  ;;  %v1520_v32 = vld [vmem:[%s2775_s0] sm:$0xf]  ;;  %v2094_v34 = vld [vmem:[%s2775_s0 + $0x4] sm:$0xf]  ;;  %v1528_v36 = vld [vmem:[%s2775_s0 + $0x8] sm:$0xf] }
   0xe   :  { %1200 = vmatpush.bf16.msra.mxu0 %v2114_v12  ;;  %v2102_v33 = vld [vmem:[%s2775_s0 + $0x3c] sm:$0xf0]  ;;  %v1522_v35 = vld [vmem:[%s2775_s0 + $0x40] sm:$0xf0]  ;;  %v2103_v37 = vld [vmem:[%s2775_s0 + $0x44] sm:$0xf0] }
   0xf   :  { %1218 = vmatpush.bf16.msra.mxu1 %v2122_v13  ;;  %v2095_v38 = vld [vmem:[%s2775_s0 + $0xc] sm:$0xf]  ;;  %v1521_v42 = vor.u32 %v2102_v33, %v1520_v32  ;;  %v1525_v43 = vor.u32 %v2094_v34, %v1522_v35  ;;  %v1529_v44 = vor.u32 %v2103_v37, %v1528_v36  ;;  %v2164_v48 = vld [vmem:[%s2774_s1 + $0x1b0] sm:$0xff]  ;;  %v29_v54 = vld [vmem:[%s2775_s0 + $0x80] sm:$0xff] }
  0x10   :  { %1236 = vmatpush.bf16.msra.mxu2 %v2130_v14  ;;  %v1530_v39 = vld [vmem:[%s2775_s0 + $0x48] sm:$0xf0]  ;;  %v2148_v49 = vld [vmem:[%s2774_s1 + $0x130] sm:$0xff]  ;;  %v2162_v58 = vld [vmem:[%s2774_s1 + $0x1a0] sm:$0xff]  ;;  %v349_v60 = vunpack.c.l.b16 %v29_v54  ;;  %v350_v61 = vunpack.c.h.b16 %v29_v54 }
  0x11   :  { %1254 = vmatpush.bf16.msra.mxu3 %v2138_v15  ;;  %v1533_v45 = vor.u32 %v2095_v38, %v1530_v39  ;;  %v2156_v50 = vld [vmem:[%s2774_s1 + $0x170] sm:$0xff]  ;;  %v2163_v52 = vld [vmem:[%s2774_s1 + $0x1a8] sm:$0xff]  ;;  %v2146_v59 = vld [vmem:[%s2774_s1 + $0x120] sm:$0xff] }
  0x12   :  { %1201 = vmatpush.bf16.msra.mxu0 %v2113_v16  ;;  %v2172_v51 = vld [vmem:[%s2774_s1 + $0x1f0] sm:$0xff]  ;;  %v2147_v53 = vld [vmem:[%s2774_s1 + $0x128] sm:$0xff]  ;;  %v2154_v0 = vld [vmem:[%s2774_s1 + $0x160] sm:$0xff]  ;;  %v381_v4 = vpack.c.b16 %v349_v60, %v349_v60  ;;  %v382_v5 = vpack.c.b16 %v350_v61, %v350_v61 }
  0x13   :  { %1219 = vmatpush.bf16.msra.mxu1 %v2121_v17  ;;  %v2155_v55 = vld [vmem:[%s2774_s1 + $0x168] sm:$0xff]  ;;  %v2170_v1 = vld [vmem:[%s2774_s1 + $0x1e0] sm:$0xff]  ;;  %v2161_v2 = vld [vmem:[%s2774_s1 + $0x198] sm:$0xff] }
  0x14   :  { %1237 = vmatpush.bf16.msra.mxu2 %v2129_v18  ;;  %v2171_v56 = vld [vmem:[%s2774_s1 + $0x1e8] sm:$0xff]  ;;  %v2145_v3 = vld [vmem:[%s2774_s1 + $0x118] sm:$0xff]  ;;  %v2160_v10 = vld [vmem:[%s2774_s1 + $0x190] sm:$0xff] }
  0x15   :  { %1255 = vmatpush.bf16.msra.mxu3 %v2137_v19  ;;  %v30_v57 = vld [vmem:[%s2775_s0 + $0x88] sm:$0xff]  ;;  %v2153_v8 = vld [vmem:[%s2774_s1 + $0x158] sm:$0xff]  ;;  %v2144_v11 = vld [vmem:[%s2774_s1 + $0x110] sm:$0xff] }
  0x16   :  { %1202 = vmatpush.bf16.msra.mxu0 %v2112_v20  ;;  %v351_v62 = vunpack.c.l.b16 %v30_v57  ;;  %v352_v63 = vunpack.c.h.b16 %v30_v57  ;;  %v2169_v9 = vld [vmem:[%s2774_s1 + $0x1d8] sm:$0xff]  ;;  %v2152_v12 = vld [vmem:[%s2774_s1 + $0x150] sm:$0xff]  ;;  %v2159_v14 = vld [vmem:[%s2774_s1 + $0x188] sm:$0xff] }
  0x17   :  { %1220 = vmatpush.bf16.msra.mxu1 %v2120_v21  ;;  %v2168_v13 = vld [vmem:[%s2774_s1 + $0x1d0] sm:$0xff]  ;;  %v2143_v15 = vld [vmem:[%s2774_s1 + $0x108] sm:$0xff]  ;;  %v2158_v18 = vld [vmem:[%s2774_s1 + $0x180] sm:$0xff] }
  0x18   :  { %1238 = vmatpush.bf16.msra.mxu2 %v2128_v22  ;;  %v383_v6 = vpack.c.b16 %v351_v62, %v351_v62  ;;  %v384_v7 = vpack.c.b16 %v352_v63, %v352_v63  ;;  %v2151_v16 = vld [vmem:[%s2774_s1 + $0x148] sm:$0xff]  ;;  %v2142_v19 = vld [vmem:[%s2774_s1 + $0x100] sm:$0xff]  ;;  %v1536_v22 = vld [vmem:[%s2775_s0 + $0x10] sm:$0xf] }
  0x19   :  { %1256 = vmatpush.bf16.msra.mxu3 %v2136_v23  ;;  %v2167_v17 = vld [vmem:[%s2774_s1 + $0x1c8] sm:$0xff]  ;;  %v2150_v20 = vld [vmem:[%s2774_s1 + $0x140] sm:$0xff]  ;;  %v2197_v23 = vld [vmem:[%s2774_s1 + $0x2b8] sm:$0xff] }
  0x1a   :  { %1203 = vmatpush.bf16.msra.mxu0 %v2111_v24  ;;  %v2166_v21 = vld [vmem:[%s2774_s1 + $0x1c0] sm:$0xff]  ;;  %v2181_v24 = vld [vmem:[%s2774_s1 + $0x238] sm:$0xff]  ;;  %v2196_v35 = vld [vmem:[%s2774_s1 + $0x2b0] sm:$0xff] }
  0x1b   :  { %1221 = vmatpush.bf16.msra.mxu1 %v2119_v25  ;;  %v2104_v25 = vld [vmem:[%s2775_s0 + $0x4c] sm:$0xf0]  ;;  %v2189_v32 = vld [vmem:[%s2774_s1 + $0x278] sm:$0xff] }
  0x1c   :  { %1239 = vmatpush.bf16.msra.mxu2 %v2127_v26  ;;  %v2096_v26 = vld [vmem:[%s2775_s0 + $0x14] sm:$0xf]  ;;  %v2205_v33 = vld [vmem:[%s2774_s1 + $0x2f8] sm:$0xff]  ;;  %v1537_v34 = vor.u32 %v2104_v25, %v1536_v22  ;;  %v2107_v22 = vld [vmem:[%s2775_s0 + $0x64] sm:$0xf0] }
  0x1d   :  { %1257 = vmatpush.bf16.msra.mxu3 %v2135_v27  ;;  %v1538_v27 = vld [vmem:[%s2775_s0 + $0x50] sm:$0xf0]  ;;  %v2177_v57 = vld [vmem:[%s2774_s1 + $0x218] sm:$0xff] }
  0x1e   :  { %1204 = vmatpush.bf16.msra.mxu0 %v2110_v28  ;;  %v1544_v28 = vld [vmem:[%s2775_s0 + $0x18] sm:$0xf]  ;;  %v1541_v36 = vor.u32 %v2096_v26, %v1538_v27  ;;  %v2180_v39 = vld [vmem:[%s2774_s1 + $0x230] sm:$0xff] }
  0x1f   :  { %1222 = vmatpush.bf16.msra.mxu1 %v2118_v29  ;;  %v2105_v29 = vld [vmem:[%s2775_s0 + $0x54] sm:$0xf0]  ;;  %v2192_v61 = vld [vmem:[%s2774_s1 + $0x290] sm:$0xff] }
  0x20   :  { %1240 = vmatpush.bf16.msra.mxu2 %v2126_v30  ;;  %v2097_v30 = vld [vmem:[%s2775_s0 + $0x1c] sm:$0xf]  ;;  %v1545_v37 = vor.u32 %v2105_v29, %v1544_v28  ;;  %v2220_v26 = vld [vmem:[%s2774_s1 + $0x370] sm:$0xff] }
  0x21   :  { %1258 = vmatpush.bf16.msra.mxu3 %v2134_v31  ;;  %1205 = vmatmul.bf16.vlgmr.msra.gmra.mxu0 %v1521_v42  ;;  %v1546_v31 = vld [vmem:[%s2775_s0 + $0x58] sm:$0xf0]  ;;  %v2195_v42 = vld [vmem:[%s2774_s1 + $0x2a8] sm:$0xff] }
  0x22   :  { %1269 = vmatpush.bf16.msrb.mxu0 %v2149_v41  ;;  %1223 = vmatmul.bf16.vlgmr.msra.gmra.mxu1 %v1525_v43  ;;  %v1549_v38 = vor.u32 %v2097_v30, %v1546_v31  ;;  %v2204_v41 = vld [vmem:[%s2774_s1 + $0x2f0] sm:$0xff]  ;;  %v2179_v43 = vld [vmem:[%s2774_s1 + $0x228] sm:$0xff] }
  0x23   :  { %1241 = vmatmul.bf16.vlgmr.msra.gmra.mxu2 %v1529_v44  ;;  %1287 = vmatpush.bf16.msrb.mxu1 %v2157_v46  ;;  %v2187_v44 = vld [vmem:[%s2774_s1 + $0x268] sm:$0xff]  ;;  %v2194_v46 = vld [vmem:[%s2774_s1 + $0x2a0] sm:$0xff]  ;;  %v2212_v30 = vld [vmem:[%s2774_s1 + $0x330] sm:$0xff] }
  0x24   :  { %1305 = vmatpush.bf16.msrb.mxu2 %v2165_v40  ;;  %1259 = vmatmul.bf16.vlgmr.msra.gmra.mxu3 %v1533_v45  ;;  %v2188_v40 = vld [vmem:[%s2774_s1 + $0x270] sm:$0xff]  ;;  %v2203_v45 = vld [vmem:[%s2774_s1 + $0x2e8] sm:$0xff] }
  0x25   :  { %1323 = vmatpush.bf16.msrb.mxu3 %v2173_v47  ;;  %v31_v47 = vld [vmem:[%s2775_s0 + $0x90] sm:$0xff] }
  0x26   :  { %1270 = vmatpush.bf16.msrb.mxu0 %v2148_v49  ;;  %v32_v49 = vld [vmem:[%s2775_s0 + $0x98] sm:$0xff]  ;;  %v354_v54 = vunpack.c.h.b16 %v31_v47  ;;  %v2236_v31 = vld [vmem:[%s2774_s1 + $0x3f0] sm:$0xff] }
  0x27   :  { %1288 = vmatpush.bf16.msrb.mxu1 %v2156_v50  ;;  %v2186_v50 = vld [vmem:[%s2774_s1 + $0x260] sm:$0xff] }
  0x28   :  { %1306 = vmatpush.bf16.msrb.mxu2 %v2164_v48  ;;  %v2178_v48 = vld [vmem:[%s2774_s1 + $0x220] sm:$0xff]  ;;  %v386_v62 = vpack.c.b16 %v354_v54, %v354_v54 }
  0x29   :  { %1324 = vmatpush.bf16.msrb.mxu3 %v2172_v51  ;;  %v2202_v51 = vld [vmem:[%s2774_s1 + $0x2e0] sm:$0xff] }
  0x2a   :  { %1271 = vmatpush.bf16.msrb.mxu0 %v2147_v53  ;;  %v2193_v53 = vld [vmem:[%s2774_s1 + $0x298] sm:$0xff] }
  0x2b   :  { %1289 = vmatpush.bf16.msrb.mxu1 %v2155_v55  ;;  %v355_v55 = vunpack.c.l.b16 %v32_v49 }
  0x2c   :  { %1307 = vmatpush.bf16.msrb.mxu2 %v2163_v52  ;;  %v353_v52 = vunpack.c.l.b16 %v31_v47 }
  0x2d   :  { %1325 = vmatpush.bf16.msrb.mxu3 %v2171_v56  ;;  %v356_v56 = vunpack.c.h.b16 %v32_v49  ;;  %v387_v63 = vpack.c.b16 %v355_v55, %v355_v55  ;;  %v2233_v49 = vld [vmem:[%s2774_s1 + $0x3d8] sm:$0xff] }
  0x2e   :  { %1272 = vmatpush.bf16.msrb.mxu0 %v2146_v59  ;;  %v2201_v59 = vld [vmem:[%s2774_s1 + $0x2d8] sm:$0xff]  ;;  %v385_v60 = vpack.c.b16 %v353_v52, %v353_v52  ;;  %v2216_v52 = vld [vmem:[%s2774_s1 + $0x350] sm:$0xff] }
  0x2f   :  { %1290 = vmatpush.bf16.msrb.mxu1 %v2154_v0  ;;  %v388_v0 = vpack.c.b16 %v356_v56, %v356_v56  ;;  %v2208_v56 = vld [vmem:[%s2774_s1 + $0x310] sm:$0xff] }
  0x30   :  { %1308 = vmatpush.bf16.msrb.mxu2 %v2162_v58  ;;  %v2185_v58 = vld [vmem:[%s2774_s1 + $0x258] sm:$0xff] }
  0x31   :  { %1326 = vmatpush.bf16.msrb.mxu3 %v2170_v1  ;;  %1210 = vmatmul.bf16.gmra.mxu0 %v381_v4  ;;  %v2176_v1 = vld [vmem:[%s2774_s1 + $0x210] sm:$0xff]  ;;  %v2191_v4 = vld [vmem:[%s2774_s1 + $0x288] sm:$0xff] }
  0x32   :  { %1273 = vmatpush.bf16.msrb.mxu0 %v2145_v3  ;;  %1228 = vmatmul.bf16.gmra.mxu1 %v382_v5  ;;  %v2200_v3 = vld [vmem:[%s2774_s1 + $0x2d0] sm:$0xff]  ;;  %v2175_v5 = vld [vmem:[%s2774_s1 + $0x208] sm:$0xff] }
  0x33   :  { %1246 = vmatmul.bf16.gmra.mxu2 %v383_v6  ;;  %1291 = vmatpush.bf16.msrb.mxu1 %v2153_v8  ;;  %v2183_v6 = vld [vmem:[%s2774_s1 + $0x248] sm:$0xff]  ;;  %v2190_v8 = vld [vmem:[%s2774_s1 + $0x280] sm:$0xff] }
  0x34   :  { %1309 = vmatpush.bf16.msrb.mxu2 %v2161_v2  ;;  %1264 = vmatmul.bf16.gmra.mxu3 %v384_v7  ;;  %v2184_v2 = vld [vmem:[%s2774_s1 + $0x250] sm:$0xff]  ;;  %v2199_v7 = vld [vmem:[%s2774_s1 + $0x2c8] sm:$0xff] }
  0x35   :  { %1327 = vmatpush.bf16.msrb.mxu3 %v2169_v9  ;;  %v2229_v9 = vld [vmem:[%s2774_s1 + $0x3b8] sm:$0xff] }
  0x36   :  { %1274 = vmatpush.bf16.msrb.mxu0 %v2144_v11  ;;  %v2182_v11 = vld [vmem:[%s2774_s1 + $0x240] sm:$0xff] }
  0x37   :  { %1292 = vmatpush.bf16.msrb.mxu1 %v2152_v12  ;;  %v2198_v12 = vld [vmem:[%s2774_s1 + $0x2c0] sm:$0xff] }
  0x38   :  { %1310 = vmatpush.bf16.msrb.mxu2 %v2160_v10  ;;  %v2174_v10 = vld [vmem:[%s2774_s1 + $0x200] sm:$0xff] }
  0x39   :  { %1328 = vmatpush.bf16.msrb.mxu3 %v2168_v13  ;;  %v1552_v13 = vld [vmem:[%s2775_s0 + $0x20] sm:$0xf] }
  0x3a   :  { %1275 = vmatpush.bf16.msrb.mxu0 %v2143_v15  ;;  %v2213_v15 = vld [vmem:[%s2774_s1 + $0x338] sm:$0xff] }
  0x3b   :  { %1293 = vmatpush.bf16.msrb.mxu1 %v2151_v16  ;;  %v2221_v16 = vld [vmem:[%s2774_s1 + $0x378] sm:$0xff] }
  0x3c   :  { %1311 = vmatpush.bf16.msrb.mxu2 %v2159_v14  ;;  %v2106_v14 = vld [vmem:[%s2775_s0 + $0x5c] sm:$0xf0] }
  0x3d   :  { %1329 = vmatpush.bf16.msrb.mxu3 %v2167_v17  ;;  %v2098_v17 = vld [vmem:[%s2775_s0 + $0x24] sm:$0xf]  ;;  %v1553_v25 = vor.u32 %v2106_v14, %v1552_v13  ;;  %v35_v14 = vld [vmem:[%s2775_s0 + $0xb0] sm:$0xff] }
  0x3e   :  { %1276 = vmatpush.bf16.msrb.mxu0 %v2142_v19  ;;  %v2228_v19 = vld [vmem:[%s2774_s1 + $0x3b0] sm:$0xff] }
  0x3f   :  { %1294 = vmatpush.bf16.msrb.mxu1 %v2150_v20  ;;  %v1554_v20 = vld [vmem:[%s2775_s0 + $0x60] sm:$0xf0] }
  0x40   :  { %1312 = vmatpush.bf16.msrb.mxu2 %v2158_v18  ;;  %v2237_v18 = vld [vmem:[%s2774_s1 + $0x3f8] sm:$0xff]  ;;  %v1557_v27 = vor.u32 %v2098_v17, %v1554_v20  ;;  %v362_v17 = vunpack.c.h.b16 %v35_v14 }
  0x41   :  { %1330 = vmatpush.bf16.msrb.mxu3 %v2166_v21  ;;  %1277 = vmatmul.bf16.vlgmr.msrb.gmra.mxu0 %v1537_v34  ;;  %v1560_v21 = vld [vmem:[%s2775_s0 + $0x28] sm:$0xf] }
  0x42   :  { %1341 = vmatpush.bf16.msra.mxu0 %v2181_v24  ;;  %1295 = vmatmul.bf16.vlgmr.msrb.gmra.mxu1 %v1541_v36  ;;  %v1562_v24 = vld [vmem:[%s2775_s0 + $0x68] sm:$0xf0]  ;;  %v1561_v28 = vor.u32 %v2107_v22, %v1560_v21  ;;  %v2226_v36 = vld [vmem:[%s2774_s1 + $0x3a0] sm:$0xff]  ;;  %v394_v21 = vpack.c.b16 %v362_v17, %v362_v17 }
  0x43   :  { %1359 = vmatpush.bf16.msra.mxu1 %v2189_v32  ;;  %1313 = vmatmul.bf16.vlgmr.msrb.gmra.mxu2 %v1545_v37  ;;  %v2227_v32 = vld [vmem:[%s2774_s1 + $0x3a8] sm:$0xff]  ;;  %v2218_v37 = vld [vmem:[%s2774_s1 + $0x360] sm:$0xff] }
  0x44   :  { %1377 = vmatpush.bf16.msra.mxu2 %v2197_v23  ;;  %1331 = vmatmul.bf16.vlgmr.msrb.gmra.mxu3 %v1549_v38  ;;  %v2099_v23 = vld [vmem:[%s2775_s0 + $0x2c] sm:$0xf]  ;;  %v33_v38 = vld [vmem:[%s2775_s0 + $0xa0] sm:$0xff] }
  0x45   :  { %1395 = vmatpush.bf16.msra.mxu3 %v2205_v33  ;;  %v1565_v29 = vor.u32 %v2099_v23, %v1562_v24  ;;  %v2219_v33 = vld [vmem:[%s2774_s1 + $0x368] sm:$0xff] }
  0x46   :  { %1342 = vmatpush.bf16.msra.mxu0 %v2180_v39  ;;  %v2211_v34 = vld [vmem:[%s2774_s1 + $0x328] sm:$0xff]  ;;  %v2210_v39 = vld [vmem:[%s2774_s1 + $0x320] sm:$0xff] }
  0x47   :  { %1360 = vmatpush.bf16.msra.mxu1 %v2188_v40  ;;  %v34_v40 = vld [vmem:[%s2775_s0 + $0xa8] sm:$0xff] }
  0x48   :  { %1378 = vmatpush.bf16.msra.mxu2 %v2196_v35  ;;  %v2235_v35 = vld [vmem:[%s2774_s1 + $0x3e8] sm:$0xff]  ;;  %v360_v47 = vunpack.c.h.b16 %v34_v40 }
  0x49   :  { %1396 = vmatpush.bf16.msra.mxu3 %v2204_v41  ;;  %v2234_v41 = vld [vmem:[%s2774_s1 + $0x3e0] sm:$0xff] }
  0x4a   :  { %1343 = vmatpush.bf16.msra.mxu0 %v2179_v43  ;;  %v357_v43 = vunpack.c.l.b16 %v33_v38  ;;  %v392_v55 = vpack.c.b16 %v360_v47, %v360_v47 }
  0x4b   :  { %1361 = vmatpush.bf16.msra.mxu1 %v2187_v44  ;;  %v2217_v44 = vld [vmem:[%s2774_s1 + $0x358] sm:$0xff] }
  0x4c   :  { %1379 = vmatpush.bf16.msra.mxu2 %v2195_v42  ;;  %v2225_v42 = vld [vmem:[%s2774_s1 + $0x398] sm:$0xff] }
  0x4d   :  { %1397 = vmatpush.bf16.msra.mxu3 %v2203_v45  ;;  %v358_v45 = vunpack.c.h.b16 %v33_v38 }
  0x4e   :  { %1344 = vmatpush.bf16.msra.mxu0 %v2178_v48  ;;  %v2209_v48 = vld [vmem:[%s2774_s1 + $0x318] sm:$0xff] }
  0x4f   :  { %1362 = vmatpush.bf16.msra.mxu1 %v2186_v50  ;;  %v2224_v50 = vld [vmem:[%s2774_s1 + $0x390] sm:$0xff] }
  0x50   :  { %1380 = vmatpush.bf16.msra.mxu2 %v2194_v46  ;;  %v359_v46 = vunpack.c.l.b16 %v34_v40 }
  0x51   :  { %1398 = vmatpush.bf16.msra.mxu3 %v2202_v51  ;;  %1282 = vmatmul.bf16.gmra.mxu0 %v385_v60  ;;  %v389_v51 = vpack.c.b16 %v357_v43, %v357_v43  ;;  %v2207_v60 = vld [vmem:[%s2774_s1 + $0x308] sm:$0xff] }
  0x52   :  { %1345 = vmatpush.bf16.msra.mxu0 %v2177_v57  ;;  %1300 = vmatmul.bf16.gmra.mxu1 %v386_v62  ;;  %v391_v54 = vpack.c.b16 %v359_v46, %v359_v46  ;;  %v2232_v57 = vld [vmem:[%s2774_s1 + $0x3d0] sm:$0xff]  ;;  %v2222_v62 = vld [vmem:[%s2774_s1 + $0x380] sm:$0xff] }
  0x53   :  { %1363 = vmatpush.bf16.msra.mxu1 %v2185_v58  ;;  %1318 = vmatmul.bf16.gmra.mxu2 %v387_v63  ;;  %v2223_v58 = vld [vmem:[%s2774_s1 + $0x388] sm:$0xff]  ;;  %v2214_v63 = vld [vmem:[%s2774_s1 + $0x340] sm:$0xff] }
  0x54   :  { %1381 = vmatpush.bf16.msra.mxu2 %v2193_v53  ;;  %1336 = vmatmul.bf16.gmra.mxu3 %v388_v0  ;;  %v390_v53 = vpack.c.b16 %v358_v45, %v358_v45  ;;  %v2206_v0 = vld [vmem:[%s2774_s1 + $0x300] sm:$0xff] }
  0x55   :  { %1399 = vmatpush.bf16.msra.mxu3 %v2201_v59  ;;  %v2215_v59 = vld [vmem:[%s2774_s1 + $0x348] sm:$0xff] }
  0x56   :  { %1346 = vmatpush.bf16.msra.mxu0 %v2176_v1  ;;  %v2230_v1 = vld [vmem:[%s2774_s1 + $0x3c0] sm:$0xff] }
  0x57   :  { %1364 = vmatpush.bf16.msra.mxu1 %v2184_v2  ;;  %v1568_v2 = vld [vmem:[%s2775_s0 + $0x30] sm:$0xf] }
  0x58   :  { %1382 = vmatpush.bf16.msra.mxu2 %v2192_v61  ;;  %v2231_v61 = vld [vmem:[%s2774_s1 + $0x3c8] sm:$0xff] }
  0x59   :  { %1400 = vmatpush.bf16.msra.mxu3 %v2200_v3  ;;  %v2108_v3 = vld [vmem:[%s2775_s0 + $0x6c] sm:$0xf0] }
  0x5a   :  { %1347 = vmatpush.bf16.msra.mxu0 %v2175_v5  ;;  %v1570_v5 = vld [vmem:[%s2775_s0 + $0x70] sm:$0xf0] }
  0x5b   :  { %1365 = vmatpush.bf16.msra.mxu1 %v2183_v6  ;;  %v1576_v6 = vld [vmem:[%s2775_s0 + $0x38] sm:$0xf] }
  0x5c   :  { %1383 = vmatpush.bf16.msra.mxu2 %v2191_v4  ;;  %v2100_v4 = vld [vmem:[%s2775_s0 + $0x34] sm:$0xf] }
  0x5d   :  { %1401 = vmatpush.bf16.msra.mxu3 %v2199_v7  ;;  %v2109_v7 = vld [vmem:[%s2775_s0 + $0x74] sm:$0xf0] }
  0x5e   :  { %1348 = vmatpush.bf16.msra.mxu0 %v2174_v10  ;;  %v1569_v10 = vor.u32 %v2108_v3, %v1568_v2 }
  0x5f   :  { %1366 = vmatpush.bf16.msra.mxu1 %v2182_v11  ;;  %v1573_v11 = vor.u32 %v2100_v4, %v1570_v5 }
  0x60   :  { %1384 = vmatpush.bf16.msra.mxu2 %v2190_v8  ;;  %v2101_v8 = vld [vmem:[%s2775_s0 + $0x3c] sm:$0xf] }
  0x61   :  { %1402 = vmatpush.bf16.msra.mxu3 %v2198_v12  ;;  %1349 = vmatmul.bf16.vlgmr.msra.gmra.mxu0 %v1553_v25  ;;  %v1577_v12 = vor.u32 %v2109_v7, %v1576_v6 }
  0x62   :  { %1413 = vmatpush.bf16.msrb.mxu0 %v2213_v15  ;;  %1367 = vmatmul.bf16.vlgmr.msra.gmra.mxu1 %v1557_v27  ;;  %v36_v15 = vld [vmem:[%s2775_s0 + $0xb8] sm:$0xff] }
  0x63   :  { %1431 = vmatpush.bf16.msrb.mxu1 %v2221_v16  ;;  %1385 = vmatmul.bf16.vlgmr.msra.gmra.mxu2 %v1561_v28  ;;  %v361_v16 = vunpack.c.l.b16 %v35_v14 }
  0x64   :  { %1449 = vmatpush.bf16.msrb.mxu2 %v2229_v9  ;;  %1403 = vmatmul.bf16.vlgmr.msra.gmra.mxu3 %v1565_v29  ;;  %v1578_v9 = vld [vmem:[%s2775_s0 + $0x78] sm:$0xf0] }
  0x65   :  { %1467 = vmatpush.bf16.msrb.mxu3 %v2237_v18  ;;  %v1581_v13 = vor.u32 %v2101_v8, %v1578_v9  ;;  %v363_v18 = vunpack.c.l.b16 %v36_v15  ;;  %v393_v20 = vpack.c.b16 %v361_v16, %v361_v16 }
  0x66   :  { %1414 = vmatpush.bf16.msrb.mxu0 %v2212_v30 }
  0x67   :  { %1432 = vmatpush.bf16.msrb.mxu1 %v2220_v26  ;;  %v395_v22 = vpack.c.b16 %v363_v18, %v363_v18 }
  0x68   :  { %1450 = vmatpush.bf16.msrb.mxu2 %v2228_v19  ;;  %v364_v19 = vunpack.c.h.b16 %v36_v15 }
  0x69   :  { %1468 = vmatpush.bf16.msrb.mxu3 %v2236_v31 }
  0x6a   :  { %1415 = vmatpush.bf16.msrb.mxu0 %v2211_v34  ;;  %v396_v23 = vpack.c.b16 %v364_v19, %v364_v19 }
  0x6b   :  { %1433 = vmatpush.bf16.msrb.mxu1 %v2219_v33 }
  0x6c   :  { %1451 = vmatpush.bf16.msrb.mxu2 %v2227_v32 }
  0x6d   :  { %1469 = vmatpush.bf16.msrb.mxu3 %v2235_v35 }
  0x6e   :  { %1416 = vmatpush.bf16.msrb.mxu0 %v2210_v39 }
  0x6f   :  { %1434 = vmatpush.bf16.msrb.mxu1 %v2218_v37 }
  0x70   :  { %1452 = vmatpush.bf16.msrb.mxu2 %v2226_v36 }
  0x71   :  { %1470 = vmatpush.bf16.msrb.mxu3 %v2234_v41  ;;  %1354 = vmatmul.bf16.gmra.mxu0 %v389_v51 }
  0x72   :  { %1417 = vmatpush.bf16.msrb.mxu0 %v2209_v48  ;;  %1372 = vmatmul.bf16.gmra.mxu1 %v390_v53 }
  0x73   :  { %1435 = vmatpush.bf16.msrb.mxu1 %v2217_v44  ;;  %1390 = vmatmul.bf16.gmra.mxu2 %v391_v54 }
  0x74   :  { %1453 = vmatpush.bf16.msrb.mxu2 %v2225_v42  ;;  %1408 = vmatmul.bf16.gmra.mxu3 %v392_v55 }
  0x75   :  { %1471 = vmatpush.bf16.msrb.mxu3 %v2233_v49 }
  0x76   :  { %1418 = vmatpush.bf16.msrb.mxu0 %v2208_v56 }
  0x77   :  { %1436 = vmatpush.bf16.msrb.mxu1 %v2216_v52 }
  0x78   :  { %1454 = vmatpush.bf16.msrb.mxu2 %v2224_v50 }
  0x79   :  { %1472 = vmatpush.bf16.msrb.mxu3 %v2232_v57 }
  0x7a   :  { %1419 = vmatpush.bf16.msrb.mxu0 %v2207_v60 }
  0x7b   :  { %1437 = vmatpush.bf16.msrb.mxu1 %v2215_v59 }
  0x7c   :  { %1455 = vmatpush.bf16.msrb.mxu2 %v2223_v58 }
  0x7d   :  { %1473 = vmatpush.bf16.msrb.mxu3 %v2231_v61 }
  0x7e   :  { %1420 = vmatpush.bf16.msrb.mxu0 %v2206_v0 }
  0x7f   :  { %1438 = vmatpush.bf16.msrb.mxu1 %v2214_v63 }
  0x80   :  { %1456 = vmatpush.bf16.msrb.mxu2 %v2222_v62 }
  0x81   :  { %1474 = vmatpush.bf16.msrb.mxu3 %v2230_v1  ;;  %1421 = vmatmul.bf16.vlgmr.msrb.gmra.mxu0 %v1569_v10 }
  0x82   :  { %1439 = vmatmul.bf16.vlgmr.msrb.gmra.mxu1 %v1573_v11 }
  0x83   :  { %1457 = vmatmul.bf16.vlgmr.msrb.gmra.mxu2 %v1577_v12 }
  0x84   :  { %1475 = vmatmul.bf16.vlgmr.msrb.gmra.mxu3 %v1581_v13 }
  0x91   :  { %1426 = vmatmul.bf16.gmra.mxu0 %v393_v20 }
  0x92   :  { %1444 = vmatmul.bf16.gmra.mxu1 %v394_v21 }
  0x93   :  { %1462 = vmatmul.bf16.gmra.mxu2 %v395_v22 }
  0x94   :  { %1480 = vmatmul.bf16.gmra.mxu3 %v396_v23 }
  0x9e   :  { %v1206_v24 = vpop.f32.mrf.mxu0 }
  0x9f   :  { %v1224_v25 = vpop.f32.mrf.mxu1 }
  0xa0   :  { %v1225_v26 = vadd.f32 %v1224_v25, %v1206_v24 }
  0xa6   :  { %v1242_v27 = vpop.f32.mrf.mxu2  ;;  %v1208_v30 = vpop.f32.mrf.mxu0 }
  0xa7   :  { %v1260_v28 = vpop.f32.mrf.mxu3  ;;  %v1243_v29 = vadd.f32 %v1242_v27, %v1225_v26  ;;  %v1226_v31 = vpop.f32.mrf.mxu1 }
  0xa8   :  { %v1227_v32 = vadd.f32 %v1226_v31, %v1208_v30 }
  0xa9   :  { %v1261_v33 = vadd.f32 %v1260_v28, %v1243_v29 }
  0xae   :  { %v1244_v34 = vpop.f32.mrf.mxu2  ;;  %v1211_v37 = vpop.f32.mrf.mxu0 }
  0xaf   :  { %v1262_v35 = vpop.f32.mrf.mxu3  ;;  %v1245_v36 = vadd.f32 %v1244_v34, %v1227_v32  ;;  %v1229_v38 = vpop.f32.mrf.mxu1 }
  0xb0   :  { %v1230_v39 = vadd.f32 %v1229_v38, %v1211_v37 }
  0xb1   :  { %v1263_v40 = vadd.f32 %v1262_v35, %v1245_v36 }
  0xb6   :  { %v1247_v41 = vpop.f32.mrf.mxu2  ;;  %v1213_v44 = vpop.f32.mrf.mxu0 }
  0xb7   :  { %v1265_v42 = vpop.f32.mrf.mxu3  ;;  %v1248_v43 = vadd.f32 %v1247_v41, %v1230_v39  ;;  %v1231_v45 = vpop.f32.mrf.mxu1 }
  0xb9   :  { %v1266_v46 = vadd.f32 %v1265_v42, %v1248_v43 }
  0xbe   :  { %v1249_v47 = vpop.f32.mrf.mxu2  ;;  %v1278_v49 = vpop.f32.mrf.mxu0 }
  0xbf   :  { %v1267_v48 = vpop.f32.mrf.mxu3  ;;  %v1296_v50 = vpop.f32.mrf.mxu1  ;;  %v1279_v7 = vadd.f32 %v1278_v49, %v1261_v33 }
  0xc1   :  { %v1297_v8 = vadd.f32 %v1296_v50, %v1279_v7 }
  0xc6   :  { %v1314_v51 = vpop.f32.mrf.mxu2  ;;  %v1280_v53 = vpop.f32.mrf.mxu0 }
  0xc7   :  { %v1332_v52 = vpop.f32.mrf.mxu3  ;;  %v1298_v54 = vpop.f32.mrf.mxu1  ;;  %v1315_v10 = vadd.f32 %v1314_v51, %v1297_v8  ;;  %v1281_v14 = vadd.f32 %v1280_v53, %v1263_v40 }
  0xc9   :  { %v1333_v15 = vadd.f32 %v1332_v52, %v1315_v10  ;;  %v1299_v16 = vadd.f32 %v1298_v54, %v1281_v14 }
  0xce   :  { %v1316_v55 = vpop.f32.mrf.mxu2  ;;  %v1283_v57 = vpop.f32.mrf.mxu0 }
  0xcf   :  { %v1334_v56 = vpop.f32.mrf.mxu3  ;;  %v1301_v58 = vpop.f32.mrf.mxu1  ;;  %v1317_v19 = vadd.f32 %v1316_v55, %v1299_v16  ;;  %v1284_v23 = vadd.f32 %v1283_v57, %v1266_v46 }
  0xd1   :  { %v1335_v25 = vadd.f32 %v1334_v56, %v1317_v19  ;;  %v1302_v27 = vadd.f32 %v1301_v58, %v1284_v23 }
  0xd6   :  { %v1319_v59 = vpop.f32.mrf.mxu2  ;;  %v1285_v61 = vpop.f32.mrf.mxu0 }
  0xd7   :  { %v1337_v60 = vpop.f32.mrf.mxu3  ;;  %v1303_v62 = vpop.f32.mrf.mxu1  ;;  %v1320_v30 = vadd.f32 %v1319_v59, %v1302_v27 }
  0xd9   :  { %v1338_v37 = vadd.f32 %v1337_v60, %v1320_v30 }
  0xde   :  { %v1321_v63 = vpop.f32.mrf.mxu2  ;;  %v1350_v1 = vpop.f32.mrf.mxu0 }
  0xdf   :  { %v1339_v0 = vpop.f32.mrf.mxu3  ;;  %v1368_v2 = vpop.f32.mrf.mxu1  ;;  %v1351_v17 = vadd.f32 %v1350_v1, %v1333_v15 }
  0xe1   :  { %v1369_v24 = vadd.f32 %v1368_v2, %v1351_v17 }
  0xe6   :  { %v1386_v3 = vpop.f32.mrf.mxu2  ;;  %v1352_v5 = vpop.f32.mrf.mxu0 }
  0xe7   :  { %v1404_v4 = vpop.f32.mrf.mxu3  ;;  %v1370_v6 = vpop.f32.mrf.mxu1  ;;  %v1387_v26 = vadd.f32 %v1386_v3, %v1369_v24  ;;  %v1353_v28 = vadd.f32 %v1352_v5, %v1335_v25 }
  0xe9   :  { %v1405_v31 = vadd.f32 %v1404_v4, %v1387_v26  ;;  %v1371_v35 = vadd.f32 %v1370_v6, %v1353_v28 }
  0xee   :  { %v1388_v9 = vpop.f32.mrf.mxu2  ;;  %v1355_v12 = vpop.f32.mrf.mxu0 }
  0xef   :  { %v1406_v11 = vpop.f32.mrf.mxu3  ;;  %v1373_v13 = vpop.f32.mrf.mxu1  ;;  %v1389_v38 = vadd.f32 %v1388_v9, %v1371_v35  ;;  %v1356_v39 = vadd.f32 %v1355_v12, %v1338_v37 }
  0xf1   :  { %v1407_v42 = vadd.f32 %v1406_v11, %v1389_v38  ;;  %v1374_v47 = vadd.f32 %v1373_v13, %v1356_v39 }
  0xf6   :  { %v1391_v18 = vpop.f32.mrf.mxu2  ;;  %v1357_v21 = vpop.f32.mrf.mxu0 }
  0xf7   :  { %v1409_v20 = vpop.f32.mrf.mxu3  ;;  %v1375_v22 = vpop.f32.mrf.mxu1  ;;  %v1392_v50 = vadd.f32 %v1391_v18, %v1374_v47 }
  0xf9   :  { %v1410_v53 = vadd.f32 %v1409_v20, %v1392_v50 }
  0xfe   :  { %v1393_v29 = vpop.f32.mrf.mxu2  ;;  %v1422_v33 = vpop.f32.mrf.mxu0 }
  0xff   :  { %v1411_v32 = vpop.f32.mrf.mxu3  ;;  %v1440_v34 = vpop.f32.mrf.mxu1  ;;  %v1423_v36 = vadd.f32 %v1422_v33, %v1405_v31 }
 0x101   :  { %v1441_v40 = vadd.f32 %v1440_v34, %v1423_v36 }
 0x106   :  { %v1458_v41 = vpop.f32.mrf.mxu2  ;;  %v1424_v45 = vpop.f32.mrf.mxu0 }
 0x107   :  { %v1459_v43 = vadd.f32 %v1458_v41, %v1441_v40  ;;  %v1476_v44 = vpop.f32.mrf.mxu3  ;;  %v1442_v46 = vpop.f32.mrf.mxu1  ;;  %v1425_v49 = vadd.f32 %v1424_v45, %v1407_v42 }
 0x109   :  { %v1477_v48 = vadd.f32 %v1476_v44, %v1459_v43  ;;  %v1443_v51 = vadd.f32 %v1442_v46, %v1425_v49 }
 0x10b   :  { %1507 = vst [vmem:[%s2776_s2] sm:$0xff] %v1477_v48  ;;  %v1493_v60 = vmul.f32 %v1477_v48, %v1477_v48 }
 0x10e   :  { %v1460_v52 = vpop.f32.mrf.mxu2  ;;  %v1427_v56 = vpop.f32.mrf.mxu0 }
 0x10f   :  { %v1461_v54 = vadd.f32 %v1460_v52, %v1443_v51  ;;  %v1478_v55 = vpop.f32.mrf.mxu3  ;;  %v1445_v57 = vpop.f32.mrf.mxu1  ;;  %v1428_v59 = vadd.f32 %v1427_v56, %v1410_v53 }
 0x111   :  { %v1479_v58 = vadd.f32 %v1478_v55, %v1461_v54  ;;  %v1446_v0 = vadd.f32 %v1445_v57, %v1428_v59 }
 0x113   :  { %v1485_v61 = vadd.f32 %v1479_v58, %v1477_v48  ;;  %v1494_v62 = vmul.f32 %v1479_v58, %v1479_v58  ;;  %1508 = vst [vmem:[%s2776_s2 + $0x8] sm:$0xff] %v1479_v58 }
 0x115   :  { %v1496_v63 = vadd.f32 %v1494_v62, %v1493_v60 }
 0x116   :  { %v1463_v1 = vpop.f32.mrf.mxu2  ;;  %v1429_v4 = vpop.f32.mrf.mxu0 }
 0x117   :  { %v1464_v2 = vadd.f32 %v1463_v1, %v1446_v0  ;;  %v1481_v3 = vpop.f32.mrf.mxu3  ;;  %v1447_v5 = vpop.f32.mrf.mxu1 }
 0x119   :  { %v1482_v6 = vadd.f32 %v1481_v3, %v1464_v2 }
 0x11b   :  { %v1486_v7 = vadd.f32 %v1485_v61, %v1482_v6  ;;  %v1495_v8 = vmul.f32 %v1482_v6, %v1482_v6  ;;  %1509 = vst [vmem:[%s2776_s2 + $0x10] sm:$0xff] %v1482_v6 }
 0x11d   :  { %v1487_v9 = vrot.slane %v1486_v7, 4  ;;  %v1497_v10 = vadd.f32 %v1496_v63, %v1495_v8 }
 0x11e   :  { %v1465_v11 = vpop.f32.mrf.mxu2 }
 0x11f   :  { %v1488_v12 = vadd.f32 %v1487_v9, %v1486_v7  ;;  %v1498_v13 = vrot.slane %v1497_v10, 4  ;;  %v1483_v14 = vpop.f32.mrf.mxu3 }
 0x121   :  { %v1489_v15 = vrot.slane %v1488_v12, 2  ;;  %v1499_v16 = vadd.f32 %v1498_v13, %v1497_v10 }
 0x123   :  { %v1490_v17 = vadd.f32 %v1489_v15, %v1488_v12  ;;  %v1500_v18 = vrot.slane %v1499_v16, 2 }
 0x125   :  { %v1491_v19 = vrot.slane %v1490_v17, 1  ;;  %v1501_v20 = vadd.f32 %v1500_v18, %v1499_v16 }
 0x127   :  { %v1502_v21 = vrot.slane %v1501_v20, 1  ;;  %v1492_v22 = vadd.f32 %v1491_v19, %v1490_v17 }
 0x129   :  { %v1503_v23 = vadd.f32 %v1502_v21, %v1501_v20 }
 0x12b   :  { %v1505_v24 = vsel %vm1504_vm0, %v1492_v22, %v1503_v23 }
 0x12c   :  { %1506 = vst [vmem:[%s2777_s3] sm:$0x3] %v1505_v24 }

// kernel: discriminator_forward.15
= control target key start
LH: loop header
LB: loop body
LE: loop exit
PB: predicated region body
PF: predicated region fallthrough
CT: control target
= control target key end

     0   :  { %s2449_s0 = inlined_call_operand.vmem [shape: bf16[8,2048], index: 0, kind: input, shape index: {}]   ;;  %s2450_s1 = inlined_call_operand.vmem [shape: bf16[2048,128], index: 1, kind: input, shape index: {}]   ;;  %s2451_s2 = inlined_call_operand.vmem [shape: f32[8,128], index: 2, kind: output, shape index: {0}]   ;;  %s2452_s3 = inlined_call_operand.hbm [shape: f32[1,2,128], index: 3, kind: output, shape index: {1}]  }
   0x1   :  { %v1866_v0 = vld [vmem:[%s2450_s1 + $0x38] sm:$0xff]  ;;  %v1865_v4 = vld [vmem:[%s2450_s1 + $0x30] sm:$0xff]  ;;  %v1864_v8 = vld [vmem:[%s2450_s1 + $0x28] sm:$0xff] }
   0x2   :  { %v1874_v1 = vld [vmem:[%s2450_s1 + $0x78] sm:$0xff]  ;;  %1102 = vmatpush.bf16.msra.mxu0 %v1866_v0  ;;  %v1873_v5 = vld [vmem:[%s2450_s1 + $0x70] sm:$0xff]  ;;  %v1872_v9 = vld [vmem:[%s2450_s1 + $0x68] sm:$0xff] }
   0x3   :  { %v1882_v2 = vld [vmem:[%s2450_s1 + $0xb8] sm:$0xff]  ;;  %1115 = vmatpush.bf16.msra.mxu1 %v1874_v1  ;;  %v1881_v6 = vld [vmem:[%s2450_s1 + $0xb0] sm:$0xff]  ;;  %v1880_v10 = vld [vmem:[%s2450_s1 + $0xa8] sm:$0xff] }
   0x4   :  { %v1890_v3 = vld [vmem:[%s2450_s1 + $0xf8] sm:$0xff]  ;;  %1128 = vmatpush.bf16.msra.mxu2 %v1882_v2  ;;  %v1889_v7 = vld [vmem:[%s2450_s1 + $0xf0] sm:$0xff]  ;;  %v1888_v11 = vld [vmem:[%s2450_s1 + $0xe8] sm:$0xff] }
   0x5   :  { %1141 = vmatpush.bf16.msra.mxu3 %v1890_v3  ;;  %v1863_v12 = vld [vmem:[%s2450_s1 + $0x20] sm:$0xff]  ;;  %v1862_v16 = vld [vmem:[%s2450_s1 + $0x18] sm:$0xff]  ;;  %v1861_v20 = vld [vmem:[%s2450_s1 + $0x10] sm:$0xff] }
   0x6   :  { %1103 = vmatpush.bf16.msra.mxu0 %v1865_v4  ;;  %v1871_v13 = vld [vmem:[%s2450_s1 + $0x60] sm:$0xff]  ;;  %v1870_v17 = vld [vmem:[%s2450_s1 + $0x58] sm:$0xff]  ;;  %v1869_v21 = vld [vmem:[%s2450_s1 + $0x50] sm:$0xff] }
   0x7   :  { %1116 = vmatpush.bf16.msra.mxu1 %v1873_v5  ;;  %v1879_v14 = vld [vmem:[%s2450_s1 + $0xa0] sm:$0xff]  ;;  %v1878_v18 = vld [vmem:[%s2450_s1 + $0x98] sm:$0xff] }
   0x8   :  { %1129 = vmatpush.bf16.msra.mxu2 %v1881_v6  ;;  %v1887_v15 = vld [vmem:[%s2450_s1 + $0xe0] sm:$0xff]  ;;  %v1886_v19 = vld [vmem:[%s2450_s1 + $0xd8] sm:$0xff] }
   0x9   :  { %1142 = vmatpush.bf16.msra.mxu3 %v1889_v7 }
   0xa   :  { %1104 = vmatpush.bf16.msra.mxu0 %v1864_v8 }
   0xb   :  { %1117 = vmatpush.bf16.msra.mxu1 %v1872_v9 }
   0xc   :  { %1130 = vmatpush.bf16.msra.mxu2 %v1880_v10 }
   0xd   :  { %1143 = vmatpush.bf16.msra.mxu3 %v1888_v11 }
   0xe   :  { %1105 = vmatpush.bf16.msra.mxu0 %v1863_v12 }
   0xf   :  { %1118 = vmatpush.bf16.msra.mxu1 %v1871_v13 }
  0x10   :  { %1131 = vmatpush.bf16.msra.mxu2 %v1879_v14 }
  0x11   :  { %1144 = vmatpush.bf16.msra.mxu3 %v1887_v15 }
  0x12   :  { %1106 = vmatpush.bf16.msra.mxu0 %v1862_v16 }
  0x13   :  { %1119 = vmatpush.bf16.msra.mxu1 %v1870_v17 }
  0x14   :  { %9 = vsyncpa [#allocation3], 0  ;;  %1132 = vmatpush.bf16.msra.mxu2 %v1878_v18  ;;  %v1877_v22 = vld [vmem:[%s2450_s1 + $0x90] sm:$0xff]  ;;  %v1860_v24 = vld [vmem:[%s2450_s1 + $0x8] sm:$0xff]  ;;  %s2014_s14 = smov [#allocation2]   ;;  %s1336_s18 = sshll.u32 %s2452_s3, 4  ;;  %s1337_s18 = int_to_ptr.hbm [resolvable:$true] %s1336_s18 }
  0x15   :  { %1145 = vmatpush.bf16.msra.mxu3 %v1886_v19  ;;  %v1885_v23 = vld [vmem:[%s2450_s1 + $0xd0] sm:$0xff]  ;;  %v1868_v25 = vld [vmem:[%s2450_s1 + $0x48] sm:$0xff]  ;;  %v14_v29 = vld [vmem:[%s2449_s0] sm:$0xff]  ;;  %s1334_s15 = sshll.u32 %s2014_s14, 4  ;;  %vm1323_vm0 = vcmask 1040384   ;;  %s1335_s15 = int_to_ptr.vmem [resolvable:$true] %s1334_s15 }
  0x16   :  { %1107 = vmatpush.bf16.msra.mxu0 %v1861_v20  ;;  %v1876_v26 = vld [vmem:[%s2450_s1 + $0x88] sm:$0xff]  ;;  %v1859_v30 = vld [vmem:[%s2450_s1] sm:$0xff]  ;;  %v286_v33 = vunpack.c.l.b16 %v14_v29  ;;  %v287_v37 = vunpack.c.h.b16 %v14_v29  ;;  %v1898_v38 = vld [vmem:[%s2450_s1 + $0x138] sm:$0xff] }
  0x17   :  { %1120 = vmatpush.bf16.msra.mxu1 %v1869_v21  ;;  %v1884_v27 = vld [vmem:[%s2450_s1 + $0xc8] sm:$0xff]  ;;  %v1867_v31 = vld [vmem:[%s2450_s1 + $0x40] sm:$0xff]  ;;  %v1906_v39 = vld [vmem:[%s2450_s1 + $0x178] sm:$0xff] }
  0x18   :  { %1133 = vmatpush.bf16.msra.mxu2 %v1877_v22  ;;  %v15_v28 = vld [vmem:[%s2449_s0 + $0x8] sm:$0xff]  ;;  %v1875_v34 = vld [vmem:[%s2450_s1 + $0x80] sm:$0xff]  ;;  %v1914_v40 = vld [vmem:[%s2450_s1 + $0x1b8] sm:$0xff]  ;;  %v302_v43 = vpack.c.b16 %v286_v33, %v286_v33  ;;  %v303_v45 = vpack.c.b16 %v287_v37, %v287_v37 }
  0x19   :  { %1146 = vmatpush.bf16.msra.mxu3 %v1885_v23  ;;  %v288_v32 = vunpack.c.l.b16 %v15_v28  ;;  %v1883_v35 = vld [vmem:[%s2450_s1 + $0xc0] sm:$0xff]  ;;  %v289_v36 = vunpack.c.h.b16 %v15_v28  ;;  %v1922_v41 = vld [vmem:[%s2450_s1 + $0x1f8] sm:$0xff]  ;;  %v1897_v46 = vld [vmem:[%s2450_s1 + $0x130] sm:$0xff] }
  0x1a   :  { %1108 = vmatpush.bf16.msra.mxu0 %v1860_v24  ;;  %v1905_v47 = vld [vmem:[%s2450_s1 + $0x170] sm:$0xff]  ;;  %v1896_v50 = vld [vmem:[%s2450_s1 + $0x128] sm:$0xff]  ;;  %v1895_v54 = vld [vmem:[%s2450_s1 + $0x120] sm:$0xff] }
  0x1b   :  { %1121 = vmatpush.bf16.msra.mxu1 %v1868_v25  ;;  %v304_v42 = vpack.c.b16 %v288_v32, %v288_v32  ;;  %v305_v44 = vpack.c.b16 %v289_v36, %v289_v36  ;;  %v1913_v48 = vld [vmem:[%s2450_s1 + $0x1b0] sm:$0xff]  ;;  %v1904_v51 = vld [vmem:[%s2450_s1 + $0x168] sm:$0xff]  ;;  %v1903_v55 = vld [vmem:[%s2450_s1 + $0x160] sm:$0xff] }
  0x1c   :  { %1134 = vmatpush.bf16.msra.mxu2 %v1876_v26  ;;  %v1921_v49 = vld [vmem:[%s2450_s1 + $0x1f0] sm:$0xff]  ;;  %v1912_v52 = vld [vmem:[%s2450_s1 + $0x1a8] sm:$0xff]  ;;  %v1911_v56 = vld [vmem:[%s2450_s1 + $0x1a0] sm:$0xff] }
  0x1d   :  { %1147 = vmatpush.bf16.msra.mxu3 %v1884_v27  ;;  %v1920_v53 = vld [vmem:[%s2450_s1 + $0x1e8] sm:$0xff]  ;;  %v1919_v57 = vld [vmem:[%s2450_s1 + $0x1e0] sm:$0xff]  ;;  %v1894_v58 = vld [vmem:[%s2450_s1 + $0x118] sm:$0xff] }
  0x1e   :  { %1109 = vmatpush.bf16.msra.mxu0 %v1859_v30  ;;  %v1902_v59 = vld [vmem:[%s2450_s1 + $0x158] sm:$0xff]  ;;  %v1893_v62 = vld [vmem:[%s2450_s1 + $0x110] sm:$0xff]  ;;  %v1892_v2 = vld [vmem:[%s2450_s1 + $0x108] sm:$0xff] }
  0x1f   :  { %1122 = vmatpush.bf16.msra.mxu1 %v1867_v31  ;;  %v1910_v60 = vld [vmem:[%s2450_s1 + $0x198] sm:$0xff]  ;;  %v1901_v63 = vld [vmem:[%s2450_s1 + $0x150] sm:$0xff]  ;;  %v1900_v3 = vld [vmem:[%s2450_s1 + $0x148] sm:$0xff] }
  0x20   :  { %1135 = vmatpush.bf16.msra.mxu2 %v1875_v34  ;;  %v1918_v61 = vld [vmem:[%s2450_s1 + $0x1d8] sm:$0xff]  ;;  %v1909_v0 = vld [vmem:[%s2450_s1 + $0x190] sm:$0xff]  ;;  %v1908_v4 = vld [vmem:[%s2450_s1 + $0x188] sm:$0xff] }
  0x21   :  { %1148 = vmatpush.bf16.msra.mxu3 %v1883_v35  ;;  %1110 = vmatmul.bf16.vlgmr.msra.gmra.mxu0 %v302_v43  ;;  %v1917_v1 = vld [vmem:[%s2450_s1 + $0x1d0] sm:$0xff]  ;;  %v1916_v5 = vld [vmem:[%s2450_s1 + $0x1c8] sm:$0xff]  ;;  %v17_v6 = vld [vmem:[%s2449_s0 + $0x18] sm:$0xff] }
  0x22   :  { %1154 = vmatpush.bf16.msrb.mxu0 %v1898_v38  ;;  %1123 = vmatmul.bf16.vlgmr.msra.gmra.mxu1 %v303_v45  ;;  %v16_v7 = vld [vmem:[%s2449_s0 + $0x10] sm:$0xff]  ;;  %v1891_v8 = vld [vmem:[%s2450_s1 + $0x100] sm:$0xff]  ;;  %v292_v10 = vunpack.c.l.b16 %v17_v6  ;;  %v293_v14 = vunpack.c.h.b16 %v17_v6  ;;  %v1930_v16 = vld [vmem:[%s2450_s1 + $0x238] sm:$0xff] }
  0x23   :  { %1167 = vmatpush.bf16.msrb.mxu1 %v1906_v39  ;;  %1136 = vmatmul.bf16.vlgmr.msra.gmra.mxu2 %v304_v42  ;;  %v1899_v9 = vld [vmem:[%s2450_s1 + $0x140] sm:$0xff]  ;;  %v290_v11 = vunpack.c.l.b16 %v16_v7  ;;  %v291_v15 = vunpack.c.h.b16 %v16_v7  ;;  %v1938_v17 = vld [vmem:[%s2450_s1 + $0x278] sm:$0xff]  ;;  %v1929_v24 = vld [vmem:[%s2450_s1 + $0x230] sm:$0xff] }
  0x24   :  { %1180 = vmatpush.bf16.msrb.mxu2 %v1914_v40  ;;  %1149 = vmatmul.bf16.vlgmr.msra.gmra.mxu3 %v305_v44  ;;  %v1907_v12 = vld [vmem:[%s2450_s1 + $0x180] sm:$0xff]  ;;  %v1946_v18 = vld [vmem:[%s2450_s1 + $0x2b8] sm:$0xff]  ;;  %v308_v20 = vpack.c.b16 %v292_v10, %v292_v10  ;;  %v309_v22 = vpack.c.b16 %v293_v14, %v293_v14  ;;  %v1937_v25 = vld [vmem:[%s2450_s1 + $0x270] sm:$0xff] }
  0x25   :  { %1193 = vmatpush.bf16.msrb.mxu3 %v1922_v41  ;;  %v1915_v13 = vld [vmem:[%s2450_s1 + $0x1c0] sm:$0xff]  ;;  %v1954_v19 = vld [vmem:[%s2450_s1 + $0x2f8] sm:$0xff]  ;;  %v306_v21 = vpack.c.b16 %v290_v11, %v290_v11  ;;  %v307_v23 = vpack.c.b16 %v291_v15, %v291_v15  ;;  %v1945_v26 = vld [vmem:[%s2450_s1 + $0x2b0] sm:$0xff] }
  0x26   :  { %1155 = vmatpush.bf16.msrb.mxu0 %v1897_v46  ;;  %v1953_v27 = vld [vmem:[%s2450_s1 + $0x2f0] sm:$0xff]  ;;  %v1928_v28 = vld [vmem:[%s2450_s1 + $0x228] sm:$0xff]  ;;  %v1927_v32 = vld [vmem:[%s2450_s1 + $0x220] sm:$0xff] }
  0x27   :  { %1168 = vmatpush.bf16.msrb.mxu1 %v1905_v47  ;;  %v1936_v29 = vld [vmem:[%s2450_s1 + $0x268] sm:$0xff]  ;;  %v1935_v33 = vld [vmem:[%s2450_s1 + $0x260] sm:$0xff]  ;;  %v1926_v36 = vld [vmem:[%s2450_s1 + $0x218] sm:$0xff] }
  0x28   :  { %1181 = vmatpush.bf16.msrb.mxu2 %v1913_v48  ;;  %v1944_v30 = vld [vmem:[%s2450_s1 + $0x2a8] sm:$0xff]  ;;  %v1943_v34 = vld [vmem:[%s2450_s1 + $0x2a0] sm:$0xff]  ;;  %v1934_v37 = vld [vmem:[%s2450_s1 + $0x258] sm:$0xff] }
  0x29   :  { %1194 = vmatpush.bf16.msrb.mxu3 %v1921_v49  ;;  %v1952_v31 = vld [vmem:[%s2450_s1 + $0x2e8] sm:$0xff]  ;;  %v1951_v35 = vld [vmem:[%s2450_s1 + $0x2e0] sm:$0xff]  ;;  %v1942_v38 = vld [vmem:[%s2450_s1 + $0x298] sm:$0xff] }
  0x2a   :  { %1156 = vmatpush.bf16.msrb.mxu0 %v1896_v50  ;;  %v1950_v39 = vld [vmem:[%s2450_s1 + $0x2d8] sm:$0xff]  ;;  %v1925_v40 = vld [vmem:[%s2450_s1 + $0x210] sm:$0xff]  ;;  %v1924_v44 = vld [vmem:[%s2450_s1 + $0x208] sm:$0xff] }
  0x2b   :  { %1169 = vmatpush.bf16.msrb.mxu1 %v1904_v51  ;;  %v1933_v41 = vld [vmem:[%s2450_s1 + $0x250] sm:$0xff]  ;;  %v1932_v45 = vld [vmem:[%s2450_s1 + $0x248] sm:$0xff]  ;;  %v18_v48 = vld [vmem:[%s2449_s0 + $0x20] sm:$0xff] }
  0x2c   :  { %1182 = vmatpush.bf16.msrb.mxu2 %v1912_v52  ;;  %v1941_v42 = vld [vmem:[%s2450_s1 + $0x290] sm:$0xff]  ;;  %v1940_v46 = vld [vmem:[%s2450_s1 + $0x288] sm:$0xff]  ;;  %v1923_v50 = vld [vmem:[%s2450_s1 + $0x200] sm:$0xff]  ;;  %v294_v52 = vunpack.c.l.b16 %v18_v48 }
  0x2d   :  { %1195 = vmatpush.bf16.msrb.mxu3 %v1920_v53  ;;  %v1949_v43 = vld [vmem:[%s2450_s1 + $0x2d0] sm:$0xff]  ;;  %v1948_v47 = vld [vmem:[%s2450_s1 + $0x2c8] sm:$0xff]  ;;  %v1931_v51 = vld [vmem:[%s2450_s1 + $0x240] sm:$0xff] }
  0x2e   :  { %1157 = vmatpush.bf16.msrb.mxu0 %v1895_v54  ;;  %v19_v49 = vld [vmem:[%s2449_s0 + $0x28] sm:$0xff]  ;;  %v1939_v54 = vld [vmem:[%s2450_s1 + $0x280] sm:$0xff]  ;;  %v1958_v14 = vld [vmem:[%s2450_s1 + $0x318] sm:$0xff] }
  0x2f   :  { %1170 = vmatpush.bf16.msrb.mxu1 %v1903_v55  ;;  %v296_v53 = vunpack.c.l.b16 %v19_v49  ;;  %v1947_v55 = vld [vmem:[%s2450_s1 + $0x2c0] sm:$0xff]  ;;  %v1960_v6 = vld [vmem:[%s2450_s1 + $0x328] sm:$0xff]  ;;  %v1966_v15 = vld [vmem:[%s2450_s1 + $0x358] sm:$0xff] }
  0x30   :  { %1183 = vmatpush.bf16.msrb.mxu2 %v1911_v56  ;;  %v295_v56 = vunpack.c.h.b16 %v18_v48  ;;  %v1968_v7 = vld [vmem:[%s2450_s1 + $0x368] sm:$0xff]  ;;  %v1959_v10 = vld [vmem:[%s2450_s1 + $0x320] sm:$0xff] }
  0x31   :  { %1196 = vmatpush.bf16.msrb.mxu3 %v1919_v57  ;;  %v297_v57 = vunpack.c.h.b16 %v19_v49  ;;  %v1967_v11 = vld [vmem:[%s2450_s1 + $0x360] sm:$0xff] }
  0x32   :  { %1158 = vmatpush.bf16.msrb.mxu0 %v1894_v58  ;;  %v1962_v58 = vld [vmem:[%s2450_s1 + $0x338] sm:$0xff] }
  0x33   :  { %1171 = vmatpush.bf16.msrb.mxu1 %v1902_v59  ;;  %v1970_v59 = vld [vmem:[%s2450_s1 + $0x378] sm:$0xff] }
  0x34   :  { %1184 = vmatpush.bf16.msrb.mxu2 %v1910_v60  ;;  %v1978_v60 = vld [vmem:[%s2450_s1 + $0x3b8] sm:$0xff] }
  0x35   :  { %1197 = vmatpush.bf16.msrb.mxu3 %v1918_v61  ;;  %v1986_v61 = vld [vmem:[%s2450_s1 + $0x3f8] sm:$0xff] }
  0x36   :  { %1159 = vmatpush.bf16.msrb.mxu0 %v1893_v62  ;;  %v310_v62 = vpack.c.b16 %v294_v52, %v294_v52 }
  0x37   :  { %1172 = vmatpush.bf16.msrb.mxu1 %v1901_v63  ;;  %v312_v63 = vpack.c.b16 %v296_v53, %v296_v53 }
  0x38   :  { %1185 = vmatpush.bf16.msrb.mxu2 %v1909_v0  ;;  %v311_v0 = vpack.c.b16 %v295_v56, %v295_v56 }
  0x39   :  { %1198 = vmatpush.bf16.msrb.mxu3 %v1917_v1  ;;  %v313_v1 = vpack.c.b16 %v297_v57, %v297_v57 }
  0x3a   :  { %1160 = vmatpush.bf16.msrb.mxu0 %v1892_v2  ;;  %v1961_v2 = vld [vmem:[%s2450_s1 + $0x330] sm:$0xff] }
  0x3b   :  { %1173 = vmatpush.bf16.msrb.mxu1 %v1900_v3  ;;  %v1969_v3 = vld [vmem:[%s2450_s1 + $0x370] sm:$0xff] }
  0x3c   :  { %1186 = vmatpush.bf16.msrb.mxu2 %v1908_v4  ;;  %v1977_v4 = vld [vmem:[%s2450_s1 + $0x3b0] sm:$0xff] }
  0x3d   :  { %1199 = vmatpush.bf16.msrb.mxu3 %v1916_v5  ;;  %v1985_v5 = vld [vmem:[%s2450_s1 + $0x3f0] sm:$0xff] }
  0x3e   :  { %1161 = vmatpush.bf16.msrb.mxu0 %v1891_v8  ;;  %v1976_v8 = vld [vmem:[%s2450_s1 + $0x3a8] sm:$0xff] }
  0x3f   :  { %1174 = vmatpush.bf16.msrb.mxu1 %v1899_v9  ;;  %v1984_v9 = vld [vmem:[%s2450_s1 + $0x3e8] sm:$0xff] }
  0x40   :  { %1187 = vmatpush.bf16.msrb.mxu2 %v1907_v12  ;;  %v1975_v12 = vld [vmem:[%s2450_s1 + $0x3a0] sm:$0xff] }
  0x41   :  { %1200 = vmatpush.bf16.msrb.mxu3 %v1915_v13  ;;  %1162 = vmatmul.bf16.vlgmr.msrb.gmra.mxu0 %v306_v21  ;;  %v1983_v13 = vld [vmem:[%s2450_s1 + $0x3e0] sm:$0xff]  ;;  %v1981_v21 = vld [vmem:[%s2450_s1 + $0x3d0] sm:$0xff] }
  0x42   :  { %1206 = vmatpush.bf16.msra.mxu0 %v1930_v16  ;;  %1175 = vmatmul.bf16.vlgmr.msrb.gmra.mxu1 %v307_v23  ;;  %v1974_v16 = vld [vmem:[%s2450_s1 + $0x398] sm:$0xff]  ;;  %v1964_v23 = vld [vmem:[%s2450_s1 + $0x348] sm:$0xff] }
  0x43   :  { %1219 = vmatpush.bf16.msra.mxu1 %v1938_v17  ;;  %1188 = vmatmul.bf16.vlgmr.msrb.gmra.mxu2 %v308_v20  ;;  %v1982_v17 = vld [vmem:[%s2450_s1 + $0x3d8] sm:$0xff]  ;;  %v1973_v20 = vld [vmem:[%s2450_s1 + $0x390] sm:$0xff] }
  0x44   :  { %1232 = vmatpush.bf16.msra.mxu2 %v1946_v18  ;;  %1201 = vmatmul.bf16.vlgmr.msrb.gmra.mxu3 %v309_v22  ;;  %v1957_v18 = vld [vmem:[%s2450_s1 + $0x310] sm:$0xff]  ;;  %v1956_v22 = vld [vmem:[%s2450_s1 + $0x308] sm:$0xff] }
  0x45   :  { %1245 = vmatpush.bf16.msra.mxu3 %v1954_v19  ;;  %v1965_v19 = vld [vmem:[%s2450_s1 + $0x350] sm:$0xff] }
  0x46   :  { %1207 = vmatpush.bf16.msra.mxu0 %v1929_v24  ;;  %v20_v24 = vld [vmem:[%s2449_s0 + $0x30] sm:$0xff] }
  0x47   :  { %1220 = vmatpush.bf16.msra.mxu1 %v1937_v25  ;;  %v1972_v25 = vld [vmem:[%s2450_s1 + $0x388] sm:$0xff] }
  0x48   :  { %1233 = vmatpush.bf16.msra.mxu2 %v1945_v26  ;;  %v1980_v26 = vld [vmem:[%s2450_s1 + $0x3c8] sm:$0xff] }
  0x49   :  { %1246 = vmatpush.bf16.msra.mxu3 %v1953_v27  ;;  %v21_v27 = vld [vmem:[%s2449_s0 + $0x38] sm:$0xff] }
  0x4a   :  { %1208 = vmatpush.bf16.msra.mxu0 %v1928_v28  ;;  %v298_v28 = vunpack.c.l.b16 %v20_v24 }
  0x4b   :  { %1221 = vmatpush.bf16.msra.mxu1 %v1936_v29  ;;  %v299_v29 = vunpack.c.h.b16 %v20_v24 }
  0x4c   :  { %1234 = vmatpush.bf16.msra.mxu2 %v1944_v30  ;;  %v1955_v30 = vld [vmem:[%s2450_s1 + $0x300] sm:$0xff] }
  0x4d   :  { %1247 = vmatpush.bf16.msra.mxu3 %v1952_v31  ;;  %v1963_v31 = vld [vmem:[%s2450_s1 + $0x340] sm:$0xff] }
  0x4e   :  { %1209 = vmatpush.bf16.msra.mxu0 %v1927_v32  ;;  %v300_v32 = vunpack.c.l.b16 %v21_v27 }
  0x4f   :  { %1222 = vmatpush.bf16.msra.mxu1 %v1935_v33  ;;  %v301_v33 = vunpack.c.h.b16 %v21_v27 }
  0x50   :  { %1235 = vmatpush.bf16.msra.mxu2 %v1943_v34  ;;  %v1971_v34 = vld [vmem:[%s2450_s1 + $0x380] sm:$0xff] }
  0x51   :  { %1248 = vmatpush.bf16.msra.mxu3 %v1951_v35  ;;  %v1979_v35 = vld [vmem:[%s2450_s1 + $0x3c0] sm:$0xff] }
  0x52   :  { %1210 = vmatpush.bf16.msra.mxu0 %v1926_v36  ;;  %v314_v36 = vpack.c.b16 %v298_v28, %v298_v28 }
  0x53   :  { %1223 = vmatpush.bf16.msra.mxu1 %v1934_v37  ;;  %v315_v37 = vpack.c.b16 %v299_v29, %v299_v29 }
  0x54   :  { %1236 = vmatpush.bf16.msra.mxu2 %v1942_v38  ;;  %v316_v38 = vpack.c.b16 %v300_v32, %v300_v32 }
  0x55   :  { %1249 = vmatpush.bf16.msra.mxu3 %v1950_v39  ;;  %v317_v39 = vpack.c.b16 %v301_v33, %v301_v33 }
  0x56   :  { %1211 = vmatpush.bf16.msra.mxu0 %v1925_v40 }
  0x57   :  { %1224 = vmatpush.bf16.msra.mxu1 %v1933_v41 }
  0x58   :  { %1237 = vmatpush.bf16.msra.mxu2 %v1941_v42 }
  0x59   :  { %1250 = vmatpush.bf16.msra.mxu3 %v1949_v43 }
  0x5a   :  { %1212 = vmatpush.bf16.msra.mxu0 %v1924_v44 }
  0x5b   :  { %1225 = vmatpush.bf16.msra.mxu1 %v1932_v45 }
  0x5c   :  { %1238 = vmatpush.bf16.msra.mxu2 %v1940_v46 }
  0x5d   :  { %1251 = vmatpush.bf16.msra.mxu3 %v1948_v47 }
  0x5e   :  { %1213 = vmatpush.bf16.msra.mxu0 %v1923_v50 }
  0x5f   :  { %1226 = vmatpush.bf16.msra.mxu1 %v1931_v51 }
  0x60   :  { %1239 = vmatpush.bf16.msra.mxu2 %v1939_v54 }
  0x61   :  { %1252 = vmatpush.bf16.msra.mxu3 %v1947_v55  ;;  %1214 = vmatmul.bf16.vlgmr.msra.gmra.mxu0 %v310_v62 }
  0x62   :  { %1258 = vmatpush.bf16.msrb.mxu0 %v1962_v58  ;;  %1227 = vmatmul.bf16.vlgmr.msra.gmra.mxu1 %v311_v0 }
  0x63   :  { %1271 = vmatpush.bf16.msrb.mxu1 %v1970_v59  ;;  %1240 = vmatmul.bf16.vlgmr.msra.gmra.mxu2 %v312_v63 }
  0x64   :  { %1284 = vmatpush.bf16.msrb.mxu2 %v1978_v60  ;;  %1253 = vmatmul.bf16.vlgmr.msra.gmra.mxu3 %v313_v1 }
  0x65   :  { %1297 = vmatpush.bf16.msrb.mxu3 %v1986_v61 }
  0x66   :  { %1259 = vmatpush.bf16.msrb.mxu0 %v1961_v2 }
  0x67   :  { %1272 = vmatpush.bf16.msrb.mxu1 %v1969_v3 }
  0x68   :  { %1285 = vmatpush.bf16.msrb.mxu2 %v1977_v4 }
  0x69   :  { %1298 = vmatpush.bf16.msrb.mxu3 %v1985_v5 }
  0x6a   :  { %1260 = vmatpush.bf16.msrb.mxu0 %v1960_v6 }
  0x6b   :  { %1273 = vmatpush.bf16.msrb.mxu1 %v1968_v7 }
  0x6c   :  { %1286 = vmatpush.bf16.msrb.mxu2 %v1976_v8 }
  0x6d   :  { %1299 = vmatpush.bf16.msrb.mxu3 %v1984_v9 }
  0x6e   :  { %1261 = vmatpush.bf16.msrb.mxu0 %v1959_v10 }
  0x6f   :  { %1274 = vmatpush.bf16.msrb.mxu1 %v1967_v11 }
  0x70   :  { %1287 = vmatpush.bf16.msrb.mxu2 %v1975_v12 }
  0x71   :  { %1300 = vmatpush.bf16.msrb.mxu3 %v1983_v13 }
  0x72   :  { %1262 = vmatpush.bf16.msrb.mxu0 %v1958_v14 }
  0x73   :  { %1275 = vmatpush.bf16.msrb.mxu1 %v1966_v15 }
  0x74   :  { %1288 = vmatpush.bf16.msrb.mxu2 %v1974_v16 }
  0x75   :  { %1301 = vmatpush.bf16.msrb.mxu3 %v1982_v17 }
  0x76   :  { %1263 = vmatpush.bf16.msrb.mxu0 %v1957_v18 }
  0x77   :  { %1276 = vmatpush.bf16.msrb.mxu1 %v1965_v19 }
  0x78   :  { %1289 = vmatpush.bf16.msrb.mxu2 %v1973_v20 }
  0x79   :  { %1302 = vmatpush.bf16.msrb.mxu3 %v1981_v21 }
  0x7a   :  { %1264 = vmatpush.bf16.msrb.mxu0 %v1956_v22 }
  0x7b   :  { %1277 = vmatpush.bf16.msrb.mxu1 %v1964_v23 }
  0x7c   :  { %1290 = vmatpush.bf16.msrb.mxu2 %v1972_v25 }
  0x7d   :  { %1303 = vmatpush.bf16.msrb.mxu3 %v1980_v26 }
  0x7e   :  { %1265 = vmatpush.bf16.msrb.mxu0 %v1955_v30 }
  0x7f   :  { %1278 = vmatpush.bf16.msrb.mxu1 %v1963_v31 }
  0x80   :  { %1291 = vmatpush.bf16.msrb.mxu2 %v1971_v34 }
  0x81   :  { %1304 = vmatpush.bf16.msrb.mxu3 %v1979_v35  ;;  %1266 = vmatmul.bf16.vlgmr.msrb.gmra.mxu0 %v314_v36 }
  0x82   :  { %1279 = vmatmul.bf16.vlgmr.msrb.gmra.mxu1 %v315_v37 }
  0x83   :  { %1292 = vmatmul.bf16.vlgmr.msrb.gmra.mxu2 %v316_v38 }
  0x84   :  { %1305 = vmatmul.bf16.vlgmr.msrb.gmra.mxu3 %v317_v39 }
  0x9e   :  { %v1111_v40 = vpop.f32.mrf.mxu0 }
  0x9f   :  { %v1124_v41 = vpop.f32.mrf.mxu1 }
  0xa0   :  { %v1125_v42 = vadd.f32 %v1124_v41, %v1111_v40 }
  0xa6   :  { %v1137_v43 = vpop.f32.mrf.mxu2  ;;  %v1113_v46 = vpop.f32.mrf.mxu0 }
  0xa7   :  { %v1138_v44 = vadd.f32 %v1137_v43, %v1125_v42  ;;  %v1150_v45 = vpop.f32.mrf.mxu3  ;;  %v1126_v48 = vpop.f32.mrf.mxu1 }
  0xa9   :  { %v1151_v47 = vadd.f32 %v1150_v45, %v1138_v44 }
  0xae   :  { %v1139_v49 = vpop.f32.mrf.mxu2 }
  0xaf   :  { %v1152_v50 = vpop.f32.mrf.mxu3 }
  0xbe   :  { %v1163_v51 = vpop.f32.mrf.mxu0 }
  0xbf   :  { %v1176_v52 = vpop.f32.mrf.mxu1  ;;  %v1164_v61 = vadd.f32 %v1163_v51, %v1151_v47 }
  0xc1   :  { %v1177_v1 = vadd.f32 %v1176_v52, %v1164_v61 }
  0xc6   :  { %v1189_v53 = vpop.f32.mrf.mxu2  ;;  %v1165_v55 = vpop.f32.mrf.mxu0 }
  0xc7   :  { %v1202_v54 = vpop.f32.mrf.mxu3  ;;  %v1178_v56 = vpop.f32.mrf.mxu1  ;;  %v1190_v3 = vadd.f32 %v1189_v53, %v1177_v1 }
  0xc9   :  { %v1203_v6 = vadd.f32 %v1202_v54, %v1190_v3 }
  0xce   :  { %v1191_v57 = vpop.f32.mrf.mxu2 }
  0xcf   :  { %v1204_v58 = vpop.f32.mrf.mxu3 }
  0xde   :  { %v1215_v59 = vpop.f32.mrf.mxu0 }
  0xdf   :  { %v1228_v60 = vpop.f32.mrf.mxu1  ;;  %v1216_v7 = vadd.f32 %v1215_v59, %v1203_v6 }
  0xe1   :  { %v1229_v8 = vadd.f32 %v1228_v60, %v1216_v7 }
  0xe6   :  { %v1241_v62 = vpop.f32.mrf.mxu2  ;;  %v1217_v0 = vpop.f32.mrf.mxu0 }
  0xe7   :  { %v1254_v63 = vpop.f32.mrf.mxu3  ;;  %v1230_v2 = vpop.f32.mrf.mxu1  ;;  %v1242_v9 = vadd.f32 %v1241_v62, %v1229_v8 }
  0xe9   :  { %v1255_v10 = vadd.f32 %v1254_v63, %v1242_v9 }
  0xee   :  { %v1243_v4 = vpop.f32.mrf.mxu2 }
  0xef   :  { %v1256_v5 = vpop.f32.mrf.mxu3 }
  0xfe   :  { %v1267_v11 = vpop.f32.mrf.mxu0 }
  0xff   :  { %v1280_v12 = vpop.f32.mrf.mxu1  ;;  %v1268_v13 = vadd.f32 %v1267_v11, %v1255_v10 }
 0x101   :  { %v1281_v14 = vadd.f32 %v1280_v12, %v1268_v13 }
 0x106   :  { %v1293_v15 = vpop.f32.mrf.mxu2  ;;  %v1269_v18 = vpop.f32.mrf.mxu0 }
 0x107   :  { %v1306_v16 = vpop.f32.mrf.mxu3  ;;  %v1294_v17 = vadd.f32 %v1293_v15, %v1281_v14  ;;  %v1282_v19 = vpop.f32.mrf.mxu1 }
 0x109   :  { %v1307_v20 = vadd.f32 %v1306_v16, %v1294_v17 }
 0x10b   :  { %v1310_v21 = vrot.slane %v1307_v20, 4  ;;  %v1316_v22 = vmul.f32 %v1307_v20, %v1307_v20  ;;  %1326 = vst [vmem:[%s2451_s2] sm:$0xff] %v1307_v20 }
 0x10d   :  { %v1311_v23 = vadd.f32 %v1310_v21, %v1307_v20  ;;  %v1317_v24 = vrot.slane %v1316_v22, 4 }
 0x10e   :  { %v1295_v25 = vpop.f32.mrf.mxu2 }
 0x10f   :  { %v1308_v26 = vpop.f32.mrf.mxu3  ;;  %v1312_v27 = vrot.slane %v1311_v23, 2  ;;  %v1318_v28 = vadd.f32 %v1317_v24, %v1316_v22 }
 0x111   :  { %v1313_v29 = vadd.f32 %v1312_v27, %v1311_v23  ;;  %v1319_v30 = vrot.slane %v1318_v28, 2 }
 0x113   :  { %v1314_v31 = vrot.slane %v1313_v29, 1  ;;  %v1320_v32 = vadd.f32 %v1319_v30, %v1318_v28 }
 0x115   :  { %v1321_v33 = vrot.slane %v1320_v32, 1  ;;  %v1315_v34 = vadd.f32 %v1314_v31, %v1313_v29 }
 0x117   :  { %v1322_v35 = vadd.f32 %v1321_v33, %v1320_v32 }
 0x119   :  { %v1324_v36 = vsel %vm1323_vm0, %v1315_v34, %v1322_v35 }
 0x11a   :  { %1325 = vst [vmem:[#allocation2] sm:$0x3] %v1324_v36 }
 0x11b   :  { %1339 = dma.vmem_to_hbm [thread:$0]  %s1335_s15, 32, %s1337_s18, [#allocation3]  }
 0x11c   :  { %2012 = dma.done.wait [#allocation3], 32  }
 0x11d   :  { %2013 = vsyncadd [#allocation3], 4294967264 }
 0x11e   :  { %1346 = vsyncpa [#allocation3], 1 }

</bundles_post_ra>
